<compile_context>
chip_gen: v7x
topology: tpu7x:2x2x1
jax: 0.10.0
libtpu: 0.0.40
codegen_flags: <defaults>
</compile_context>

<pallas_src>
import functools

import jax
import jax.numpy as jnp
from jax.experimental import pallas as pl
from jax.experimental.pallas import tpu as pltpu

_LANE = 128          # vreg lane width (last dim)
_SUBLANE = 8         # vreg sublane count (second-to-last dim, f32)
_MAX_BATCH_TILE = 512


def _round_up(x, m):
    return ((x + m - 1) // m) * m


def _cdiv(a, b):
    return (a + b - 1) // b


def _pick_batch_tile(batch):
    """Near-balanced batch tiles, each a multiple of 8 and <= 512 rows.

    Big tiles amortize the ~0.35 us per-grid-step overhead; balancing them
    (instead of a fixed 512) avoids a nearly-all-padding trailing tile at
    awkward batch sizes (e.g. B=520).  Returns (tile, padded_batch).
    """
    bp8 = _round_up(max(batch, 1), _SUBLANE)
    n_tiles = _cdiv(bp8, _MAX_BATCH_TILE)
    tb = _round_up(_cdiv(bp8, n_tiles), _SUBLANE)
    return tb, tb * n_tiles


def _has_bf16_vector_units():
    """bf16 VPU/EUP exist on v6e (Trillium) and v7x; not on v5e and older."""
    try:
        kind = jax.devices()[0].device_kind.lower()
    except Exception:  # pragma: no cover - be conservative if query fails
        return False
    return not any(v in kind for v in ("v2", "v3", "v4", "v5"))


def _classifier_kernel(x_ref, w1_ref, b1_ref, w2_ref, b2_ref, o_ref, *,
                       bf16_epilogue):
    """Fused classifier head: Linear -> Mish -> Linear (dropout = identity)."""
    # First linear: bf16 x bf16 -> f32 accumulation on the MXU, f32 bias add.
    h = jnp.dot(x_ref[...], w1_ref[...], preferred_element_type=jnp.float32)
    h = h + b1_ref[...]

    # Mish(h) = h * tanh(softplus(h));  tanh(log1p(e)) = n / (n + 2) with
    # n = e * (e + 2), e = exp(h).  The e*(e+2) form avoids the catastrophic
    # cancellation of (1+e)^2 - 1 for very negative h.  The h > 20 fast path
    # (factor ~= 1) keeps exp() from overflowing and bounds the approx-recip
    # error for large h.
    if bf16_epilogue:
        # v6e/v7x: bf16 VPU + EUP -> run the transcendental chain in bf16
        # (halves vreg traffic); h itself and the final multiply stay f32.
        hc = jnp.minimum(h, 20.0).astype(jnp.bfloat16)
    else:
        # v5e: no bf16 VPU/EUP -> all-f32 epilogue.
        hc = jnp.minimum(h, 20.0)
    e = jnp.exp(hc)
    n = e * (e + 2.0)
    factor = n * pl.reciprocal(n + 2.0, approx=True)
    m = jnp.where(h > 20.0, h, h * factor.astype(jnp.float32))

    # Second linear (lane-padded classes): bf16 x bf16 -> f32 accumulation.
    out = jnp.dot(m.astype(jnp.bfloat16), w2_ref[...],
                  preferred_element_type=jnp.float32)
    o_ref[...] = out + b2_ref[...]


def classification_head(cls_tok, w1, b1, w2, b2, n_classes):
    """cls_tok: [B, H]; w1: [H, H] bf16; b1: [1, H] f32;
    w2: [H, Cp] bf16 (Cp = n_classes lane-padded to 128); b2: [1, Cp] f32.

    Returns logits [B, n_classes] in f32.
    """
    B, H = cls_tok.shape
    Cp = w2.shape[-1]

    # Zero-copy hot path: weights must be lane-padded + typed once at init.
    # (A per-call jnp.pad would add an extra HBM pass over W2 that rivals the
    # kernel's own weight DMA.)
    assert Cp % _LANE == 0 and Cp >= n_classes, (
        "w2/b2 must be lane-padded to a multiple of 128 classes at init "
        f"(got w2 shape {w2.shape}); build params with init_params().")
    assert w1.shape == (H, H) and b1.shape[-1] == H and b2.shape[-1] == Cp

    cls_tok = cls_tok.astype(jnp.bfloat16)       # no-op if already bf16
    w1 = w1.astype(jnp.bfloat16)                 # no-ops for init_params output
    w2 = w2.astype(jnp.bfloat16)
    b1 = b1.reshape(1, H).astype(jnp.float32)
    b2 = b2.reshape(1, Cp).astype(jnp.float32)

    # Batch tiling: sublane-pad, near-balanced tiles up to 512 rows.
    TB, Bp = _pick_batch_tile(B)
    if Bp != B:
        cls_tok = jnp.pad(cls_tok, ((0, Bp - B), (0, 0)))

    use_bf16_epilogue = _has_bf16_vector_units()

    def run(single_buffer_weights, bf16_epilogue):
        if single_buffer_weights:
            def resident(shape):
                # Constant index_map -> fetched exactly once; a single VMEM
                # buffer suffices (frees ~1 x W1 of dead double-buffer VMEM).
                return pl.BlockSpec(shape, lambda i: (0, 0),
                                    pipeline_mode=pl.Buffered(1))
        else:
            def resident(shape):
                return pl.BlockSpec(shape, lambda i: (0, 0))

        kernel = functools.partial(_classifier_kernel,
                                   bf16_epilogue=bf16_epilogue)
        return pl.pallas_call(
            kernel,
            out_shape=jax.ShapeDtypeStruct((Bp, Cp), jnp.float32),
            grid=(Bp // TB,),
            in_specs=[
                pl.BlockSpec((TB, H), lambda i: (i, 0)),  # CLS acts (batch-tiled)
                resident((H, H)),    # W1 (resident)
                resident((1, H)),    # b1
                resident((H, Cp)),   # W2 (lane-padded classes)
                resident((1, Cp)),   # b2
            ],
            out_specs=pl.BlockSpec((TB, Cp), lambda i: (i, 0)),
            compiler_params=pltpu.CompilerParams(
                # Batch tiles are independent -> megacore sharding on v7x.
                # TODO(synk): for tiny B on v7x, splitting W1's output columns
                # across the two TensorCores would halve per-core weight DMA;
                # kept batch-parallel here (wins when each core gets tiles).
                dimension_semantics=("parallel",),
            ),
        )(cls_tok, w1, b1, w2, b2)

    # Portability fallback: Buffered(1) / bf16 EUP ops may be unsupported on a
    # given jaxlib or chip generation; degrade gracefully to the known-good
    # double-buffered, all-f32-epilogue configuration.
    configs = []
    for cfg in ((True, use_bf16_epilogue), (True, False),
                (False, use_bf16_epilogue), (False, False)):
        if cfg not in configs:
            configs.append(cfg)
    out, last_err = None, None
    for sb, bf in configs:
        try:
            out = run(sb, bf)
            break
        except Exception as err:   # pragma: no cover - portability fallback
            last_err = err
    if out is None:
        raise last_err
    return out[:B, :n_classes]


def classification_model_forward(hidden_states, params):
    """Mirrors ClassificationModel.forward after the base model.

    hidden_states: [B, S, H] = base_model(X, attention_mask)[0]
    Returns logits [B, n_classes].
    """
    # CLS gather + bf16 cast left to XLA (tiny [B, H] copy, fuses with the cast).
    cls_tok = hidden_states[:, 0, :].astype(jnp.bfloat16)
    return classification_head(cls_tok, params["w1"], params["b1"],
                               params["w2"], params["b2"], params["n_classes"])


def init_params(key, hidden, n_classes):
    """Matches PyTorch init: weight ~ N(0, 0.02), bias = 0.

    Weights stored [in, out] in bf16 (MXU operands); biases in f32. W2/b2 are
    lane-padded to a multiple of 128 classes once, here, so the per-call hot
    path is zero-copy.
    """
    k1, k2 = jax.random.split(key)
    c_pad = _round_up(max(n_classes, _LANE), _LANE)
    w1 = (0.02 * jax.random.normal(k1, (hidden, hidden), jnp.float32)
          ).astype(jnp.bfloat16)
    b1 = jnp.zeros((1, hidden), jnp.float32)
    w2_core = 0.02 * jax.random.normal(k2, (hidden, n_classes), jnp.float32)
    w2 = jnp.pad(w2_core, ((0, 0), (0, c_pad - n_classes))).astype(jnp.bfloat16)
    b2 = jnp.zeros((1, c_pad), jnp.float32)
    return {"w1": w1, "b1": b1, "w2": w2, "b2": b2, "n_classes": n_classes}


if __name__ == "__main__":
    key = jax.random.PRNGKey(0)
    B, S, H, n_classes = 2, 8, 768, 6   # H = 768 as in the PyTorch default

    k_hs, k_params, k_b1, k_b2 = jax.random.split(key, 4)
    # Synthetic stand-in for base_model(X, attention_mask)[0].
    hidden_states = jax.random.normal(k_hs, (B, S, H), jnp.float32)
    params = init_params(k_params, H, n_classes)
    # PyTorch init zeroes the biases; perturb them here so the bias-add path
    # is actually exercised by the numeric check (padded b2 region stays 0).
    params["b1"] = 0.05 * jax.random.normal(k_b1, (1, H), jnp.float32)
    params["b2"] = params["b2"].at[:, :n_classes].set(
        0.05 * jax.random.normal(k_b2, (1, n_classes), jnp.float32))

    logits = classification_model_forward(hidden_states, params)
    logits = jax.block_until_ready(logits)
    assert logits.shape == (B, n_classes)

    # Pure-JAX reference with the same bf16 rounding of the MXU operands.
    f32 = lambda a: a.astype(jnp.float32)
    cls = f32(hidden_states[:, 0, :].astype(jnp.bfloat16))
    h = jnp.dot(cls, f32(params["w1"]),
                precision=jax.lax.Precision.HIGHEST) + params["b1"]
    m = h * jnp.tanh(jax.nn.softplus(h))
    ref = (jnp.dot(f32(m.astype(jnp.bfloat16)), f32(params["w2"]),
                   precision=jax.lax.Precision.HIGHEST)
           + params["b2"])[:, :n_classes]

    # Tolerance covers bf16 MXU operands, the approx reciprocal, and (on
    # v6e/v7x) the bf16 Mish transcendental chain.
    err = float(jnp.max(jnp.abs(logits - ref)))
    assert jnp.allclose(logits, ref, atol=2e-2, rtol=2e-2), ("max abs err", err)

    print("KERNEL_OK")
</pallas_src>

<mosaic_0001>
module attributes {stable_mosaic.version = 11 : i64} {
  func.func @_classifier_kernel(%arg0: i32, %arg1: memref<8x768xbf16, #tpu.memory_space<vmem>>, %arg2: memref<768x768xbf16, #tpu.memory_space<vmem>>, %arg3: memref<1x768xf32, #tpu.memory_space<vmem>>, %arg4: memref<768x128xbf16, #tpu.memory_space<vmem>>, %arg5: memref<1x128xf32, #tpu.memory_space<vmem>>, %arg6: memref<8x128xf32, #tpu.memory_space<vmem>>) attributes {dimension_semantics = [#tpu.dimension_semantics<parallel>], iteration_bounds = array<i64: 1>, scalar_prefetch = 0 : i64, scratch_operands = 0 : i64, tpu.core_type = #tpu.core_type<tc>, window_params = [{transform_indices = @transform_0, window_bounds = array<i64: 8, 768>}, {pipeline_mode = #tpu.pipeline_mode<synchronous>, transform_indices = @transform_1, window_bounds = array<i64: 768, 768>}, {pipeline_mode = #tpu.pipeline_mode<synchronous>, transform_indices = @transform_2, window_bounds = array<i64: 1, 768>}, {pipeline_mode = #tpu.pipeline_mode<synchronous>, transform_indices = @transform_3, window_bounds = array<i64: 768, 128>}, {pipeline_mode = #tpu.pipeline_mode<synchronous>, transform_indices = @transform_4, window_bounds = array<i64: 1, 128>}, {transform_indices = @transform_5, window_bounds = array<i64: 8, 128>}]} {
    %c0 = arith.constant 0 : index
    %c0_0 = arith.constant 0 : index
    %0 = vector.load %arg1[%c0, %c0_0] : memref<8x768xbf16, #tpu.memory_space<vmem>>, vector<8x768xbf16>
    %c0_1 = arith.constant 0 : index
    %c0_2 = arith.constant 0 : index
    %1 = vector.load %arg2[%c0_1, %c0_2] : memref<768x768xbf16, #tpu.memory_space<vmem>>, vector<768x768xbf16>
    %cst = arith.constant dense<0.000000e+00> : vector<8x768xf32>
    %2 = tpu.matmul %0, %1, %cst {dimension_numbers = #tpu.dot_dimension_numbers<[1], [0], [0], [1], [0, 0, 1, 1], [], []>} : vector<8x768xbf16>, vector<768x768xbf16>, vector<8x768xf32> -> vector<8x768xf32>
    %c0_3 = arith.constant 0 : index
    %c0_4 = arith.constant 0 : index
    %3 = vector.load %arg3[%c0_3, %c0_4] : memref<1x768xf32, #tpu.memory_space<vmem>>, vector<1x768xf32>
    %4 = vector.broadcast %3 : vector<1x768xf32> to vector<8x768xf32>
    %5 = arith.addf %2, %4 : vector<8x768xf32>
    %cst_5 = arith.constant 2.000000e+01 : f32
    %6 = vector.broadcast %cst_5 : f32 to vector<8x768xf32>
    %7 = arith.minimumf %5, %6 : vector<8x768xf32>
    %8 = math.exp %7 : vector<8x768xf32>
    %cst_6 = arith.constant 2.000000e+00 : f32
    %9 = vector.broadcast %cst_6 : f32 to vector<8x768xf32>
    %10 = arith.addf %8, %9 : vector<8x768xf32>
    %11 = arith.mulf %8, %10 : vector<8x768xf32>
    %cst_7 = arith.constant 2.000000e+00 : f32
    %12 = vector.broadcast %cst_7 : f32 to vector<8x768xf32>
    %13 = arith.addf %11, %12 : vector<8x768xf32>
    %14 = tpu.reciprocal %13 {approx = true} : vector<8x768xf32> -> vector<8x768xf32>
    %15 = arith.mulf %11, %14 : vector<8x768xf32>
    %cst_8 = arith.constant 2.000000e+01 : f32
    %16 = vector.broadcast %cst_8 : f32 to vector<8x768xf32>
    %17 = arith.cmpf ogt, %5, %16 : vector<8x768xf32>
    %18 = arith.mulf %5, %15 : vector<8x768xf32>
    %19 = arith.select %17, %5, %18 : vector<8x768xi1>, vector<8x768xf32>
    %20 = arith.truncf %19 : vector<8x768xf32> to vector<8x768xbf16>
    %c0_9 = arith.constant 0 : index
    %c0_10 = arith.constant 0 : index
    %21 = vector.load %arg4[%c0_9, %c0_10] : memref<768x128xbf16, #tpu.memory_space<vmem>>, vector<768x128xbf16>
    %cst_11 = arith.constant dense<0.000000e+00> : vector<8x128xf32>
    %22 = tpu.matmul %20, %21, %cst_11 {dimension_numbers = #tpu.dot_dimension_numbers<[1], [0], [0], [1], [0, 0, 1, 1], [], []>} : vector<8x768xbf16>, vector<768x128xbf16>, vector<8x128xf32> -> vector<8x128xf32>
    %c0_12 = arith.constant 0 : index
    %c0_13 = arith.constant 0 : index
    %23 = vector.load %arg5[%c0_12, %c0_13] : memref<1x128xf32, #tpu.memory_space<vmem>>, vector<1x128xf32>
    %24 = vector.broadcast %23 : vector<1x128xf32> to vector<8x128xf32>
    %25 = arith.addf %22, %24 : vector<8x128xf32>
    %c0_14 = arith.constant 0 : index
    %c0_15 = arith.constant 0 : index
    %26 = vector.load %arg6[%c0_14, %c0_15] : memref<8x128xf32, #tpu.memory_space<vmem>>, vector<8x128xf32>
    tpu.vector_store %arg6[%c0_14, %c0_15], %25 {strides = array<i32>} : memref<8x128xf32, #tpu.memory_space<vmem>>, vector<8x128xf32>,
    return
  }
  func.func @transform_0(%arg0: i32) -> (i32, i32) {
    %c0_i32 = arith.constant 0 : i32
    %c0_i32_0 = arith.constant 0 : i32
    return %arg0, %c0_i32 : i32, i32
  }
  func.func @transform_1(%arg0: i32) -> (i32, i32) {
    %c0_i32 = arith.constant 0 : i32
    %c0_i32_0 = arith.constant 0 : i32
    %c0_i32_1 = arith.constant 0 : i32
    return %c0_i32, %c0_i32_0 : i32, i32
  }
  func.func @transform_2(%arg0: i32) -> (i32, i32) {
    %c0_i32 = arith.constant 0 : i32
    %c0_i32_0 = arith.constant 0 : i32
    %c0_i32_1 = arith.constant 0 : i32
    return %c0_i32, %c0_i32_0 : i32, i32
  }
  func.func @transform_3(%arg0: i32) -> (i32, i32) {
    %c0_i32 = arith.constant 0 : i32
    %c0_i32_0 = arith.constant 0 : i32
    %c0_i32_1 = arith.constant 0 : i32
    return %c0_i32, %c0_i32_0 : i32, i32
  }
  func.func @transform_4(%arg0: i32) -> (i32, i32) {
    %c0_i32 = arith.constant 0 : i32
    %c0_i32_0 = arith.constant 0 : i32
    %c0_i32_1 = arith.constant 0 : i32
    return %c0_i32, %c0_i32_0 : i32, i32
  }
  func.func @transform_5(%arg0: i32) -> (i32, i32) {
    %c0_i32 = arith.constant 0 : i32
    %c0_i32_0 = arith.constant 0 : i32
    return %arg0, %c0_i32 : i32, i32
  }
}

module attributes {stable_mosaic.version = 11 : i64} {
  func.func @_classifier_kernel(%arg0: i32, %arg1: memref<8x768xbf16, #tpu.memory_space<vmem>>, %arg2: memref<768x768xbf16, #tpu.memory_space<vmem>>, %arg3: memref<1x768xf32, #tpu.memory_space<vmem>>, %arg4: memref<768x128xbf16, #tpu.memory_space<vmem>>, %arg5: memref<1x128xf32, #tpu.memory_space<vmem>>, %arg6: memref<8x128xf32, #tpu.memory_space<vmem>>) attributes {dimension_semantics = [#tpu.dimension_semantics<parallel>], iteration_bounds = array<i64: 1>, scalar_prefetch = 0 : i64, scratch_operands = 0 : i64, tpu.core_type = #tpu.core_type<tc>, window_params = [{transform_indices = @transform_0, window_bounds = array<i64: 8, 768>}, {pipeline_mode = #tpu.pipeline_mode<synchronous>, transform_indices = @transform_1, window_bounds = array<i64: 768, 768>}, {pipeline_mode = #tpu.pipeline_mode<synchronous>, transform_indices = @transform_2, window_bounds = array<i64: 1, 768>}, {pipeline_mode = #tpu.pipeline_mode<synchronous>, transform_indices = @transform_3, window_bounds = array<i64: 768, 128>}, {pipeline_mode = #tpu.pipeline_mode<synchronous>, transform_indices = @transform_4, window_bounds = array<i64: 1, 128>}, {transform_indices = @transform_5, window_bounds = array<i64: 8, 128>}]} {
    %c0 = arith.constant 0 : index
    %c0_0 = arith.constant 0 : index
    %0 = vector.load %arg1[%c0, %c0_0] : memref<8x768xbf16, #tpu.memory_space<vmem>>, vector<8x768xbf16>
    %c0_1 = arith.constant 0 : index
    %c0_2 = arith.constant 0 : index
    %1 = vector.load %arg2[%c0_1, %c0_2] : memref<768x768xbf16, #tpu.memory_space<vmem>>, vector<768x768xbf16>
    %cst = arith.constant dense<0.000000e+00> : vector<8x768xf32>
    %2 = tpu.matmul %0, %1, %cst {dimension_numbers = #tpu.dot_dimension_numbers<[1], [0], [0], [1], [0, 0, 1, 1], [], []>} : vector<8x768xbf16>, vector<768x768xbf16>, vector<8x768xf32> -> vector<8x768xf32>
    %c0_3 = arith.constant 0 : index
    %c0_4 = arith.constant 0 : index
    %3 = vector.load %arg3[%c0_3, %c0_4] : memref<1x768xf32, #tpu.memory_space<vmem>>, vector<1x768xf32>
    %4 = vector.broadcast %3 : vector<1x768xf32> to vector<8x768xf32>
    %5 = arith.addf %2, %4 : vector<8x768xf32>
    %cst_5 = arith.constant 2.000000e+01 : f32
    %6 = vector.broadcast %cst_5 : f32 to vector<8x768xf32>
    %7 = arith.minimumf %5, %6 : vector<8x768xf32>
    %8 = math.exp %7 : vector<8x768xf32>
    %cst_6 = arith.constant 2.000000e+00 : f32
    %9 = vector.broadcast %cst_6 : f32 to vector<8x768xf32>
    %10 = arith.addf %8, %9 : vector<8x768xf32>
    %11 = arith.mulf %8, %10 : vector<8x768xf32>
    %cst_7 = arith.constant 2.000000e+00 : f32
    %12 = vector.broadcast %cst_7 : f32 to vector<8x768xf32>
    %13 = arith.addf %11, %12 : vector<8x768xf32>
    %14 = tpu.reciprocal %13 {approx = true} : vector<8x768xf32> -> vector<8x768xf32>
    %15 = arith.mulf %11, %14 : vector<8x768xf32>
    %cst_8 = arith.constant 2.000000e+01 : f32
    %16 = vector.broadcast %cst_8 : f32 to vector<8x768xf32>
    %17 = arith.cmpf ogt, %5, %16 : vector<8x768xf32>
    %18 = arith.mulf %5, %15 : vector<8x768xf32>
    %19 = arith.select %17, %5, %18 : vector<8x768xi1>, vector<8x768xf32>
    %20 = arith.truncf %19 : vector<8x768xf32> to vector<8x768xbf16>
    %c0_9 = arith.constant 0 : index
    %c0_10 = arith.constant 0 : index
    %21 = vector.load %arg4[%c0_9, %c0_10] : memref<768x128xbf16, #tpu.memory_space<vmem>>, vector<768x128xbf16>
    %cst_11 = arith.constant dense<0.000000e+00> : vector<8x128xf32>
    %22 = tpu.matmul %20, %21, %cst_11 {dimension_numbers = #tpu.dot_dimension_numbers<[1], [0], [0], [1], [0, 0, 1, 1], [], []>} : vector<8x768xbf16>, vector<768x128xbf16>, vector<8x128xf32> -> vector<8x128xf32>
    %c0_12 = arith.constant 0 : index
    %c0_13 = arith.constant 0 : index
    %23 = vector.load %arg5[%c0_12, %c0_13] : memref<1x128xf32, #tpu.memory_space<vmem>>, vector<1x128xf32>
    %24 = vector.broadcast %23 : vector<1x128xf32> to vector<8x128xf32>
    %25 = arith.addf %22, %24 : vector<8x128xf32>
    %c0_14 = arith.constant 0 : index
    %c0_15 = arith.constant 0 : index
    %26 = vector.load %arg6[%c0_14, %c0_15] : memref<8x128xf32, #tpu.memory_space<vmem>>, vector<8x128xf32>
    tpu.vector_store %arg6[%c0_14, %c0_15], %25 {strides = array<i32>} : memref<8x128xf32, #tpu.memory_space<vmem>>, vector<8x128xf32>,
    return
  }
  func.func @transform_0(%arg0: i32) -> (i32, i32) {
    %c0_i32 = arith.constant 0 : i32
    %c0_i32_0 = arith.constant 0 : i32
    return %arg0, %c0_i32 : i32, i32
  }
  func.func @transform_1(%arg0: i32) -> (i32, i32) {
    %c0_i32 = arith.constant 0 : i32
    %c0_i32_0 = arith.constant 0 : i32
    %c0_i32_1 = arith.constant 0 : i32
    return %c0_i32, %c0_i32_0 : i32, i32
  }
  func.func @transform_2(%arg0: i32) -> (i32, i32) {
    %c0_i32 = arith.constant 0 : i32
    %c0_i32_0 = arith.constant 0 : i32
    %c0_i32_1 = arith.constant 0 : i32
    return %c0_i32, %c0_i32_0 : i32, i32
  }
  func.func @transform_3(%arg0: i32) -> (i32, i32) {
    %c0_i32 = arith.constant 0 : i32
    %c0_i32_0 = arith.constant 0 : i32
    %c0_i32_1 = arith.constant 0 : i32
    return %c0_i32, %c0_i32_0 : i32, i32
  }
  func.func @transform_4(%arg0: i32) -> (i32, i32) {
    %c0_i32 = arith.constant 0 : i32
    %c0_i32_0 = arith.constant 0 : i32
    %c0_i32_1 = arith.constant 0 : i32
    return %c0_i32, %c0_i32_0 : i32, i32
  }
  func.func @transform_5(%arg0: i32) -> (i32, i32) {
    %c0_i32 = arith.constant 0 : i32
    %c0_i32_0 = arith.constant 0 : i32
    return %arg0, %c0_i32 : i32, i32
  }
}

</mosaic_0001>

<bundles_post_ra>
// kernel: tpu_custom_call.1
= control target key start
LH: loop header
LB: loop body
LE: loop exit
PB: predicated region body
PF: predicated region fallthrough
CT: control target
= control target key end

     0   :  { %10 = vsyncpa [#allocation3], 0  ;;  %s4099_s0 = inlined_call_operand.hbm [shape: bf16[8,768], index: 0, kind: input, shape index: {}]   ;;  %s4100_s1 = inlined_call_operand.hbm [shape: bf16[768,768], index: 1, kind: input, shape index: {}]   ;;  %s4101_s2 = inlined_call_operand.hbm [shape: f32[1,768], index: 2, kind: input, shape index: {}]   ;;  %s4102_s3 = inlined_call_operand.hbm [shape: bf16[768,128], index: 3, kind: input, shape index: {}]   ;;  %s4103_s4 = inlined_call_operand.hbm [shape: f32[1,128], index: 4, kind: input, shape index: {}]   ;;  %s4104_s5 = inlined_call_operand.hbm [shape: f32[8,128], index: 5, kind: output, shape index: {}]  }
   0x1   :  { %11 = vsyncpa [#allocation6], 0 }
   0x2   :  { %12 = vsyncpa [#allocation9], 0 }
   0x3   :  { %13 = vsyncpa [#allocation4], 0  ;;  %s3935_s18 = smov [#allocation5]   ;;  %s3795_s22 = scalar_lea.hbm %s4100_s1, 36864 }
   0x4   :  { %s29_s19 = sshll.u32 %s3935_s18, 4  ;;  %p3796_p0 = scmp.ne.s32.totalorder %s4100_s1, %s3795_s22  ;;  %s30_s19 = int_to_ptr.vmem [resolvable:$true] %s29_s19 }
   0x5   :  { %p3799_p1 = scmp.lt.u32.totalorder %s3795_s22, %s4100_s1 }
   0x7   :  { %p3801_p2 = pnand %p3799_p1, %p3796_p0 }
   0x9   :  { %3804 = shalt.err (!%p3801_p2)
}
   0xa   :  { %s3805_s27 = scalar_lea.vmem %s30_s19, 36864  ;;  %p3810_p4 = scmp.lt.s32.totalorder %s30_s19, %s30_s19 }
   0xb   :  { %p3806_p3 = scmp.ne.s32.totalorder %s30_s19, %s3805_s27  ;;  %p3811_p5 = scmp.lt.s32.totalorder %s3805_s27, %s3805_s27 }
   0xd   :  { %p3812_p6 = por %p3811_p5, %p3810_p4 }
   0xf   :  { %p3813_p7 = pnand %p3812_p6, %p3806_p3 }
  0x11   :  { %3816 = shalt.err (!%p3813_p7)
}
  0x12   :  { %s3936_s28 = smov 384   ;;  %s3937_s29 = smov 24  }
  0x13   :  { %35 = dma.hbm_to_vmem [thread:$0]  %s4100_s1, 36864, %s30_s19, [#allocation6], %s3936_s28, %s3936_s28, %s3937_s29  }
  0x14   :  { %s3938_s7 = smov [#allocation8]   ;;  %s3817_s11 = scalar_lea.hbm %s4102_s3, 6144 }
  0x15   :  { %s51_s8 = sshll.u32 %s3938_s7, 4  ;;  %p3818_p8 = scmp.ne.s32.totalorder %s4102_s3, %s3817_s11  ;;  %s52_s8 = int_to_ptr.vmem [resolvable:$true] %s51_s8 }
  0x16   :  { %p3821_p9 = scmp.lt.u32.totalorder %s3817_s11, %s4102_s3 }
  0x18   :  { %p3823_p10 = pnand %p3821_p9, %p3818_p8 }
  0x1a   :  { %3826 = shalt.err (!%p3823_p10)
}
  0x1b   :  { %s3827_s16 = scalar_lea.vmem %s52_s8, 6144  ;;  %p3832_p12 = scmp.lt.s32.totalorder %s52_s8, %s52_s8 }
  0x1c   :  { %p3828_p11 = scmp.ne.s32.totalorder %s52_s8, %s3827_s16  ;;  %p3833_p13 = scmp.lt.s32.totalorder %s3827_s16, %s3827_s16 }
  0x1e   :  { %p3834_p0 = por %p3833_p13, %p3832_p12 }
  0x20   :  { %p3835_p1 = pnand %p3834_p0, %p3828_p11 }
  0x22   :  { %3838 = shalt.err (!%p3835_p1)
}
  0x23   :  { %s3939_s1 = smov 64   ;;  %s3940_s17 = smov 4  }
  0x24   :  { %57 = dma.hbm_to_vmem [thread:$0]  %s4102_s3, 6144, %s52_s8, [#allocation9], %s3939_s1, %s3939_s1, %s3940_s17  }
  0x25   :  { %s3941_s20 = smov [#allocation2]   ;;  %s3942_s22 = smov [#allocation7]  }
  0x26   :  { %s20_s21 = sshll.u32 %s3941_s20, 4  ;;  %s42_s23 = sshll.u32 %s3942_s22, 4  ;;  %s21_s21 = int_to_ptr.vmem [resolvable:$true] %s20_s21  ;;  %s43_s23 = int_to_ptr.vmem [resolvable:$true] %s42_s23 }
  0x27   :  { %s3839_s26 = scalar_lea.hbm %s4099_s0, 384 }
  0x28   :  { %p3840_p2 = scmp.ne.s32.totalorder %s4099_s0, %s3839_s26  ;;  %p3843_p3 = scmp.lt.u32.totalorder %s3839_s26, %s4099_s0 }
  0x2a   :  { %p3845_p4 = pnand %p3843_p3, %p3840_p2 }
  0x2c   :  { %3848 = shalt.err (!%p3845_p4)
}
  0x2d   :  { %s3849_s3 = scalar_lea.vmem %s21_s21, 384  ;;  %p3854_p6 = scmp.lt.s32.totalorder %s21_s21, %s21_s21 }
  0x2e   :  { %p3850_p5 = scmp.ne.s32.totalorder %s21_s21, %s3849_s3  ;;  %p3855_p7 = scmp.lt.s32.totalorder %s3849_s3, %s3849_s3 }
  0x30   :  { %p3856_p8 = por %p3855_p7, %p3854_p6 }
  0x32   :  { %p3857_p9 = pnand %p3856_p8, %p3850_p5 }
  0x34   :  { %3860 = shalt.err (!%p3857_p9)
}
  0x35   :  { %23 = dma.hbm_to_vmem [thread:$0]  %s4099_s0, 384, %s21_s21, [#allocation3]  }
  0x36   :  { %s3861_s10 = scalar_lea.hbm %s4101_s2, 96 }
  0x37   :  { %p3862_p10 = scmp.ne.s32.totalorder %s4101_s2, %s3861_s10  ;;  %p3865_p11 = scmp.lt.u32.totalorder %s3861_s10, %s4101_s2 }
  0x39   :  { %p3867_p12 = pnand %p3865_p11, %p3862_p10 }
  0x3b   :  { %3870 = shalt.err (!%p3867_p12)
}
  0x3c   :  { %s3871_s15 = scalar_lea.vmem %s43_s23, 96  ;;  %p3876_p0 = scmp.lt.s32.totalorder %s43_s23, %s43_s23 }
  0x3d   :  { %p3872_p13 = scmp.ne.s32.totalorder %s43_s23, %s3871_s15  ;;  %p3877_p1 = scmp.lt.s32.totalorder %s3871_s15, %s3871_s15 }
  0x3f   :  { %p3878_p2 = por %p3877_p1, %p3876_p0 }
  0x41   :  { %p3879_p3 = pnand %p3878_p2, %p3872_p13 }
  0x43   :  { %3882 = shalt.err (!%p3879_p3)
}
  0x44   :  { %45 = dma.hbm_to_vmem [thread:$0]  %s4101_s2, 96, %s43_s23, [#allocation6]  }
  0x45   :  { %s3943_s1 = smov [#allocation10]   ;;  %s3883_s20 = scalar_lea.hbm %s4103_s4, 16 }
  0x46   :  { %s64_s17 = sshll.u32 %s3943_s1, 4  ;;  %p3884_p4 = scmp.ne.s32.totalorder %s4103_s4, %s3883_s20  ;;  %s65_s17 = int_to_ptr.vmem [resolvable:$true] %s64_s17 }
  0x47   :  { %p3887_p5 = scmp.lt.u32.totalorder %s3883_s20, %s4103_s4 }
  0x49   :  { %p3889_p6 = pnand %p3887_p5, %p3884_p4 }
  0x4b   :  { %3892 = shalt.err (!%p3889_p6)
}
  0x4c   :  { %s3893_s26 = scalar_lea.vmem %s65_s17, 16  ;;  %s3897_s2 = scalar_lea.vmem %s65_s17, 32 }
  0x4d   :  { %p3894_p7 = scmp.ne.s32.totalorder %s65_s17, %s3893_s26  ;;  %p3898_p8 = scmp.lt.s32.totalorder %s65_s17, %s65_s17 }
  0x4e   :  { %p3899_p9 = scmp.lt.s32.totalorder %s3897_s2, %s3893_s26 }
  0x50   :  { %p3900_p10 = por %p3899_p9, %p3898_p8 }
  0x52   :  { %p3901_p11 = pnand %p3900_p10, %p3894_p7 }
  0x54   :  { %3904 = shalt.err (!%p3901_p11)
}
  0x55   :  { %67 = dma.hbm_to_vmem [thread:$0]  %s4103_s4, 16, %s65_s17, [#allocation9]  }
  0x56   :  { %3927 = dma.done.wait [#allocation3], 384  }
  0x57   :  { %3928 = vsyncadd [#allocation3], 4294966912 }
  0x58   :  { %3929 = dma.done.wait [#allocation6], 36960  }
  0x59   :  { %3930 = vsyncadd [#allocation6], 4294930336 }
  0x5a   :  { %3931 = dma.done.wait [#allocation9], 6160  }
  0x5b   :  { %3932 = vsyncadd [#allocation9], 4294961136  ;;  %v3285_v0 = vld [vmem:[#allocation5 + $0x4] ss:$24 sps:$4 sm:$0xff]   ;;  %v3289_v2 = vld [vmem:[#allocation5] ss:$24 sps:$4 sm:$0xff]  }
  0x5c   :  { %v3287_v1 = vld [vmem:[#allocation5 + $0x304] ss:$24 sps:$4 sm:$0xff]   ;;  %1868 = vmatprep.subr.bf16.mxu1 %v3285_v0  ;;  %v3290_v3 = vld [vmem:[#allocation5 + $0x300] ss:$24 sps:$4 sm:$0xff]   ;;  %v3291_v4 = vld [vmem:[#allocation5 + $0x34] ss:$24 sps:$4 sm:$0xff]  }
  0x5d   :  { %1909 = vmatprep.subr.bf16.mxu0 %v3287_v1  ;;  %1869 = vmatpush1.bf16.msra.mxu1 %v3289_v2  ;;  %v3293_v5 = vld [vmem:[#allocation5 + $0x334] ss:$24 sps:$4 sm:$0xff]   ;;  %v3295_v6 = vld [vmem:[#allocation5 + $0x30] ss:$24 sps:$4 sm:$0xff]   ;;  %v3297_v8 = vld [vmem:[#allocation5 + $0x64] ss:$24 sps:$4 sm:$0xff]  }
  0x5e   :  { %1910 = vmatpush1.bf16.msra.mxu0 %v3290_v3  ;;  %1870 = vmatprep.subr.bf16.mxu1 %v3291_v4  ;;  %v3296_v7 = vld [vmem:[#allocation5 + $0x330] ss:$24 sps:$4 sm:$0xff]   ;;  %v3299_v9 = vld [vmem:[#allocation5 + $0x364] ss:$24 sps:$4 sm:$0xff]   ;;  %v3301_v10 = vld [vmem:[#allocation5 + $0x60] ss:$24 sps:$4 sm:$0xff]  }
  0x5f   :  { %1911 = vmatprep.subr.bf16.mxu0 %v3293_v5  ;;  %v3302_v11 = vld [vmem:[#allocation5 + $0x360] ss:$24 sps:$4 sm:$0xff]   ;;  %v3303_v12 = vld [vmem:[#allocation5 + $0x94] ss:$24 sps:$4 sm:$0xff]   ;;  %v3307_v14 = vld [vmem:[#allocation5 + $0x90] ss:$24 sps:$4 sm:$0xff]  }
  0x60   :  { %v3305_v13 = vld [vmem:[#allocation5 + $0x394] ss:$24 sps:$4 sm:$0xff]   ;;  %v3308_v15 = vld [vmem:[#allocation5 + $0x390] ss:$24 sps:$4 sm:$0xff]   ;;  %v3309_v16 = vld [vmem:[#allocation5 + $0xc4] ss:$24 sps:$4 sm:$0xff]  }
  0x61   :  { %1871 = vmatpush1.bf16.msra.mxu1 %v3295_v6  ;;  %v3311_v17 = vld [vmem:[#allocation5 + $0x3c4] ss:$24 sps:$4 sm:$0xff]   ;;  %v3313_v18 = vld [vmem:[#allocation5 + $0xc0] ss:$24 sps:$4 sm:$0xff]   ;;  %v3315_v20 = vld [vmem:[#allocation5 + $0xf4] ss:$24 sps:$4 sm:$0xff]  }
  0x62   :  { %1912 = vmatpush1.bf16.msra.mxu0 %v3296_v7  ;;  %1872 = vmatprep.subr.bf16.mxu1 %v3297_v8  ;;  %v3314_v19 = vld [vmem:[#allocation5 + $0x3c0] ss:$24 sps:$4 sm:$0xff]   ;;  %v3317_v21 = vld [vmem:[#allocation5 + $0x3f4] ss:$24 sps:$4 sm:$0xff]   ;;  %v3319_v22 = vld [vmem:[#allocation5 + $0xf0] ss:$24 sps:$4 sm:$0xff]  }
  0x63   :  { %1913 = vmatprep.subr.bf16.mxu0 %v3299_v9  ;;  %v3320_v23 = vld [vmem:[#allocation5 + $0x3f0] ss:$24 sps:$4 sm:$0xff]   ;;  %v3321_v24 = vld [vmem:[#allocation5 + $0x124] ss:$24 sps:$4 sm:$0xff]   ;;  %v3325_v26 = vld [vmem:[#allocation5 + $0x120] ss:$24 sps:$4 sm:$0xff]  }
  0x64   :  { %v3323_v25 = vld [vmem:[#allocation5 + $0x424] ss:$24 sps:$4 sm:$0xff]   ;;  %v3326_v27 = vld [vmem:[#allocation5 + $0x420] ss:$24 sps:$4 sm:$0xff]   ;;  %v3327_v28 = vld [vmem:[#allocation5 + $0x154] ss:$24 sps:$4 sm:$0xff]  }
  0x65   :  { %1873 = vmatpush1.bf16.msra.mxu1 %v3301_v10  ;;  %v3329_v29 = vld [vmem:[#allocation5 + $0x454] ss:$24 sps:$4 sm:$0xff]   ;;  %v3331_v30 = vld [vmem:[#allocation5 + $0x150] ss:$24 sps:$4 sm:$0xff]   ;;  %v3333_v32 = vld [vmem:[#allocation5 + $0x184] ss:$24 sps:$4 sm:$0xff]  }
  0x66   :  { %1914 = vmatpush1.bf16.msra.mxu0 %v3302_v11  ;;  %1874 = vmatprep.subr.bf16.mxu1 %v3303_v12  ;;  %v3332_v31 = vld [vmem:[#allocation5 + $0x450] ss:$24 sps:$4 sm:$0xff]   ;;  %v3335_v33 = vld [vmem:[#allocation5 + $0x484] ss:$24 sps:$4 sm:$0xff]   ;;  %v3337_v34 = vld [vmem:[#allocation5 + $0x180] ss:$24 sps:$4 sm:$0xff]  }
  0x67   :  { %1915 = vmatprep.subr.bf16.mxu0 %v3305_v13  ;;  %v3338_v35 = vld [vmem:[#allocation5 + $0x480] ss:$24 sps:$4 sm:$0xff]   ;;  %v3339_v36 = vld [vmem:[#allocation5 + $0x1b4] ss:$24 sps:$4 sm:$0xff]   ;;  %v3343_v38 = vld [vmem:[#allocation5 + $0x1b0] ss:$24 sps:$4 sm:$0xff]  }
  0x68   :  { %v3341_v37 = vld [vmem:[#allocation5 + $0x4b4] ss:$24 sps:$4 sm:$0xff]   ;;  %v3344_v39 = vld [vmem:[#allocation5 + $0x4b0] ss:$24 sps:$4 sm:$0xff]   ;;  %v3345_v40 = vld [vmem:[#allocation5 + $0x1e4] ss:$24 sps:$4 sm:$0xff]  }
  0x69   :  { %1875 = vmatpush1.bf16.msra.mxu1 %v3307_v14  ;;  %v3347_v41 = vld [vmem:[#allocation5 + $0x4e4] ss:$24 sps:$4 sm:$0xff]   ;;  %v3349_v42 = vld [vmem:[#allocation5 + $0x1e0] ss:$24 sps:$4 sm:$0xff]   ;;  %v3351_v44 = vld [vmem:[#allocation5 + $0x214] ss:$24 sps:$4 sm:$0xff]  }
  0x6a   :  { %1916 = vmatpush1.bf16.msra.mxu0 %v3308_v15  ;;  %1876 = vmatprep.subr.bf16.mxu1 %v3309_v16  ;;  %v3350_v43 = vld [vmem:[#allocation5 + $0x4e0] ss:$24 sps:$4 sm:$0xff]   ;;  %v3353_v45 = vld [vmem:[#allocation5 + $0x514] ss:$24 sps:$4 sm:$0xff]   ;;  %v3355_v49 = vld [vmem:[#allocation5 + $0x210] ss:$24 sps:$4 sm:$0xff]  }
  0x6b   :  { %1917 = vmatprep.subr.bf16.mxu0 %v3311_v17  ;;  %v84_v46 = vld [vmem:[#allocation2] sm:$0xff]  ;;  %v85_v48 = vld [vmem:[#allocation2 + $0x8] sm:$0xff]  ;;  %v3357_v52 = vld [vmem:[#allocation5 + $0x244] ss:$24 sps:$4 sm:$0xff]   ;;  %s3944_s4 = smov [#allocation11]  }
  0x6c   :  { %v4035_v47 = vcombine.high %v84_v46, %v84_v46  ;;  %v3356_v50 = vld [vmem:[#allocation5 + $0x510] ss:$24 sps:$4 sm:$0xff]   ;;  %v4037_v51 = vcombine.high %v85_v48, %v85_v48  ;;  %v3359_v53 = vld [vmem:[#allocation5 + $0x544] ss:$24 sps:$4 sm:$0xff]   ;;  %v3361_v54 = vld [vmem:[#allocation5 + $0x240] ss:$24 sps:$4 sm:$0xff]   ;;  %v4041_v6 = vcombine.low %v84_v46, %v84_v46  ;;  %v4043_v7 = vcombine.low %v85_v48, %v85_v48 }
  0x6d   :  { %1877 = vmatpush1.bf16.msra.mxu1 %v3313_v18  ;;  %v3362_v55 = vld [vmem:[#allocation5 + $0x540] ss:$24 sps:$4 sm:$0xff]   ;;  %v3363_v56 = vld [vmem:[#allocation5 + $0x274] ss:$24 sps:$4 sm:$0xff]   ;;  %v3367_v58 = vld [vmem:[#allocation5 + $0x270] ss:$24 sps:$4 sm:$0xff]  }
  0x6e   :  { %1918 = vmatpush1.bf16.msra.mxu0 %v3314_v19  ;;  %1878 = vmatprep.subr.bf16.mxu1 %v3315_v20  ;;  %v3365_v57 = vld [vmem:[#allocation5 + $0x574] ss:$24 sps:$4 sm:$0xff]   ;;  %v3368_v59 = vld [vmem:[#allocation5 + $0x570] ss:$24 sps:$4 sm:$0xff]   ;;  %v3369_v60 = vld [vmem:[#allocation5 + $0x2a4] ss:$24 sps:$4 sm:$0xff]  }
  0x6f   :  { %1919 = vmatprep.subr.bf16.mxu0 %v3317_v21  ;;  %1900 = vmatprep.mubr.bf16.mxu1 %v4035_v47  ;;  %v3371_v61 = vld [vmem:[#allocation5 + $0x5a4] ss:$24 sps:$4 sm:$0xff]   ;;  %v3373_v62 = vld [vmem:[#allocation5 + $0x2a0] ss:$24 sps:$4 sm:$0xff]   ;;  %v3375_v0 = vld [vmem:[#allocation5 + $0x2d4] ss:$24 sps:$4 sm:$0xff]  }
  0x70   :  { %1941 = vmatprep.mubr.bf16.mxu0 %v4037_v51  ;;  %v3374_v63 = vld [vmem:[#allocation5 + $0x5a0] ss:$24 sps:$4 sm:$0xff]   ;;  %v3377_v1 = vld [vmem:[#allocation5 + $0x5d4] ss:$24 sps:$4 sm:$0xff]   ;;  %v3379_v2 = vld [vmem:[#allocation5 + $0x2d0] ss:$24 sps:$4 sm:$0xff]  }
  0x71   :  { %1879 = vmatpush1.bf16.msra.mxu1 %v3319_v22  ;;  %v3380_v3 = vld [vmem:[#allocation5 + $0x5d0] ss:$24 sps:$4 sm:$0xff]   ;;  %v3385_v4 = vld [vmem:[#allocation5 + $0x604] ss:$24 sps:$4 sm:$0xff]   ;;  %v3383_v8 = vld [vmem:[#allocation5 + $0x600] ss:$24 sps:$4 sm:$0xff]  }
  0x72   :  { %1920 = vmatpush1.bf16.msra.mxu0 %v3320_v23  ;;  %1880 = vmatprep.subr.bf16.mxu1 %v3321_v24  ;;  %v3388_v5 = vld [vmem:[#allocation5 + $0xc] ss:$24 sps:$4 sm:$0xff]   ;;  %v3386_v9 = vld [vmem:[#allocation5 + $0x8] ss:$24 sps:$4 sm:$0xff]   ;;  %v3396_v11 = vld [vmem:[#allocation5 + $0x3c] ss:$24 sps:$4 sm:$0xff]  }
  0x73   :  { %1921 = vmatprep.subr.bf16.mxu0 %v3323_v25  ;;  %v3393_v10 = vld [vmem:[#allocation5 + $0x634] ss:$24 sps:$4 sm:$0xff]   ;;  %v3391_v12 = vld [vmem:[#allocation5 + $0x630] ss:$24 sps:$4 sm:$0xff]   ;;  %v3399_v14 = vld [vmem:[#allocation5 + $0x664] ss:$24 sps:$4 sm:$0xff]  }
  0x74   :  { %v3394_v13 = vld [vmem:[#allocation5 + $0x38] ss:$24 sps:$4 sm:$0xff]   ;;  %v3402_v15 = vld [vmem:[#allocation5 + $0x6c] ss:$24 sps:$4 sm:$0xff]   ;;  %v3400_v17 = vld [vmem:[#allocation5 + $0x68] ss:$24 sps:$4 sm:$0xff]  }
  0x75   :  { %1881 = vmatpush1.bf16.msra.mxu1 %v3325_v26  ;;  %v3397_v16 = vld [vmem:[#allocation5 + $0x660] ss:$24 sps:$4 sm:$0xff]   ;;  %v3405_v18 = vld [vmem:[#allocation5 + $0x694] ss:$24 sps:$4 sm:$0xff]   ;;  %v3403_v20 = vld [vmem:[#allocation5 + $0x690] ss:$24 sps:$4 sm:$0xff]  }
  0x76   :  { %1922 = vmatpush1.bf16.msra.mxu0 %v3326_v27  ;;  %1882 = vmatprep.subr.bf16.mxu1 %v3327_v28  ;;  %v3408_v19 = vld [vmem:[#allocation5 + $0x9c] ss:$24 sps:$4 sm:$0xff]   ;;  %v3406_v21 = vld [vmem:[#allocation5 + $0x98] ss:$24 sps:$4 sm:$0xff]   ;;  %v3414_v23 = vld [vmem:[#allocation5 + $0xcc] ss:$24 sps:$4 sm:$0xff]  }
  0x77   :  { %1923 = vmatprep.subr.bf16.mxu0 %v3329_v29  ;;  %v3411_v22 = vld [vmem:[#allocation5 + $0x6c4] ss:$24 sps:$4 sm:$0xff]   ;;  %v3409_v24 = vld [vmem:[#allocation5 + $0x6c0] ss:$24 sps:$4 sm:$0xff]   ;;  %v3417_v26 = vld [vmem:[#allocation5 + $0x6f4] ss:$24 sps:$4 sm:$0xff]  }
  0x78   :  { %v3412_v25 = vld [vmem:[#allocation5 + $0xc8] ss:$24 sps:$4 sm:$0xff]   ;;  %v3420_v27 = vld [vmem:[#allocation5 + $0xfc] ss:$24 sps:$4 sm:$0xff]   ;;  %v3418_v29 = vld [vmem:[#allocation5 + $0xf8] ss:$24 sps:$4 sm:$0xff]  }
  0x79   :  { %1883 = vmatpush1.bf16.msra.mxu1 %v3331_v30  ;;  %v3415_v28 = vld [vmem:[#allocation5 + $0x6f0] ss:$24 sps:$4 sm:$0xff]   ;;  %v3423_v30 = vld [vmem:[#allocation5 + $0x724] ss:$24 sps:$4 sm:$0xff]   ;;  %s2827_s28 = sshll.u32 %s3944_s4, 4  ;;  %s2828_s28 = int_to_ptr.vmem [resolvable:$true] %s2827_s28 }
  0x7a   :  { %1924 = vmatpush1.bf16.msra.mxu0 %v3332_v31  ;;  %1884 = vmatprep.subr.bf16.mxu1 %v3333_v32  ;;  %v3426_v31 = vld [vmem:[#allocation5 + $0x12c] ss:$24 sps:$4 sm:$0xff]   ;;  %v4048_v32 = vld [vmem:[#allocation2 + $0x10] sm:$0xff]  ;;  %v3439_v46 = vld [vmem:[#allocation5 + $0x7b0] ss:$24 sps:$4 sm:$0xff]   ;;  %s3905_s29 = scalar_lea.vmem %s2828_s28, 128  ;;  %p3910_p13 = scmp.lt.s32.totalorder %s2828_s28, %s2828_s28 }
  0x7b   :  { %1925 = vmatprep.subr.bf16.mxu0 %v3335_v33  ;;  %v3421_v33 = vld [vmem:[#allocation5 + $0x720] ss:$24 sps:$4 sm:$0xff]   ;;  %p3906_p12 = scmp.ne.s32.totalorder %s2828_s28, %s3905_s29  ;;  %p3911_p0 = scmp.lt.s32.totalorder %s3905_s29, %s3905_s29 }
  0x7c   :  { %v3442_v48 = vld [vmem:[#allocation5 + $0x1b8] ss:$24 sps:$4 sm:$0xff]  }
  0x7d   :  { %1885 = vmatpush1.bf16.msra.mxu1 %v3337_v34  ;;  %v4052_v34 = vcombine.high %v4048_v32, %v4048_v32  ;;  %p3912_p1 = por %p3911_p0, %p3910_p13 }
  0x7e   :  { %1926 = vmatpush1.bf16.msra.mxu0 %v3338_v35  ;;  %1886 = vmatprep.subr.bf16.mxu1 %v3339_v36  ;;  %v3424_v35 = vld [vmem:[#allocation5 + $0x128] ss:$24 sps:$4 sm:$0xff]   ;;  %v3429_v36 = vld [vmem:[#allocation5 + $0x754] ss:$24 sps:$4 sm:$0xff]  }
  0x7f   :  { %1927 = vmatprep.subr.bf16.mxu0 %v3341_v37  ;;  %v3432_v37 = vld [vmem:[#allocation5 + $0x15c] ss:$24 sps:$4 sm:$0xff]   ;;  %p3913_p2 = pnand %p3912_p1, %p3906_p12 }
  0x81   :  { %1887 = vmatpush1.bf16.msra.mxu1 %v3343_v38  ;;  %v3427_v38 = vld [vmem:[#allocation5 + $0x750] ss:$24 sps:$4 sm:$0xff]  }
  0x82   :  { %1928 = vmatpush1.bf16.msra.mxu0 %v3344_v39  ;;  %1888 = vmatprep.subr.bf16.mxu1 %v3345_v40  ;;  %v3430_v39 = vld [vmem:[#allocation5 + $0x158] ss:$24 sps:$4 sm:$0xff]   ;;  %v3435_v40 = vld [vmem:[#allocation5 + $0x784] ss:$24 sps:$4 sm:$0xff]  }
  0x83   :  { %1929 = vmatprep.subr.bf16.mxu0 %v3347_v41  ;;  %v3438_v41 = vld [vmem:[#allocation5 + $0x18c] ss:$24 sps:$4 sm:$0xff]  }
  0x85   :  { %1889 = vmatpush1.bf16.msra.mxu1 %v3349_v42  ;;  %v3433_v42 = vld [vmem:[#allocation5 + $0x780] ss:$24 sps:$4 sm:$0xff]  }
  0x86   :  { %1930 = vmatpush1.bf16.msra.mxu0 %v3350_v43  ;;  %1890 = vmatprep.subr.bf16.mxu1 %v3351_v44  ;;  %v3436_v43 = vld [vmem:[#allocation5 + $0x188] ss:$24 sps:$4 sm:$0xff]   ;;  %v3441_v44 = vld [vmem:[#allocation5 + $0x7b4] ss:$24 sps:$4 sm:$0xff]  }
  0x87   :  { %1931 = vmatprep.subr.bf16.mxu0 %v3353_v45  ;;  %v3444_v45 = vld [vmem:[#allocation5 + $0x1bc] ss:$24 sps:$4 sm:$0xff]  }
  0x89   :  { %1891 = vmatpush1.bf16.msra.mxu1 %v3355_v49  ;;  %v3447_v49 = vld [vmem:[#allocation5 + $0x7e4] ss:$24 sps:$4 sm:$0xff]  }
  0x8a   :  { %1932 = vmatpush1.bf16.msra.mxu0 %v3356_v50  ;;  %1892 = vmatprep.subr.bf16.mxu1 %v3357_v52  ;;  %v3450_v50 = vld [vmem:[#allocation5 + $0x1ec] ss:$24 sps:$4 sm:$0xff]   ;;  %v3445_v52 = vld [vmem:[#allocation5 + $0x7e0] ss:$24 sps:$4 sm:$0xff]  }
  0x8b   :  { %1933 = vmatprep.subr.bf16.mxu0 %v3359_v53  ;;  %v3448_v53 = vld [vmem:[#allocation5 + $0x1e8] ss:$24 sps:$4 sm:$0xff]  }
  0x8d   :  { %1893 = vmatpush1.bf16.msra.mxu1 %v3361_v54  ;;  %v3453_v54 = vld [vmem:[#allocation5 + $0x814] ss:$24 sps:$4 sm:$0xff]  }
  0x8e   :  { %1934 = vmatpush1.bf16.msra.mxu0 %v3362_v55  ;;  %1894 = vmatprep.subr.bf16.mxu1 %v3363_v56  ;;  %v3456_v55 = vld [vmem:[#allocation5 + $0x21c] ss:$24 sps:$4 sm:$0xff]   ;;  %v3451_v56 = vld [vmem:[#allocation5 + $0x810] ss:$24 sps:$4 sm:$0xff]  }
  0x8f   :  { %1935 = vmatprep.subr.bf16.mxu0 %v3365_v57  ;;  %v3454_v57 = vld [vmem:[#allocation5 + $0x218] ss:$24 sps:$4 sm:$0xff]  }
  0x91   :  { %1895 = vmatpush1.bf16.msra.mxu1 %v3367_v58  ;;  %v3459_v58 = vld [vmem:[#allocation5 + $0x844] ss:$24 sps:$4 sm:$0xff]  }
  0x92   :  { %1936 = vmatpush1.bf16.msra.mxu0 %v3368_v59  ;;  %1896 = vmatprep.subr.bf16.mxu1 %v3369_v60  ;;  %v3462_v59 = vld [vmem:[#allocation5 + $0x24c] ss:$24 sps:$4 sm:$0xff]   ;;  %v3457_v60 = vld [vmem:[#allocation5 + $0x840] ss:$24 sps:$4 sm:$0xff]  }
  0x93   :  { %1937 = vmatprep.subr.bf16.mxu0 %v3371_v61  ;;  %v3460_v61 = vld [vmem:[#allocation5 + $0x248] ss:$24 sps:$4 sm:$0xff]  }
  0x95   :  { %1897 = vmatpush1.bf16.msra.mxu1 %v3373_v62  ;;  %v3465_v62 = vld [vmem:[#allocation5 + $0x874] ss:$24 sps:$4 sm:$0xff]  }
  0x96   :  { %1938 = vmatpush1.bf16.msra.mxu0 %v3374_v63  ;;  %1898 = vmatprep.subr.bf16.mxu1 %v3375_v0  ;;  %v3468_v63 = vld [vmem:[#allocation5 + $0x27c] ss:$24 sps:$4 sm:$0xff]   ;;  %v3463_v0 = vld [vmem:[#allocation5 + $0x870] ss:$24 sps:$4 sm:$0xff]  }
  0x97   :  { %1939 = vmatprep.subr.bf16.mxu0 %v3377_v1  ;;  %v3466_v1 = vld [vmem:[#allocation5 + $0x278] ss:$24 sps:$4 sm:$0xff]  }
  0x99   :  { %1899 = vmatpush1.bf16.msra.mxu1 %v3379_v2  ;;  %v3471_v2 = vld [vmem:[#allocation5 + $0x8a4] ss:$24 sps:$4 sm:$0xff]  }
  0x9a   :  { %1940 = vmatpush1.bf16.msra.mxu0 %v3380_v3  ;;  %1991 = vmatprep.subr.bf16.mxu1 %v3388_v5  ;;  %v3474_v3 = vld [vmem:[#allocation5 + $0x2ac] ss:$24 sps:$4 sm:$0xff]   ;;  %v3472_v5 = vld [vmem:[#allocation5 + $0x2a8] ss:$24 sps:$4 sm:$0xff]  }
  0x9b   :  { %1950 = vmatprep.subr.bf16.mxu0 %v3385_v4  ;;  %v3469_v4 = vld [vmem:[#allocation5 + $0x8a0] ss:$24 sps:$4 sm:$0xff]  }
  0x9c   :  { %1901 = vmatmul.mubr.bf16.vlgmr.msra.gmra.mrb[0].mxu1 %v4041_v6 }
  0x9d   :  { %1942 = vmatmul.mubr.bf16.vlgmr.msra.gmra.mrb[0].mxu0 %v4043_v7  ;;  %1992 = vmatpush1.bf16.msra.mxu1 %v3386_v9  ;;  %v3480_v9 = vld [vmem:[#allocation5 + $0x2dc] ss:$24 sps:$4 sm:$0xff]  }
  0x9e   :  { %1951 = vmatpush1.bf16.msra.mxu0 %v3383_v8  ;;  %1993 = vmatprep.subr.bf16.mxu1 %v3396_v11  ;;  %v3477_v8 = vld [vmem:[#allocation5 + $0x8d4] ss:$24 sps:$4 sm:$0xff]   ;;  %v3478_v11 = vld [vmem:[#allocation5 + $0x2d8] ss:$24 sps:$4 sm:$0xff]  }
  0x9f   :  { %1952 = vmatprep.subr.bf16.mxu0 %v3393_v10  ;;  %2023 = vmatprep.mubr.bf16.mxu1 %v4035_v47  ;;  %v3475_v10 = vld [vmem:[#allocation5 + $0x8d0] ss:$24 sps:$4 sm:$0xff]  }
  0xa0   :  { %1982 = vmatprep.mubr.bf16.mxu0 %v4052_v34 }
  0xa1   :  { %1994 = vmatpush1.bf16.msra.mxu1 %v3394_v13  ;;  %v3488_v13 = vld [vmem:[#allocation5 + $0x14] ss:$24 sps:$4 sm:$0xff]  }
  0xa2   :  { %1953 = vmatpush1.bf16.msra.mxu0 %v3391_v12  ;;  %1995 = vmatprep.subr.bf16.mxu1 %v3402_v15  ;;  %v3485_v12 = vld [vmem:[#allocation5 + $0x30c] ss:$24 sps:$4 sm:$0xff]   ;;  %v3483_v15 = vld [vmem:[#allocation5 + $0x308] ss:$24 sps:$4 sm:$0xff]  }
  0xa3   :  { %1954 = vmatprep.subr.bf16.mxu0 %v3399_v14  ;;  %v4057_v14 = vcombine.low %v4048_v32, %v4048_v32  ;;  %v3515_v32 = vld [vmem:[#allocation5 + $0x3fc] ss:$24 sps:$4 sm:$0xff]  }
  0xa5   :  { %1996 = vmatpush1.bf16.msra.mxu1 %v3400_v17  ;;  %v3491_v17 = vld [vmem:[#allocation5 + $0x33c] ss:$24 sps:$4 sm:$0xff]  }
  0xa6   :  { %1955 = vmatpush1.bf16.msra.mxu0 %v3397_v16  ;;  %1997 = vmatprep.subr.bf16.mxu1 %v3408_v19  ;;  %v3486_v16 = vld [vmem:[#allocation5 + $0x10] ss:$24 sps:$4 sm:$0xff]  }
  0xa7   :  { %1956 = vmatprep.subr.bf16.mxu0 %v3405_v18  ;;  %v3494_v18 = vld [vmem:[#allocation5 + $0x44] ss:$24 sps:$4 sm:$0xff]   ;;  %v3489_v19 = vld [vmem:[#allocation5 + $0x338] ss:$24 sps:$4 sm:$0xff]  }
  0xa9   :  { %1998 = vmatpush1.bf16.msra.mxu1 %v3406_v21  ;;  %v3497_v21 = vld [vmem:[#allocation5 + $0x36c] ss:$24 sps:$4 sm:$0xff]  }
  0xaa   :  { %1957 = vmatpush1.bf16.msra.mxu0 %v3403_v20  ;;  %1999 = vmatprep.subr.bf16.mxu1 %v3414_v23  ;;  %v3492_v20 = vld [vmem:[#allocation5 + $0x40] ss:$24 sps:$4 sm:$0xff]  }
  0xab   :  { %1958 = vmatprep.subr.bf16.mxu0 %v3411_v22  ;;  %v3500_v22 = vld [vmem:[#allocation5 + $0x74] ss:$24 sps:$4 sm:$0xff]   ;;  %v3495_v23 = vld [vmem:[#allocation5 + $0x368] ss:$24 sps:$4 sm:$0xff]  }
  0xad   :  { %2000 = vmatpush1.bf16.msra.mxu1 %v3412_v25  ;;  %v3503_v25 = vld [vmem:[#allocation5 + $0x39c] ss:$24 sps:$4 sm:$0xff]  }
  0xae   :  { %1959 = vmatpush1.bf16.msra.mxu0 %v3409_v24  ;;  %2001 = vmatprep.subr.bf16.mxu1 %v3420_v27  ;;  %v3498_v24 = vld [vmem:[#allocation5 + $0x70] ss:$24 sps:$4 sm:$0xff]  }
  0xaf   :  { %1960 = vmatprep.subr.bf16.mxu0 %v3417_v26  ;;  %v3506_v26 = vld [vmem:[#allocation5 + $0xa4] ss:$24 sps:$4 sm:$0xff]   ;;  %v3501_v27 = vld [vmem:[#allocation5 + $0x398] ss:$24 sps:$4 sm:$0xff]  }
  0xb1   :  { %2002 = vmatpush1.bf16.msra.mxu1 %v3418_v29  ;;  %v3509_v29 = vld [vmem:[#allocation5 + $0x3cc] ss:$24 sps:$4 sm:$0xff]  }
  0xb2   :  { %1961 = vmatpush1.bf16.msra.mxu0 %v3415_v28  ;;  %2003 = vmatprep.subr.bf16.mxu1 %v3426_v31  ;;  %v3504_v28 = vld [vmem:[#allocation5 + $0xa0] ss:$24 sps:$4 sm:$0xff]  }
  0xb3   :  { %1962 = vmatprep.subr.bf16.mxu0 %v3423_v30  ;;  %v3512_v30 = vld [vmem:[#allocation5 + $0xd4] ss:$24 sps:$4 sm:$0xff]   ;;  %v3507_v31 = vld [vmem:[#allocation5 + $0x3c8] ss:$24 sps:$4 sm:$0xff]  }
  0xb5   :  { %2004 = vmatpush1.bf16.msra.mxu1 %v3424_v35  ;;  %v3513_v35 = vld [vmem:[#allocation5 + $0x3f8] ss:$24 sps:$4 sm:$0xff]  }
  0xb6   :  { %1963 = vmatpush1.bf16.msra.mxu0 %v3421_v33  ;;  %2005 = vmatprep.subr.bf16.mxu1 %v3432_v37  ;;  %v3518_v33 = vld [vmem:[#allocation5 + $0x104] ss:$24 sps:$4 sm:$0xff]  }
  0xb7   :  { %1964 = vmatprep.subr.bf16.mxu0 %v3429_v36  ;;  %v3516_v36 = vld [vmem:[#allocation5 + $0x100] ss:$24 sps:$4 sm:$0xff]   ;;  %v3521_v37 = vld [vmem:[#allocation5 + $0x42c] ss:$24 sps:$4 sm:$0xff]  }
  0xb9   :  { %2006 = vmatpush1.bf16.msra.mxu1 %v3430_v39  ;;  %v3519_v39 = vld [vmem:[#allocation5 + $0x428] ss:$24 sps:$4 sm:$0xff]  }
  0xba   :  { %1965 = vmatpush1.bf16.msra.mxu0 %v3427_v38  ;;  %2007 = vmatprep.subr.bf16.mxu1 %v3438_v41  ;;  %v3524_v38 = vld [vmem:[#allocation5 + $0x134] ss:$24 sps:$4 sm:$0xff]  }
  0xbb   :  { %1966 = vmatprep.subr.bf16.mxu0 %v3435_v40  ;;  %v3522_v40 = vld [vmem:[#allocation5 + $0x130] ss:$24 sps:$4 sm:$0xff]   ;;  %v3527_v41 = vld [vmem:[#allocation5 + $0x45c] ss:$24 sps:$4 sm:$0xff]  }
  0xbd   :  { %2008 = vmatpush1.bf16.msra.mxu1 %v3436_v43  ;;  %v3525_v43 = vld [vmem:[#allocation5 + $0x458] ss:$24 sps:$4 sm:$0xff]  }
  0xbe   :  { %1967 = vmatpush1.bf16.msra.mxu0 %v3433_v42  ;;  %2009 = vmatprep.subr.bf16.mxu1 %v3444_v45  ;;  %v3530_v42 = vld [vmem:[#allocation5 + $0x164] ss:$24 sps:$4 sm:$0xff]  }
  0xbf   :  { %1968 = vmatprep.subr.bf16.mxu0 %v3441_v44  ;;  %v3528_v44 = vld [vmem:[#allocation5 + $0x160] ss:$24 sps:$4 sm:$0xff]   ;;  %v3533_v45 = vld [vmem:[#allocation5 + $0x48c] ss:$24 sps:$4 sm:$0xff]  }
  0xc1   :  { %2010 = vmatpush1.bf16.msra.mxu1 %v3442_v48  ;;  %v3531_v48 = vld [vmem:[#allocation5 + $0x488] ss:$24 sps:$4 sm:$0xff]  }
  0xc2   :  { %1969 = vmatpush1.bf16.msra.mxu0 %v3439_v46  ;;  %2011 = vmatprep.subr.bf16.mxu1 %v3450_v50  ;;  %v3536_v46 = vld [vmem:[#allocation5 + $0x194] ss:$24 sps:$4 sm:$0xff]  }
  0xc3   :  { %1970 = vmatprep.subr.bf16.mxu0 %v3447_v49  ;;  %v3534_v49 = vld [vmem:[#allocation5 + $0x190] ss:$24 sps:$4 sm:$0xff]   ;;  %v3539_v50 = vld [vmem:[#allocation5 + $0x4bc] ss:$24 sps:$4 sm:$0xff]  }
  0xc5   :  { %2012 = vmatpush1.bf16.msra.mxu1 %v3448_v53  ;;  %v3537_v53 = vld [vmem:[#allocation5 + $0x4b8] ss:$24 sps:$4 sm:$0xff]  }
  0xc6   :  { %1971 = vmatpush1.bf16.msra.mxu0 %v3445_v52  ;;  %2013 = vmatprep.subr.bf16.mxu1 %v3456_v55  ;;  %v3542_v52 = vld [vmem:[#allocation5 + $0x1c4] ss:$24 sps:$4 sm:$0xff]  }
  0xc7   :  { %1972 = vmatprep.subr.bf16.mxu0 %v3453_v54  ;;  %v3540_v54 = vld [vmem:[#allocation5 + $0x1c0] ss:$24 sps:$4 sm:$0xff]   ;;  %v3545_v55 = vld [vmem:[#allocation5 + $0x4ec] ss:$24 sps:$4 sm:$0xff]  }
  0xc9   :  { %2014 = vmatpush1.bf16.msra.mxu1 %v3454_v57  ;;  %v3543_v57 = vld [vmem:[#allocation5 + $0x4e8] ss:$24 sps:$4 sm:$0xff]  }
  0xca   :  { %1973 = vmatpush1.bf16.msra.mxu0 %v3451_v56  ;;  %2015 = vmatprep.subr.bf16.mxu1 %v3462_v59  ;;  %v3548_v56 = vld [vmem:[#allocation5 + $0x1f4] ss:$24 sps:$4 sm:$0xff]  }
  0xcb   :  { %1974 = vmatprep.subr.bf16.mxu0 %v3459_v58  ;;  %v3546_v58 = vld [vmem:[#allocation5 + $0x1f0] ss:$24 sps:$4 sm:$0xff]   ;;  %v3551_v59 = vld [vmem:[#allocation5 + $0x51c] ss:$24 sps:$4 sm:$0xff]  }
  0xcd   :  { %2016 = vmatpush1.bf16.msra.mxu1 %v3460_v61  ;;  %v3549_v61 = vld [vmem:[#allocation5 + $0x518] ss:$24 sps:$4 sm:$0xff]  }
  0xce   :  { %1975 = vmatpush1.bf16.msra.mxu0 %v3457_v60  ;;  %2017 = vmatprep.subr.bf16.mxu1 %v3468_v63  ;;  %v3554_v60 = vld [vmem:[#allocation5 + $0x224] ss:$24 sps:$4 sm:$0xff]  }
  0xcf   :  { %1976 = vmatprep.subr.bf16.mxu0 %v3465_v62  ;;  %v3552_v62 = vld [vmem:[#allocation5 + $0x220] ss:$24 sps:$4 sm:$0xff]   ;;  %v3557_v63 = vld [vmem:[#allocation5 + $0x54c] ss:$24 sps:$4 sm:$0xff]  }
  0xd1   :  { %2018 = vmatpush1.bf16.msra.mxu1 %v3466_v1  ;;  %v3555_v1 = vld [vmem:[#allocation5 + $0x548] ss:$24 sps:$4 sm:$0xff]  }
  0xd2   :  { %1977 = vmatpush1.bf16.msra.mxu0 %v3463_v0  ;;  %2019 = vmatprep.subr.bf16.mxu1 %v3474_v3  ;;  %v3560_v0 = vld [vmem:[#allocation5 + $0x254] ss:$24 sps:$4 sm:$0xff]  }
  0xd3   :  { %1978 = vmatprep.subr.bf16.mxu0 %v3471_v2  ;;  %v3558_v2 = vld [vmem:[#allocation5 + $0x250] ss:$24 sps:$4 sm:$0xff]   ;;  %v3563_v3 = vld [vmem:[#allocation5 + $0x57c] ss:$24 sps:$4 sm:$0xff]  }
  0xd5   :  { %2020 = vmatpush1.bf16.msra.mxu1 %v3472_v5  ;;  %v3561_v5 = vld [vmem:[#allocation5 + $0x578] ss:$24 sps:$4 sm:$0xff]  }
  0xd6   :  { %1979 = vmatpush1.bf16.msra.mxu0 %v3469_v4  ;;  %2021 = vmatprep.subr.bf16.mxu1 %v3480_v9  ;;  %v3566_v4 = vld [vmem:[#allocation5 + $0x284] ss:$24 sps:$4 sm:$0xff]  }
  0xd7   :  { %1980 = vmatprep.subr.bf16.mxu0 %v3477_v8  ;;  %v3564_v8 = vld [vmem:[#allocation5 + $0x280] ss:$24 sps:$4 sm:$0xff]   ;;  %v3569_v9 = vld [vmem:[#allocation5 + $0x5ac] ss:$24 sps:$4 sm:$0xff]  }
  0xd9   :  { %2022 = vmatpush1.bf16.msra.mxu1 %v3478_v11  ;;  %v3567_v11 = vld [vmem:[#allocation5 + $0x5a8] ss:$24 sps:$4 sm:$0xff]  }
  0xda   :  { %1981 = vmatpush1.bf16.msra.mxu0 %v3475_v10  ;;  %2032 = vmatprep.subr.bf16.mxu1 %v3485_v12  ;;  %v3572_v10 = vld [vmem:[#allocation5 + $0x2b4] ss:$24 sps:$4 sm:$0xff]   ;;  %v3570_v12 = vld [vmem:[#allocation5 + $0x2b0] ss:$24 sps:$4 sm:$0xff]  }
  0xdb   :  { %2114 = vmatprep.subr.bf16.mxu0 %v3488_v13  ;;  %v3575_v13 = vld [vmem:[#allocation5 + $0x5dc] ss:$24 sps:$4 sm:$0xff]  }
  0xdc   :  { %2024 = vmatmul.mubr.bf16.vlgmr.msra.gmra.mrb[4].mxu1 %v4041_v6 }
  0xdd   :  { %1983 = vmatmul.mubr.bf16.vlgmr.msra.gmra.mrb[0].mxu0 %v4057_v14  ;;  %2033 = vmatpush1.bf16.msra.mxu1 %v3483_v15  ;;  %v3578_v15 = vld [vmem:[#allocation5 + $0x2e4] ss:$24 sps:$4 sm:$0xff]  }
  0xde   :  { %2115 = vmatpush1.bf16.msra.mxu0 %v3486_v16  ;;  %2034 = vmatprep.subr.bf16.mxu1 %v3491_v17  ;;  %v3573_v16 = vld [vmem:[#allocation5 + $0x5d8] ss:$24 sps:$4 sm:$0xff]  }
  0xdf   :  { %2116 = vmatprep.subr.bf16.mxu0 %v3494_v18  ;;  %2064 = vmatprep.mubr.bf16.mxu1 %v4037_v51  ;;  %v3576_v17 = vld [vmem:[#allocation5 + $0x2e0] ss:$24 sps:$4 sm:$0xff]   ;;  %v3581_v18 = vld [vmem:[#allocation5 + $0x60c] ss:$24 sps:$4 sm:$0xff]  }
  0xe0   :  { %2146 = vmatprep.mubr.bf16.mxu0 %v4035_v47  ;;  %v3510_v47 = vld [vmem:[#allocation5 + $0xd0] ss:$24 sps:$4 sm:$0xff]  }
  0xe1   :  { %2035 = vmatpush1.bf16.msra.mxu1 %v3489_v19  ;;  %v3584_v19 = vld [vmem:[#allocation5 + $0x314] ss:$24 sps:$4 sm:$0xff]  }
  0xe2   :  { %2117 = vmatpush1.bf16.msra.mxu0 %v3492_v20  ;;  %2036 = vmatprep.subr.bf16.mxu1 %v3497_v21  ;;  %v3579_v20 = vld [vmem:[#allocation5 + $0x608] ss:$24 sps:$4 sm:$0xff]  }
  0xe3   :  { %2118 = vmatprep.subr.bf16.mxu0 %v3500_v22  ;;  %v3582_v21 = vld [vmem:[#allocation5 + $0x310] ss:$24 sps:$4 sm:$0xff]   ;;  %v3587_v22 = vld [vmem:[#allocation5 + $0x63c] ss:$24 sps:$4 sm:$0xff]  }
  0xe5   :  { %2037 = vmatpush1.bf16.msra.mxu1 %v3495_v23  ;;  %v3590_v23 = vld [vmem:[#allocation5 + $0x344] ss:$24 sps:$4 sm:$0xff]  }
  0xe6   :  { %2119 = vmatpush1.bf16.msra.mxu0 %v3498_v24  ;;  %2038 = vmatprep.subr.bf16.mxu1 %v3503_v25  ;;  %v3585_v24 = vld [vmem:[#allocation5 + $0x638] ss:$24 sps:$4 sm:$0xff]  }
  0xe7   :  { %2120 = vmatprep.subr.bf16.mxu0 %v3506_v26  ;;  %v3588_v25 = vld [vmem:[#allocation5 + $0x340] ss:$24 sps:$4 sm:$0xff]   ;;  %v3593_v26 = vld [vmem:[#allocation5 + $0x66c] ss:$24 sps:$4 sm:$0xff]  }
  0xe9   :  { %2039 = vmatpush1.bf16.msra.mxu1 %v3501_v27  ;;  %v3596_v27 = vld [vmem:[#allocation5 + $0x374] ss:$24 sps:$4 sm:$0xff]  }
  0xea   :  { %2121 = vmatpush1.bf16.msra.mxu0 %v3504_v28  ;;  %2040 = vmatprep.subr.bf16.mxu1 %v3509_v29  ;;  %v3591_v28 = vld [vmem:[#allocation5 + $0x668] ss:$24 sps:$4 sm:$0xff]  }
  0xeb   :  { %2122 = vmatprep.subr.bf16.mxu0 %v3512_v30  ;;  %v3594_v29 = vld [vmem:[#allocation5 + $0x370] ss:$24 sps:$4 sm:$0xff]   ;;  %v3599_v30 = vld [vmem:[#allocation5 + $0x69c] ss:$24 sps:$4 sm:$0xff]  }
  0xed   :  { %2041 = vmatpush1.bf16.msra.mxu1 %v3507_v31  ;;  %v3602_v31 = vld [vmem:[#allocation5 + $0x3a4] ss:$24 sps:$4 sm:$0xff]  }
  0xee   :  { %2123 = vmatpush1.bf16.msra.mxu0 %v3510_v47  ;;  %2042 = vmatprep.subr.bf16.mxu1 %v3515_v32  ;;  %v3597_v47 = vld [vmem:[#allocation5 + $0x698] ss:$24 sps:$4 sm:$0xff]   ;;  %v3605_v32 = vld [vmem:[#allocation5 + $0x6cc] ss:$24 sps:$4 sm:$0xff]  }
  0xef   :  { %2124 = vmatprep.subr.bf16.mxu0 %v3518_v33  ;;  %v3608_v33 = vld [vmem:[#allocation5 + $0x3d4] ss:$24 sps:$4 sm:$0xff]  }
  0xf1   :  { %2043 = vmatpush1.bf16.msra.mxu1 %v3513_v35  ;;  %v3603_v35 = vld [vmem:[#allocation5 + $0x6c8] ss:$24 sps:$4 sm:$0xff]  }
  0xf2   :  { %2125 = vmatpush1.bf16.msra.mxu0 %v3516_v36  ;;  %2044 = vmatprep.subr.bf16.mxu1 %v3521_v37  ;;  %v3606_v36 = vld [vmem:[#allocation5 + $0x3d0] ss:$24 sps:$4 sm:$0xff]   ;;  %v3611_v37 = vld [vmem:[#allocation5 + $0x6fc] ss:$24 sps:$4 sm:$0xff]  }
  0xf3   :  { %2126 = vmatprep.subr.bf16.mxu0 %v3524_v38  ;;  %v3614_v38 = vld [vmem:[#allocation5 + $0x404] ss:$24 sps:$4 sm:$0xff]  }
  0xf5   :  { %2045 = vmatpush1.bf16.msra.mxu1 %v3519_v39  ;;  %v3612_v39 = vld [vmem:[#allocation5 + $0x400] ss:$24 sps:$4 sm:$0xff]  }
  0xf6   :  { %2127 = vmatpush1.bf16.msra.mxu0 %v3522_v40  ;;  %2046 = vmatprep.subr.bf16.mxu1 %v3527_v41  ;;  %v3617_v40 = vld [vmem:[#allocation5 + $0x72c] ss:$24 sps:$4 sm:$0xff]  }
  0xf7   :  { %2128 = vmatprep.subr.bf16.mxu0 %v3530_v42  ;;  %v3620_v41 = vld [vmem:[#allocation5 + $0x434] ss:$24 sps:$4 sm:$0xff]   ;;  %v3615_v42 = vld [vmem:[#allocation5 + $0x728] ss:$24 sps:$4 sm:$0xff]  }
  0xf9   :  { %2047 = vmatpush1.bf16.msra.mxu1 %v3525_v43  ;;  %v3618_v43 = vld [vmem:[#allocation5 + $0x430] ss:$24 sps:$4 sm:$0xff]  }
  0xfa   :  { %2129 = vmatpush1.bf16.msra.mxu0 %v3528_v44  ;;  %2048 = vmatprep.subr.bf16.mxu1 %v3533_v45  ;;  %v3623_v44 = vld [vmem:[#allocation5 + $0x75c] ss:$24 sps:$4 sm:$0xff]  }
  0xfb   :  { %2130 = vmatprep.subr.bf16.mxu0 %v3536_v46  ;;  %v3626_v45 = vld [vmem:[#allocation5 + $0x464] ss:$24 sps:$4 sm:$0xff]   ;;  %v3621_v46 = vld [vmem:[#allocation5 + $0x758] ss:$24 sps:$4 sm:$0xff]  }
  0xfd   :  { %2049 = vmatpush1.bf16.msra.mxu1 %v3531_v48  ;;  %v3624_v48 = vld [vmem:[#allocation5 + $0x460] ss:$24 sps:$4 sm:$0xff]  }
  0xfe   :  { %2131 = vmatpush1.bf16.msra.mxu0 %v3534_v49  ;;  %2050 = vmatprep.subr.bf16.mxu1 %v3539_v50  ;;  %v3629_v49 = vld [vmem:[#allocation5 + $0x78c] ss:$24 sps:$4 sm:$0xff]  }
  0xff   :  { %2132 = vmatprep.subr.bf16.mxu0 %v3542_v52  ;;  %v3632_v50 = vld [vmem:[#allocation5 + $0x494] ss:$24 sps:$4 sm:$0xff]   ;;  %v3627_v52 = vld [vmem:[#allocation5 + $0x788] ss:$24 sps:$4 sm:$0xff]  }
 0x101   :  { %2051 = vmatpush1.bf16.msra.mxu1 %v3537_v53  ;;  %v3630_v53 = vld [vmem:[#allocation5 + $0x490] ss:$24 sps:$4 sm:$0xff]  }
 0x102   :  { %2133 = vmatpush1.bf16.msra.mxu0 %v3540_v54  ;;  %2052 = vmatprep.subr.bf16.mxu1 %v3545_v55  ;;  %v3635_v54 = vld [vmem:[#allocation5 + $0x7bc] ss:$24 sps:$4 sm:$0xff]  }
 0x103   :  { %2134 = vmatprep.subr.bf16.mxu0 %v3548_v56  ;;  %v3638_v55 = vld [vmem:[#allocation5 + $0x4c4] ss:$24 sps:$4 sm:$0xff]   ;;  %v3633_v56 = vld [vmem:[#allocation5 + $0x7b8] ss:$24 sps:$4 sm:$0xff]  }
 0x105   :  { %2053 = vmatpush1.bf16.msra.mxu1 %v3543_v57  ;;  %v3636_v57 = vld [vmem:[#allocation5 + $0x4c0] ss:$24 sps:$4 sm:$0xff]  }
 0x106   :  { %2135 = vmatpush1.bf16.msra.mxu0 %v3546_v58  ;;  %2054 = vmatprep.subr.bf16.mxu1 %v3551_v59  ;;  %v3641_v58 = vld [vmem:[#allocation5 + $0x7ec] ss:$24 sps:$4 sm:$0xff]  }
 0x107   :  { %2136 = vmatprep.subr.bf16.mxu0 %v3554_v60  ;;  %v3644_v59 = vld [vmem:[#allocation5 + $0x4f4] ss:$24 sps:$4 sm:$0xff]   ;;  %v3639_v60 = vld [vmem:[#allocation5 + $0x7e8] ss:$24 sps:$4 sm:$0xff]  }
 0x109   :  { %2055 = vmatpush1.bf16.msra.mxu1 %v3549_v61  ;;  %v3642_v61 = vld [vmem:[#allocation5 + $0x4f0] ss:$24 sps:$4 sm:$0xff]  }
 0x10a   :  { %2137 = vmatpush1.bf16.msra.mxu0 %v3552_v62  ;;  %2056 = vmatprep.subr.bf16.mxu1 %v3557_v63  ;;  %v3647_v62 = vld [vmem:[#allocation5 + $0x81c] ss:$24 sps:$4 sm:$0xff]  }
 0x10b   :  { %2138 = vmatprep.subr.bf16.mxu0 %v3560_v0  ;;  %v3650_v63 = vld [vmem:[#allocation5 + $0x524] ss:$24 sps:$4 sm:$0xff]   ;;  %v3645_v0 = vld [vmem:[#allocation5 + $0x818] ss:$24 sps:$4 sm:$0xff]  }
 0x10d   :  { %2057 = vmatpush1.bf16.msra.mxu1 %v3555_v1  ;;  %v3648_v1 = vld [vmem:[#allocation5 + $0x520] ss:$24 sps:$4 sm:$0xff]  }
 0x10e   :  { %2139 = vmatpush1.bf16.msra.mxu0 %v3558_v2  ;;  %2058 = vmatprep.subr.bf16.mxu1 %v3563_v3  ;;  %v3653_v2 = vld [vmem:[#allocation5 + $0x84c] ss:$24 sps:$4 sm:$0xff]  }
 0x10f   :  { %2140 = vmatprep.subr.bf16.mxu0 %v3566_v4  ;;  %v3656_v3 = vld [vmem:[#allocation5 + $0x554] ss:$24 sps:$4 sm:$0xff]   ;;  %v3651_v4 = vld [vmem:[#allocation5 + $0x848] ss:$24 sps:$4 sm:$0xff]  }
 0x111   :  { %2059 = vmatpush1.bf16.msra.mxu1 %v3561_v5  ;;  %v3654_v5 = vld [vmem:[#allocation5 + $0x550] ss:$24 sps:$4 sm:$0xff]  }
 0x112   :  { %2141 = vmatpush1.bf16.msra.mxu0 %v3564_v8  ;;  %2060 = vmatprep.subr.bf16.mxu1 %v3569_v9  ;;  %v3659_v8 = vld [vmem:[#allocation5 + $0x87c] ss:$24 sps:$4 sm:$0xff]  }
 0x113   :  { %2142 = vmatprep.subr.bf16.mxu0 %v3572_v10  ;;  %v3662_v9 = vld [vmem:[#allocation5 + $0x584] ss:$24 sps:$4 sm:$0xff]   ;;  %v3657_v10 = vld [vmem:[#allocation5 + $0x878] ss:$24 sps:$4 sm:$0xff]  }
 0x115   :  { %2061 = vmatpush1.bf16.msra.mxu1 %v3567_v11  ;;  %v3660_v11 = vld [vmem:[#allocation5 + $0x580] ss:$24 sps:$4 sm:$0xff]  }
 0x116   :  { %2143 = vmatpush1.bf16.msra.mxu0 %v3570_v12  ;;  %2062 = vmatprep.subr.bf16.mxu1 %v3575_v13  ;;  %v3665_v12 = vld [vmem:[#allocation5 + $0x8ac] ss:$24 sps:$4 sm:$0xff]  }
 0x117   :  { %2144 = vmatprep.subr.bf16.mxu0 %v3578_v15  ;;  %v3668_v13 = vld [vmem:[#allocation5 + $0x5b4] ss:$24 sps:$4 sm:$0xff]   ;;  %v3663_v15 = vld [vmem:[#allocation5 + $0x8a8] ss:$24 sps:$4 sm:$0xff]  }
 0x119   :  { %2063 = vmatpush1.bf16.msra.mxu1 %v3573_v16  ;;  %v3666_v16 = vld [vmem:[#allocation5 + $0x5b0] ss:$24 sps:$4 sm:$0xff]  }
 0x11a   :  { %2145 = vmatpush1.bf16.msra.mxu0 %v3576_v17  ;;  %2073 = vmatprep.subr.bf16.mxu1 %v3581_v18  ;;  %v3671_v17 = vld [vmem:[#allocation5 + $0x8dc] ss:$24 sps:$4 sm:$0xff]  }
 0x11b   :  { %2155 = vmatprep.subr.bf16.mxu0 %v3584_v19  ;;  %v3674_v18 = vld [vmem:[#allocation5 + $0x5e4] ss:$24 sps:$4 sm:$0xff]   ;;  %v3669_v19 = vld [vmem:[#allocation5 + $0x8d8] ss:$24 sps:$4 sm:$0xff]  }
 0x11c   :  { %2065 = vmatmul.mubr.bf16.vlgmr.msra.gmra.mrb[4].mxu1 %v4043_v7 }
 0x11d   :  { %2147 = vmatmul.mubr.bf16.vlgmr.msra.gmra.mrb[4].mxu0 %v4041_v6  ;;  %2074 = vmatpush1.bf16.msra.mxu1 %v3579_v20  ;;  %v3600_v6 = vld [vmem:[#allocation5 + $0x3a0] ss:$24 sps:$4 sm:$0xff]  }
 0x11e   :  { %2156 = vmatpush1.bf16.msra.mxu0 %v3582_v21  ;;  %2075 = vmatprep.subr.bf16.mxu1 %v3587_v22  ;;  %v3672_v20 = vld [vmem:[#allocation5 + $0x5e0] ss:$24 sps:$4 sm:$0xff]   ;;  %v3677_v21 = vld [vmem:[#allocation5 + $0x614] ss:$24 sps:$4 sm:$0xff]  }
 0x11f   :  { %2157 = vmatprep.subr.bf16.mxu0 %v3590_v23  ;;  %2105 = vmatprep.mubr.bf16.mxu1 %v4052_v34  ;;  %v3723_v22 = vld [vmem:[#allocation8 + $0x40] sm:$0xff]  }
 0x120   :  { %2187 = vmatprep.mubr.bf16.mxu0 %v4037_v51  ;;  %v3609_v51 = vld [vmem:[#allocation5 + $0x6f8] ss:$24 sps:$4 sm:$0xff]  }
 0x121   :  { %2076 = vmatpush1.bf16.msra.mxu1 %v3585_v24  ;;  %v3675_v23 = vld [vmem:[#allocation5 + $0x610] ss:$24 sps:$4 sm:$0xff]   ;;  %v3680_v24 = vld [vmem:[#allocation5 + $0x644] ss:$24 sps:$4 sm:$0xff]  }
 0x122   :  { %2158 = vmatpush1.bf16.msra.mxu0 %v3588_v25  ;;  %2077 = vmatprep.subr.bf16.mxu1 %v3593_v26  ;;  %v3724_v25 = vld [vmem:[#allocation8] sm:$0xff]   ;;  %v3725_v26 = vld [vmem:[#allocation8 + $0x48] sm:$0xff]  }
 0x123   :  { %2159 = vmatprep.subr.bf16.mxu0 %v3596_v27  ;;  %v3678_v27 = vld [vmem:[#allocation5 + $0x640] ss:$24 sps:$4 sm:$0xff]  }
 0x125   :  { %2078 = vmatpush1.bf16.msra.mxu1 %v3591_v28  ;;  %v3683_v28 = vld [vmem:[#allocation5 + $0x674] ss:$24 sps:$4 sm:$0xff]  }
 0x126   :  { %2160 = vmatpush1.bf16.msra.mxu0 %v3594_v29  ;;  %2079 = vmatprep.subr.bf16.mxu1 %v3599_v30  ;;  %v3726_v29 = vld [vmem:[#allocation8 + $0x8] sm:$0xff]   ;;  %v3727_v30 = vld [vmem:[#allocation8 + $0x50] sm:$0xff]  }
 0x127   :  { %2161 = vmatprep.subr.bf16.mxu0 %v3602_v31  ;;  %v3681_v31 = vld [vmem:[#allocation5 + $0x670] ss:$24 sps:$4 sm:$0xff]  }
 0x129   :  { %2080 = vmatpush1.bf16.msra.mxu1 %v3597_v47  ;;  %v3686_v47 = vld [vmem:[#allocation5 + $0x6a4] ss:$24 sps:$4 sm:$0xff]  }
 0x12a   :  { %2162 = vmatpush1.bf16.msra.mxu0 %v3600_v6  ;;  %2081 = vmatprep.subr.bf16.mxu1 %v3605_v32  ;;  %v3728_v6 = vld [vmem:[#allocation8 + $0x10] sm:$0xff]   ;;  %v3729_v32 = vld [vmem:[#allocation8 + $0x58] sm:$0xff]  }
 0x12b   :  { %2163 = vmatprep.subr.bf16.mxu0 %v3608_v33  ;;  %v3689_v33 = vld [vmem:[#allocation5 + $0x6d4] ss:$24 sps:$4 sm:$0xff]  }
 0x12d   :  { %2082 = vmatpush1.bf16.msra.mxu1 %v3603_v35  ;;  %v3731_v35 = vld [vmem:[#allocation8 + $0x60] sm:$0xff]  }
 0x12e   :  { %2164 = vmatpush1.bf16.msra.mxu0 %v3606_v36  ;;  %2083 = vmatprep.subr.bf16.mxu1 %v3611_v37  ;;  %v3687_v36 = vld [vmem:[#allocation5 + $0x6d0] ss:$24 sps:$4 sm:$0xff]   ;;  %v3692_v37 = vld [vmem:[#allocation5 + $0x704] ss:$24 sps:$4 sm:$0xff]  }
 0x12f   :  { %2165 = vmatprep.subr.bf16.mxu0 %v3614_v38  ;;  %v3732_v38 = vld [vmem:[#allocation8 + $0x20] sm:$0xff]  }
 0x131   :  { %2084 = vmatpush1.bf16.msra.mxu1 %v3609_v51  ;;  %v3733_v51 = vld [vmem:[#allocation8 + $0x68] sm:$0xff]  }
 0x132   :  { %2166 = vmatpush1.bf16.msra.mxu0 %v3612_v39  ;;  %2085 = vmatprep.subr.bf16.mxu1 %v3617_v40  ;;  %v3690_v39 = vld [vmem:[#allocation5 + $0x700] ss:$24 sps:$4 sm:$0xff]   ;;  %v3695_v40 = vld [vmem:[#allocation5 + $0x734] ss:$24 sps:$4 sm:$0xff]  }
 0x133   :  { %2167 = vmatprep.subr.bf16.mxu0 %v3620_v41  ;;  %v3734_v41 = vld [vmem:[#allocation8 + $0x28] sm:$0xff]  }
 0x135   :  { %2086 = vmatpush1.bf16.msra.mxu1 %v3615_v42 }
 0x136   :  { %2168 = vmatpush1.bf16.msra.mxu0 %v3618_v43  ;;  %2087 = vmatprep.subr.bf16.mxu1 %v3623_v44  ;;  %v3735_v43 = vld [vmem:[#allocation8 + $0x70] sm:$0xff]  }
 0x137   :  { %2169 = vmatprep.subr.bf16.mxu0 %v3626_v45  ;;  %v3693_v45 = vld [vmem:[#allocation5 + $0x730] ss:$24 sps:$4 sm:$0xff]  }
 0x139   :  { %2088 = vmatpush1.bf16.msra.mxu1 %v3621_v46 }
 0x13a   :  { %2170 = vmatpush1.bf16.msra.mxu0 %v3624_v48  ;;  %2089 = vmatprep.subr.bf16.mxu1 %v3629_v49  ;;  %v3698_v48 = vld [vmem:[#allocation5 + $0x764] ss:$24 sps:$4 sm:$0xff]  }
 0x13b   :  { %2171 = vmatprep.subr.bf16.mxu0 %v3632_v50  ;;  %v3736_v50 = vld [vmem:[#allocation8 + $0x30] sm:$0xff]  }
 0x13d   :  { %2090 = vmatpush1.bf16.msra.mxu1 %v3627_v52  ;;  %v3737_v52 = vld [vmem:[#allocation8 + $0x78] sm:$0xff]  }
 0x13e   :  { %2172 = vmatpush1.bf16.msra.mxu0 %v3630_v53  ;;  %2091 = vmatprep.subr.bf16.mxu1 %v3635_v54  ;;  %v3696_v53 = vld [vmem:[#allocation5 + $0x760] ss:$24 sps:$4 sm:$0xff]   ;;  %v3701_v54 = vld [vmem:[#allocation5 + $0x794] ss:$24 sps:$4 sm:$0xff]  }
 0x13f   :  { %2173 = vmatprep.subr.bf16.mxu0 %v3638_v55  ;;  %v3738_v55 = vld [vmem:[#allocation8 + $0x38] sm:$0xff]  }
 0x141   :  { %2092 = vmatpush1.bf16.msra.mxu1 %v3633_v56  ;;  %v3699_v56 = vld [vmem:[#allocation5 + $0x790] ss:$24 sps:$4 sm:$0xff]  }
 0x142   :  { %2174 = vmatpush1.bf16.msra.mxu0 %v3636_v57  ;;  %2093 = vmatprep.subr.bf16.mxu1 %v3641_v58  ;;  %v3704_v57 = vld [vmem:[#allocation5 + $0x7c4] ss:$24 sps:$4 sm:$0xff]   ;;  %v3702_v58 = vld [vmem:[#allocation5 + $0x7c0] ss:$24 sps:$4 sm:$0xff]  }
 0x143   :  { %2175 = vmatprep.subr.bf16.mxu0 %v3644_v59  ;;  %v3707_v59 = vld [vmem:[#allocation5 + $0x7f4] ss:$24 sps:$4 sm:$0xff]  }
 0x145   :  { %2094 = vmatpush1.bf16.msra.mxu1 %v3639_v60  ;;  %v3705_v60 = vld [vmem:[#allocation5 + $0x7f0] ss:$24 sps:$4 sm:$0xff]  }
 0x146   :  { %2176 = vmatpush1.bf16.msra.mxu0 %v3642_v61  ;;  %2095 = vmatprep.subr.bf16.mxu1 %v3647_v62  ;;  %v3710_v61 = vld [vmem:[#allocation5 + $0x824] ss:$24 sps:$4 sm:$0xff]   ;;  %v3708_v62 = vld [vmem:[#allocation5 + $0x820] ss:$24 sps:$4 sm:$0xff]  }
 0x147   :  { %2177 = vmatprep.subr.bf16.mxu0 %v3650_v63  ;;  %v3713_v63 = vld [vmem:[#allocation5 + $0x854] ss:$24 sps:$4 sm:$0xff]  }
 0x149   :  { %2096 = vmatpush1.bf16.msra.mxu1 %v3645_v0  ;;  %v3711_v0 = vld [vmem:[#allocation5 + $0x850] ss:$24 sps:$4 sm:$0xff]  }
 0x14a   :  { %2178 = vmatpush1.bf16.msra.mxu0 %v3648_v1  ;;  %2097 = vmatprep.subr.bf16.mxu1 %v3653_v2  ;;  %v3716_v1 = vld [vmem:[#allocation5 + $0x884] ss:$24 sps:$4 sm:$0xff]   ;;  %v3714_v2 = vld [vmem:[#allocation5 + $0x880] ss:$24 sps:$4 sm:$0xff]  }
 0x14b   :  { %2179 = vmatprep.subr.bf16.mxu0 %v3656_v3  ;;  %v3719_v3 = vld [vmem:[#allocation5 + $0x8b4] ss:$24 sps:$4 sm:$0xff]  }
 0x14d   :  { %2098 = vmatpush1.bf16.msra.mxu1 %v3651_v4  ;;  %v3717_v4 = vld [vmem:[#allocation5 + $0x8b0] ss:$24 sps:$4 sm:$0xff]  }
 0x14e   :  { %2180 = vmatpush1.bf16.msra.mxu0 %v3654_v5  ;;  %2099 = vmatprep.subr.bf16.mxu1 %v3659_v8  ;;  %v3722_v5 = vld [vmem:[#allocation5 + $0x8e4] ss:$24 sps:$4 sm:$0xff]   ;;  %v3720_v8 = vld [vmem:[#allocation5 + $0x8e0] ss:$24 sps:$4 sm:$0xff]  }
 0x14f   :  { %2181 = vmatprep.subr.bf16.mxu0 %v3662_v9  ;;  %v377_v9 = vlaneseq }
 0x151   :  { %2100 = vmatpush1.bf16.msra.mxu1 %v3657_v10  ;;  %v4071_v10 = vshrl.u32 %v377_v9, 7 }
 0x152   :  { %2182 = vmatpush1.bf16.msra.mxu0 %v3660_v11  ;;  %2101 = vmatprep.subr.bf16.mxu1 %v3665_v12  ;;  %v4074_v12 = vld [vmem:[#allocation7] sm:$0x3f] }
 0x153   :  { %2183 = vmatprep.subr.bf16.mxu0 %v3668_v13  ;;  %v379_v11 = vsub.s32 0, %v4071_v10  ;;  %v383_v13 = vsub.s32 1, %v4071_v10 }
 0x155   :  { %2102 = vmatpush1.bf16.msra.mxu1 %v3663_v15  ;;  %v380_v15 = vrot.slane %v4074_v12, %v379_v11 }
 0x156   :  { %2184 = vmatpush1.bf16.msra.mxu0 %v3666_v16  ;;  %2103 = vmatprep.subr.bf16.mxu1 %v3671_v17  ;;  %v384_v16 = vrot.slane %v4074_v12, %v383_v13 }
 0x157   :  { %2185 = vmatprep.subr.bf16.mxu0 %v3674_v18 }
 0x159   :  { %2104 = vmatpush1.bf16.msra.mxu1 %v3669_v19 }
 0x15a   :  { %2186 = vmatpush1.bf16.msra.mxu0 %v3672_v20  ;;  %3181 = vmatprep.subr.bf16.mxu1 %v3723_v22 }
 0x15b   :  { %2196 = vmatprep.subr.bf16.mxu0 %v3677_v21 }
 0x15c   :  { %2106 = vmatmul.mubr.bf16.vlgmr.msra.gmra.mrb[4].mxu1 %v4057_v14 }
 0x15d   :  { %2188 = vmatmul.mubr.bf16.vlgmr.msra.gmra.mrb[4].mxu0 %v4043_v7  ;;  %3182 = vmatpush3.bf16.msra.mxu1 %v3724_v25  ;;  %v3684_v7 = vld [vmem:[#allocation5 + $0x6a0] ss:$24 sps:$4 sm:$0xff]  }
 0x15e   :  { %2197 = vmatpush1.bf16.msra.mxu0 %v3675_v23  ;;  %2228 = vmatprep.mubr.bf16.mxu0 %v4052_v34  ;;  %v3730_v34 = vld [vmem:[#allocation8 + $0x18] sm:$0xff]  }
 0x15f   :  { %2198 = vmatprep.subr.bf16.mxu0 %v3680_v24  ;;  %3183 = vmatprep.subr.bf16.mxu1 %v3725_v26 }
 0x161   :  { %3184 = vmatpush3.bf16.msra.mxu1 %v3726_v29 }
 0x162   :  { %2199 = vmatpush1.bf16.msra.mxu0 %v3678_v27  ;;  %3185 = vmatprep.subr.bf16.mxu1 %v3727_v30 }
 0x163   :  { %2200 = vmatprep.subr.bf16.mxu0 %v3683_v28  ;;  %v3739_v28 = vld [vmem:[#allocation8 + $0xc0] sm:$0xff]  }
 0x165   :  { %3186 = vmatpush3.bf16.msra.mxu1 %v3728_v6 }
 0x166   :  { %2201 = vmatpush1.bf16.msra.mxu0 %v3681_v31  ;;  %3187 = vmatprep.subr.bf16.mxu1 %v3729_v32 }
 0x167   :  { %2202 = vmatprep.subr.bf16.mxu0 %v3686_v47 }
 0x169   :  { %3188 = vmatpush3.bf16.msra.mxu1 %v3730_v34 }
 0x16a   :  { %2203 = vmatpush1.bf16.msra.mxu0 %v3684_v7  ;;  %3189 = vmatprep.subr.bf16.mxu1 %v3731_v35 }
 0x16b   :  { %2204 = vmatprep.subr.bf16.mxu0 %v3689_v33 }
 0x16d   :  { %3190 = vmatpush3.bf16.msra.mxu1 %v3732_v38 }
 0x16e   :  { %2205 = vmatpush1.bf16.msra.mxu0 %v3687_v36  ;;  %3191 = vmatprep.subr.bf16.mxu1 %v3733_v51 }
 0x16f   :  { %2206 = vmatprep.subr.bf16.mxu0 %v3692_v37  ;;  %v1902_v42 = vpop.f32.mrb[0].mxu1 }
 0x170   :  { %v1904_v44 = vpop.f32.mrb[1].mxu1  ;;  %v1903_v17 = vadd.f32 %v1902_v42, %v380_v15  ;;  %v3740_v42 = vld [vmem:[#allocation8 + $0x80] sm:$0xff]  }
 0x171   :  { %v1906_v46 = vpop.f32.mrb[2].mxu1  ;;  %3192 = vmatpush3.bf16.msra.mxu1 %v3734_v41  ;;  %v1905_v18 = vadd.f32 %v1904_v44, %v384_v16  ;;  %v3741_v44 = vld [vmem:[#allocation8 + $0xc8] sm:$0xff]  }
 0x172   :  { %2207 = vmatpush1.bf16.msra.mxu0 %v3690_v39  ;;  %v1907_v49 = vpop.f32.mrb[3].mxu1  ;;  %3193 = vmatprep.subr.bf16.mxu1 %v3735_v43  ;;  %v3743_v46 = vld [vmem:[#allocation8 + $0xd0] sm:$0xff]  }
 0x173   :  { %2208 = vmatprep.subr.bf16.mxu0 %v3695_v40  ;;  %v3745_v49 = vld [vmem:[#allocation8 + $0xd8] sm:$0xff]  }
 0x175   :  { %3194 = vmatpush3.bf16.msra.mxu1 %v3736_v50  ;;  %v3746_v50 = vld [vmem:[#allocation8 + $0x98] sm:$0xff]  }
 0x176   :  { %2209 = vmatpush1.bf16.msra.mxu0 %v3693_v45  ;;  %3195 = vmatprep.subr.bf16.mxu1 %v3737_v52  ;;  %v3742_v45 = vld [vmem:[#allocation8 + $0x88] sm:$0xff]   ;;  %v3747_v52 = vld [vmem:[#allocation8 + $0xe0] sm:$0xff]  }
 0x177   :  { %2210 = vmatprep.subr.bf16.mxu0 %v3698_v48  ;;  %v3744_v48 = vld [vmem:[#allocation8 + $0x90] sm:$0xff]  }
 0x179   :  { %3196 = vmatpush3.bf16.msra.mxu1 %v3738_v55  ;;  %v3750_v55 = vld [vmem:[#allocation8 + $0xa8] sm:$0xff]  }
 0x17a   :  { %2211 = vmatpush1.bf16.msra.mxu0 %v3696_v53  ;;  %3203 = vmatprep.subr.bf16.mxu1 %v3739_v28  ;;  %v3748_v53 = vld [vmem:[#allocation8 + $0xa0] sm:$0xff]  }
 0x17b   :  { %2212 = vmatprep.subr.bf16.mxu0 %v3701_v54  ;;  %v3749_v54 = vld [vmem:[#allocation8 + $0xe8] sm:$0xff]  }
 0x17e   :  { %2213 = vmatpush1.bf16.msra.mxu0 %v3699_v56  ;;  %v3751_v56 = vld [vmem:[#allocation8 + $0xf0] sm:$0xff]  }
 0x17f   :  { %2214 = vmatprep.subr.bf16.mxu0 %v3704_v57  ;;  %v3752_v57 = vld [vmem:[#allocation8 + $0xb0] sm:$0xff]  }
 0x182   :  { %2215 = vmatpush1.bf16.msra.mxu0 %v3702_v58  ;;  %v3753_v58 = vld [vmem:[#allocation8 + $0xf8] sm:$0xff]  }
 0x183   :  { %2216 = vmatprep.subr.bf16.mxu0 %v3707_v59  ;;  %v3754_v59 = vld [vmem:[#allocation8 + $0xb8] sm:$0xff]  }
 0x186   :  { %2217 = vmatpush1.bf16.msra.mxu0 %v3705_v60  ;;  %v3755_v60 = vld [vmem:[#allocation8 + $0x140] sm:$0xff]  }
 0x187   :  { %2218 = vmatprep.subr.bf16.mxu0 %v3710_v61  ;;  %v387_v61 = vsub.s32 2, %v4071_v10 }
 0x18a   :  { %2219 = vmatpush1.bf16.msra.mxu0 %v3708_v62  ;;  %v391_v62 = vsub.s32 3, %v4071_v10 }
 0x18b   :  { %2220 = vmatprep.subr.bf16.mxu0 %v3713_v63  ;;  %v388_v63 = vrot.slane %v4074_v12, %v387_v61 }
 0x18e   :  { %2221 = vmatpush1.bf16.msra.mxu0 %v3711_v0  ;;  %v392_v0 = vrot.slane %v4074_v12, %v391_v62 }
 0x18f   :  { %2222 = vmatprep.subr.bf16.mxu0 %v3716_v1 }
 0x192   :  { %2223 = vmatpush1.bf16.msra.mxu0 %v3714_v2 }
 0x193   :  { %2224 = vmatprep.subr.bf16.mxu0 %v3719_v3 }
 0x196   :  { %2225 = vmatpush1.bf16.msra.mxu0 %v3717_v4 }
 0x197   :  { %2226 = vmatprep.subr.bf16.mxu0 %v3722_v5 }
 0x19a   :  { %2227 = vmatpush1.bf16.msra.mxu0 %v3720_v8 }
 0x19d   :  { %2229 = vmatmul.mubr.bf16.vlgmr.msra.gmra.mrb[4].mxu0 %v4057_v14 }
 0x1b0   :  { %v1984_v19 = vpop.f32.mrb[0].mxu0 }
 0x1b1   :  { %v3248_v20 = vadd.f32 %v1984_v19, %v1903_v17  ;;  %v1986_v21 = vpop.f32.mrb[1].mxu0 }
 0x1b2   :  { %v3250_v22 = vadd.f32 %v1986_v21, %v1905_v18  ;;  %v1988_v14 = vpop.f32.mrb[2].mxu0 }
 0x1b3   :  { %v2237_v23 = vmin.f32 %v3248_v20, 20.0  ;;  %v1989_v24 = vpop.f32.mrb[3].mxu0  ;;  %vm2285_vm0 = vcmp.gt.f32.partialorder %v3248_v20, 20.0 }
 0x1b4   :  { %v2238_v25 = vmin.f32 %v3250_v22, 20.0  ;;  %vm2286_vm1 = vcmp.gt.f32.partialorder %v3250_v22, 20.0 }
 0x1b5   :  { %v2243_v26 = vmul.f32 1.442695, %v2237_v23 }
 0x1b6   :  { %v2245_v27 = vmul.f32 1.442695, %v2238_v25 }
 0x1b7   :  { %3771 = vpow2.f32 %v2243_v26 }
 0x1b8   :  { %3773 = vpow2.f32 %v2245_v27 }
 0x1c1   :  { %v3772_v29 = vpop.eup %3771 }
 0x1c2   :  { %v3774_v30 = vpop.eup %3773  ;;  %v2255_v31 = vadd.f32 2.0, %v3772_v29 }
 0x1c3   :  { %v2256_v47 = vadd.f32 2.0, %v3774_v30 }
 0x1c4   :  { %v2261_v6 = vmul.f32 %v3772_v29, %v2255_v31 }
 0x1c5   :  { %v2262_v32 = vmul.f32 %v3774_v30, %v2256_v47  ;;  %v3756_v47 = vld [vmem:[#allocation8 + $0x100] sm:$0xff]  }
 0x1c6   :  { %v2267_v7 = vadd.f32 2.0, %v2261_v6 }
 0x1c7   :  { %v2268_v33 = vadd.f32 2.0, %v2262_v32 }
 0x1c8   :  { %3775 = vrcp.f32 %v2267_v7  ;;  %v3758_v7 = vld [vmem:[#allocation8 + $0x108] sm:$0xff]  }
 0x1c9   :  { %3777 = vrcp.f32 %v2268_v33  ;;  %v3759_v33 = vld [vmem:[#allocation8 + $0x150] sm:$0xff]  }
 0x1d2   :  { %v3776_v34 = vpop.eup %3775 }
 0x1d3   :  { %v3778_v35 = vpop.eup %3777  ;;  %v2279_v36 = vmul.f32 %v3776_v34, %v2261_v6  ;;  %v3760_v34 = vld [vmem:[#allocation8 + $0x110] sm:$0xff]  }
 0x1d4   :  { %v2280_v37 = vmul.f32 %v3778_v35, %v2262_v32  ;;  %v3757_v32 = vld [vmem:[#allocation8 + $0x148] sm:$0xff]   ;;  %v3761_v35 = vld [vmem:[#allocation8 + $0x158] sm:$0xff]  }
 0x1d5   :  { %v2291_v38 = vmul.f32 %v3248_v20, %v2279_v36  ;;  %v3762_v36 = vld [vmem:[#allocation8 + $0x118] sm:$0xff]  }
 0x1d6   :  { %v2292_v51 = vmul.f32 %v3250_v22, %v2280_v37  ;;  %v3763_v37 = vld [vmem:[#allocation8 + $0x160] sm:$0xff]  }
 0x1d7   :  { %v2297_v39 = vsel %vm2285_vm0, %v3248_v20, %v2291_v38  ;;  %v395_v38 = vsub.s32 4, %v4071_v10 }
 0x1d8   :  { %v2298_v40 = vsel %vm2286_vm1, %v3250_v22, %v2292_v51  ;;  %v2303_v43 = vpack.c.bf16 %v2297_v39, %v2297_v39  ;;  %v3764_v51 = vld [vmem:[#allocation8 + $0x120] sm:$0xff]   ;;  %v399_v39 = vsub.s32 5, %v4071_v10 }
 0x1d9   :  { %v2304_v41 = vpack.c.bf16 %v2298_v40, %v2298_v40  ;;  %v3765_v40 = vld [vmem:[#allocation8 + $0x168] sm:$0xff]  }
 0x1db   :  { %2732 = vmatprep.mubr.bf16.mxu1 %v2304_v41  ;;  %v396_v41 = vrot.slane %v4074_v12, %v395_v38 }
 0x1dc   :  { %2733 = vmatmul.mubr.bf16.vlgmr.msra.gmra.mrb[8].mxu1 %v2303_v43  ;;  %v400_v43 = vrot.slane %v4074_v12, %v399_v39 }
 0x1dd   :  { %3204 = vmatpush3.bf16.msra.mxu1 %v3740_v42  ;;  %v3766_v42 = vld [vmem:[#allocation8 + $0x128] sm:$0xff]  }
 0x1de   :  { %3205 = vmatprep.subr.bf16.mxu1 %v3741_v44  ;;  %v3767_v44 = vld [vmem:[#allocation8 + $0x170] sm:$0xff]  }
 0x1e1   :  { %3206 = vmatpush3.bf16.msra.mxu1 %v3742_v45 }
 0x1e2   :  { %3207 = vmatprep.subr.bf16.mxu1 %v3743_v46 }
 0x1e5   :  { %3208 = vmatpush3.bf16.msra.mxu1 %v3744_v48 }
 0x1e6   :  { %3209 = vmatprep.subr.bf16.mxu1 %v3745_v49  ;;  %v3768_v49 = vld [vmem:[#allocation8 + $0x130] sm:$0xff]  }
 0x1e9   :  { %3210 = vmatpush3.bf16.msra.mxu1 %v3746_v50 }
 0x1ea   :  { %3211 = vmatprep.subr.bf16.mxu1 %v3747_v52 }
 0x1ed   :  { %3212 = vmatpush3.bf16.msra.mxu1 %v3748_v53  ;;  %v3769_v53 = vld [vmem:[#allocation8 + $0x178] sm:$0xff]  }
 0x1ee   :  { %3213 = vmatprep.subr.bf16.mxu1 %v3749_v54 }
 0x1f1   :  { %3214 = vmatpush3.bf16.msra.mxu1 %v3750_v55 }
 0x1f2   :  { %3215 = vmatprep.subr.bf16.mxu1 %v3751_v56 }
 0x1f5   :  { %3216 = vmatpush3.bf16.msra.mxu1 %v3752_v57  ;;  %v3770_v57 = vld [vmem:[#allocation8 + $0x138] sm:$0xff]  }
 0x1f6   :  { %3217 = vmatprep.subr.bf16.mxu1 %v3753_v58 }
 0x1f9   :  { %3218 = vmatpush3.bf16.msra.mxu1 %v3754_v59 }
 0x1fa   :  { %3225 = vmatprep.subr.bf16.mxu1 %v3755_v60 }
 0x22f   :  { %v2107_v1 = vpop.f32.mrb[4].mxu1 }
 0x230   :  { %v3251_v2 = vadd.f32 %v2107_v1, %v388_v63  ;;  %v2109_v3 = vpop.f32.mrb[5].mxu1 }
 0x231   :  { %v3252_v4 = vadd.f32 %v2109_v3, %v392_v0  ;;  %v2111_v5 = vpop.f32.mrb[6].mxu1 }
 0x232   :  { %v2239_v8 = vmin.f32 %v3251_v2, 20.0  ;;  %v2112_v9 = vpop.f32.mrb[7].mxu1  ;;  %vm2287_vm2 = vcmp.gt.f32.partialorder %v3251_v2, 20.0 }
 0x233   :  { %v2240_v11 = vmin.f32 %v3252_v4, 20.0  ;;  %vm2288_vm3 = vcmp.gt.f32.partialorder %v3252_v4, 20.0 }
 0x234   :  { %v2247_v13 = vmul.f32 1.442695, %v2239_v8 }
 0x235   :  { %v2249_v15 = vmul.f32 1.442695, %v2240_v11 }
 0x236   :  { %3779 = vpow2.f32 %v2247_v13 }
 0x237   :  { %3781 = vpow2.f32 %v2249_v15 }
 0x240   :  { %v3780_v16 = vpop.eup %3779 }
 0x241   :  { %v3782_v17 = vpop.eup %3781  ;;  %v2257_v18 = vadd.f32 2.0, %v3780_v16 }
 0x242   :  { %v2258_v19 = vadd.f32 2.0, %v3782_v17 }
 0x243   :  { %v2263_v20 = vmul.f32 %v3780_v16, %v2257_v18 }
 0x244   :  { %v2264_v21 = vmul.f32 %v3782_v17, %v2258_v19 }
 0x245   :  { %v2269_v22 = vadd.f32 2.0, %v2263_v20 }
 0x246   :  { %v2270_v14 = vadd.f32 2.0, %v2264_v21 }
 0x247   :  { %3783 = vrcp.f32 %v2269_v22  ;;  %v3132_v22 = vld [vmem:[#allocation10] ss:$0 sm:$0xff] }
 0x248   :  { %3785 = vrcp.f32 %v2270_v14 }
 0x251   :  { %v3784_v23 = vpop.eup %3783 }
 0x252   :  { %v3786_v24 = vpop.eup %3785  ;;  %v2281_v25 = vmul.f32 %v3784_v23, %v2263_v20 }
 0x253   :  { %v2282_v26 = vmul.f32 %v3786_v24, %v2264_v21 }
 0x254   :  { %v2293_v27 = vmul.f32 %v3251_v2, %v2281_v25 }
 0x255   :  { %v2294_v28 = vmul.f32 %v3252_v4, %v2282_v26 }
 0x256   :  { %v2299_v29 = vsel %vm2287_vm2, %v3251_v2, %v2293_v27 }
 0x257   :  { %v2300_v30 = vsel %vm2288_vm3, %v3252_v4, %v2294_v28  ;;  %v2305_v6 = vpack.c.bf16 %v2299_v29, %v2299_v29 }
 0x258   :  { %v2306_v31 = vpack.c.bf16 %v2300_v30, %v2300_v30 }
 0x25a   :  { %2772 = vmatprep.mubr.bf16.mxu1 %v2306_v31 }
 0x25b   :  { %2773 = vmatmul.mubr.bf16.vlgmr.msra.gmra.mrb[12].mxu1 %v2305_v6 }
 0x25c   :  { %3226 = vmatpush3.bf16.msra.mxu1 %v3756_v47 }
 0x25d   :  { %3227 = vmatprep.subr.bf16.mxu1 %v3757_v32 }
 0x260   :  { %3228 = vmatpush3.bf16.msra.mxu1 %v3758_v7 }
 0x261   :  { %3229 = vmatprep.subr.bf16.mxu1 %v3759_v33 }
 0x264   :  { %3230 = vmatpush3.bf16.msra.mxu1 %v3760_v34 }
 0x265   :  { %3231 = vmatprep.subr.bf16.mxu1 %v3761_v35 }
 0x268   :  { %3232 = vmatpush3.bf16.msra.mxu1 %v3762_v36 }
 0x269   :  { %3233 = vmatprep.subr.bf16.mxu1 %v3763_v37 }
 0x26c   :  { %3234 = vmatpush3.bf16.msra.mxu1 %v3764_v51 }
 0x26d   :  { %3235 = vmatprep.subr.bf16.mxu1 %v3765_v40 }
 0x270   :  { %v2230_v45 = vpop.f32.mrb[4].mxu0  ;;  %3236 = vmatpush3.bf16.msra.mxu1 %v3766_v42 }
 0x271   :  { %v3253_v46 = vadd.f32 %v2230_v45, %v396_v41  ;;  %v2232_v48 = vpop.f32.mrb[5].mxu0  ;;  %3237 = vmatprep.subr.bf16.mxu1 %v3767_v44 }
 0x272   :  { %v3254_v50 = vadd.f32 %v2232_v48, %v400_v43  ;;  %v2234_v52 = vpop.f32.mrb[6].mxu0 }
 0x273   :  { %v2241_v10 = vmin.f32 %v3253_v46, 20.0  ;;  %v2235_v54 = vpop.f32.mrb[7].mxu0  ;;  %vm2289_vm4 = vcmp.gt.f32.partialorder %v3253_v46, 20.0 }
 0x274   :  { %v2242_v55 = vmin.f32 %v3254_v50, 20.0  ;;  %3238 = vmatpush3.bf16.msra.mxu1 %v3768_v49  ;;  %vm2290_vm5 = vcmp.gt.f32.partialorder %v3254_v50, 20.0 }
 0x275   :  { %v2251_v56 = vmul.f32 1.442695, %v2241_v10  ;;  %3239 = vmatprep.subr.bf16.mxu1 %v3769_v53 }
 0x276   :  { %v2253_v58 = vmul.f32 1.442695, %v2242_v55 }
 0x277   :  { %3787 = vpow2.f32 %v2251_v56 }
 0x278   :  { %3789 = vpow2.f32 %v2253_v58  ;;  %3240 = vmatpush3.bf16.msra.mxu1 %v3770_v57 }
 0x281   :  { %v3788_v12 = vpop.eup %3787 }
 0x282   :  { %v3790_v59 = vpop.eup %3789  ;;  %v2259_v60 = vadd.f32 2.0, %v3788_v12 }
 0x283   :  { %v2260_v61 = vadd.f32 2.0, %v3790_v59 }
 0x284   :  { %v2265_v62 = vmul.f32 %v3788_v12, %v2259_v60 }
 0x285   :  { %v2266_v63 = vmul.f32 %v3790_v59, %v2260_v61 }
 0x286   :  { %v2271_v0 = vadd.f32 2.0, %v2265_v62 }
 0x287   :  { %v2272_v1 = vadd.f32 2.0, %v2266_v63 }
 0x288   :  { %3791 = vrcp.f32 %v2271_v0 }
 0x289   :  { %3793 = vrcp.f32 %v2272_v1 }
 0x292   :  { %v3792_v2 = vpop.eup %3791 }
 0x293   :  { %v3794_v3 = vpop.eup %3793  ;;  %v2283_v4 = vmul.f32 %v3792_v2, %v2265_v62 }
 0x294   :  { %v2284_v5 = vmul.f32 %v3794_v3, %v2266_v63 }
 0x295   :  { %v2295_v8 = vmul.f32 %v3253_v46, %v2283_v4 }
 0x296   :  { %v2296_v9 = vmul.f32 %v3254_v50, %v2284_v5 }
 0x297   :  { %v2301_v11 = vsel %vm2289_vm4, %v3253_v46, %v2295_v8 }
 0x298   :  { %v2302_v13 = vsel %vm2290_vm5, %v3254_v50, %v2296_v9  ;;  %v2307_v16 = vpack.c.bf16 %v2301_v11, %v2301_v11 }
 0x299   :  { %v2308_v15 = vpack.c.bf16 %v2302_v13, %v2302_v13 }
 0x29b   :  { %2812 = vmatprep.mubr.bf16.mxu1 %v2308_v15 }
 0x29c   :  { %2813 = vmatmul.mubr.bf16.vlgmr.msra.gmra.mrb[16].mxu1 %v2307_v16 }
 0x2af   :  { %v3197_v17 = vpop.f32.mrb[8].mxu1 }
 0x2b0   :  { %v3198_v18 = vpop.f32.mrb[9].mxu1 }
 0x2b1   :  { %v3199_v19 = vadd.f32 %v3198_v18, %v3197_v17  ;;  %v3200_v20 = vpop.f32.mrb[10].mxu1 }
 0x2b2   :  { %v3201_v21 = vpop.f32.mrb[11].mxu1 }
 0x2b3   :  { %v2735_v24 = vadd.f32 %v3199_v19, %v3132_v22 }
 0x32e   :  { %v3219_v14 = vpop.f32.mrb[12].mxu1 }
 0x32f   :  { %v3220_v23 = vpop.f32.mrb[13].mxu1 }
 0x330   :  { %v3221_v25 = vadd.f32 %v3220_v23, %v3219_v14  ;;  %v3222_v26 = vpop.f32.mrb[14].mxu1 }
 0x331   :  { %v3223_v27 = vpop.f32.mrb[15].mxu1 }
 0x332   :  { %v2775_v28 = vadd.f32 %v3221_v25, %v2735_v24 }
 0x36f   :  { %v3241_v29 = vpop.f32.mrb[16].mxu1 }
 0x370   :  { %v3242_v30 = vpop.f32.mrb[17].mxu1 }
 0x371   :  { %v3243_v31 = vadd.f32 %v3242_v30, %v3241_v29  ;;  %v3244_v47 = vpop.f32.mrb[18].mxu1 }
 0x372   :  { %v3245_v6 = vpop.f32.mrb[19].mxu1 }
 0x373   :  { %v2815_v32 = vadd.f32 %v3243_v31, %v2775_v28 }
 0x375   :  { %2820 = vst [vmem:[#allocation11] sm:$0xff] %v2815_v32 }
 0x376   :  { %3916 = shalt.err (!%p3913_p2)
}
 0x377   :  { %s3917_s6 = scalar_lea.hbm %s4104_s5, 128 }
 0x378   :  { %p3918_p3 = scmp.ne.s32.totalorder %s4104_s5, %s3917_s6  ;;  %p3921_p4 = scmp.lt.u32.totalorder %s3917_s6, %s4104_s5 }
 0x37a   :  { %p3923_p5 = pnand %p3921_p4, %p3918_p3 }
 0x37c   :  { %3926 = shalt.err (!%p3923_p5)
}
 0x37d   :  { %2830 = dma.vmem_to_hbm [thread:$0]  %s2828_s28, 128, %s4104_s5, [#allocation4]  }
 0x37e   :  { %3933 = dma.done.wait [#allocation4], 128  }
 0x37f   :  { %3934 = vsyncadd [#allocation4], 4294967168 }
 0x380   :  { %2834 = vsyncpa [#allocation3], 1 }
 0x381   :  { %2835 = vsyncpa [#allocation6], 1 }
 0x382   :  { %2836 = vsyncpa [#allocation9], 1 }
 0x383   :  { %2837 = vsyncpa [#allocation4], 1 }

// kernel: tpu_custom_call.1
= control target key start
LH: loop header
LB: loop body
LE: loop exit
PB: predicated region body
PF: predicated region fallthrough
CT: control target
= control target key end

     0   :  { %10 = vsyncpa [#allocation3], 0  ;;  %s4099_s0 = inlined_call_operand.hbm [shape: bf16[8,768], index: 0, kind: input, shape index: {}]   ;;  %s4100_s1 = inlined_call_operand.hbm [shape: bf16[768,768], index: 1, kind: input, shape index: {}]   ;;  %s4101_s2 = inlined_call_operand.hbm [shape: f32[1,768], index: 2, kind: input, shape index: {}]   ;;  %s4102_s3 = inlined_call_operand.hbm [shape: bf16[768,128], index: 3, kind: input, shape index: {}]   ;;  %s4103_s4 = inlined_call_operand.hbm [shape: f32[1,128], index: 4, kind: input, shape index: {}]   ;;  %s4104_s5 = inlined_call_operand.hbm [shape: f32[8,128], index: 5, kind: output, shape index: {}]  }
   0x1   :  { %11 = vsyncpa [#allocation6], 0 }
   0x2   :  { %12 = vsyncpa [#allocation9], 0 }
   0x3   :  { %13 = vsyncpa [#allocation4], 0  ;;  %s3935_s18 = smov [#allocation5]   ;;  %s3795_s22 = scalar_lea.hbm %s4100_s1, 36864 }
   0x4   :  { %s29_s19 = sshll.u32 %s3935_s18, 4  ;;  %p3796_p0 = scmp.ne.s32.totalorder %s4100_s1, %s3795_s22  ;;  %s30_s19 = int_to_ptr.vmem [resolvable:$true] %s29_s19 }
   0x5   :  { %p3799_p1 = scmp.lt.u32.totalorder %s3795_s22, %s4100_s1 }
   0x7   :  { %p3801_p2 = pnand %p3799_p1, %p3796_p0 }
   0x9   :  { %3804 = shalt.err (!%p3801_p2)
}
   0xa   :  { %s3805_s27 = scalar_lea.vmem %s30_s19, 36864  ;;  %p3810_p4 = scmp.lt.s32.totalorder %s30_s19, %s30_s19 }
   0xb   :  { %p3806_p3 = scmp.ne.s32.totalorder %s30_s19, %s3805_s27  ;;  %p3811_p5 = scmp.lt.s32.totalorder %s3805_s27, %s3805_s27 }
   0xd   :  { %p3812_p6 = por %p3811_p5, %p3810_p4 }
   0xf   :  { %p3813_p7 = pnand %p3812_p6, %p3806_p3 }
  0x11   :  { %3816 = shalt.err (!%p3813_p7)
}
  0x12   :  { %s3936_s28 = smov 384   ;;  %s3937_s29 = smov 24  }
  0x13   :  { %35 = dma.hbm_to_vmem [thread:$0]  %s4100_s1, 36864, %s30_s19, [#allocation6], %s3936_s28, %s3936_s28, %s3937_s29  }
  0x14   :  { %s3938_s7 = smov [#allocation8]   ;;  %s3817_s11 = scalar_lea.hbm %s4102_s3, 6144 }
  0x15   :  { %s51_s8 = sshll.u32 %s3938_s7, 4  ;;  %p3818_p8 = scmp.ne.s32.totalorder %s4102_s3, %s3817_s11  ;;  %s52_s8 = int_to_ptr.vmem [resolvable:$true] %s51_s8 }
  0x16   :  { %p3821_p9 = scmp.lt.u32.totalorder %s3817_s11, %s4102_s3 }
  0x18   :  { %p3823_p10 = pnand %p3821_p9, %p3818_p8 }
  0x1a   :  { %3826 = shalt.err (!%p3823_p10)
}
  0x1b   :  { %s3827_s16 = scalar_lea.vmem %s52_s8, 6144  ;;  %p3832_p12 = scmp.lt.s32.totalorder %s52_s8, %s52_s8 }
  0x1c   :  { %p3828_p11 = scmp.ne.s32.totalorder %s52_s8, %s3827_s16  ;;  %p3833_p13 = scmp.lt.s32.totalorder %s3827_s16, %s3827_s16 }
  0x1e   :  { %p3834_p0 = por %p3833_p13, %p3832_p12 }
  0x20   :  { %p3835_p1 = pnand %p3834_p0, %p3828_p11 }
  0x22   :  { %3838 = shalt.err (!%p3835_p1)
}
  0x23   :  { %s3939_s1 = smov 64   ;;  %s3940_s17 = smov 4  }
  0x24   :  { %57 = dma.hbm_to_vmem [thread:$0]  %s4102_s3, 6144, %s52_s8, [#allocation9], %s3939_s1, %s3939_s1, %s3940_s17  }
  0x25   :  { %s3941_s20 = smov [#allocation2]   ;;  %s3942_s22 = smov [#allocation7]  }
  0x26   :  { %s20_s21 = sshll.u32 %s3941_s20, 4  ;;  %s42_s23 = sshll.u32 %s3942_s22, 4  ;;  %s21_s21 = int_to_ptr.vmem [resolvable:$true] %s20_s21  ;;  %s43_s23 = int_to_ptr.vmem [resolvable:$true] %s42_s23 }
  0x27   :  { %s3839_s26 = scalar_lea.hbm %s4099_s0, 384 }
  0x28   :  { %p3840_p2 = scmp.ne.s32.totalorder %s4099_s0, %s3839_s26  ;;  %p3843_p3 = scmp.lt.u32.totalorder %s3839_s26, %s4099_s0 }
  0x2a   :  { %p3845_p4 = pnand %p3843_p3, %p3840_p2 }
  0x2c   :  { %3848 = shalt.err (!%p3845_p4)
}
  0x2d   :  { %s3849_s3 = scalar_lea.vmem %s21_s21, 384  ;;  %p3854_p6 = scmp.lt.s32.totalorder %s21_s21, %s21_s21 }
  0x2e   :  { %p3850_p5 = scmp.ne.s32.totalorder %s21_s21, %s3849_s3  ;;  %p3855_p7 = scmp.lt.s32.totalorder %s3849_s3, %s3849_s3 }
  0x30   :  { %p3856_p8 = por %p3855_p7, %p3854_p6 }
  0x32   :  { %p3857_p9 = pnand %p3856_p8, %p3850_p5 }
  0x34   :  { %3860 = shalt.err (!%p3857_p9)
}
  0x35   :  { %23 = dma.hbm_to_vmem [thread:$0]  %s4099_s0, 384, %s21_s21, [#allocation3]  }
  0x36   :  { %s3861_s10 = scalar_lea.hbm %s4101_s2, 96 }
  0x37   :  { %p3862_p10 = scmp.ne.s32.totalorder %s4101_s2, %s3861_s10  ;;  %p3865_p11 = scmp.lt.u32.totalorder %s3861_s10, %s4101_s2 }
  0x39   :  { %p3867_p12 = pnand %p3865_p11, %p3862_p10 }
  0x3b   :  { %3870 = shalt.err (!%p3867_p12)
}
  0x3c   :  { %s3871_s15 = scalar_lea.vmem %s43_s23, 96  ;;  %p3876_p0 = scmp.lt.s32.totalorder %s43_s23, %s43_s23 }
  0x3d   :  { %p3872_p13 = scmp.ne.s32.totalorder %s43_s23, %s3871_s15  ;;  %p3877_p1 = scmp.lt.s32.totalorder %s3871_s15, %s3871_s15 }
  0x3f   :  { %p3878_p2 = por %p3877_p1, %p3876_p0 }
  0x41   :  { %p3879_p3 = pnand %p3878_p2, %p3872_p13 }
  0x43   :  { %3882 = shalt.err (!%p3879_p3)
}
  0x44   :  { %45 = dma.hbm_to_vmem [thread:$0]  %s4101_s2, 96, %s43_s23, [#allocation6]  }
  0x45   :  { %s3943_s1 = smov [#allocation10]   ;;  %s3883_s20 = scalar_lea.hbm %s4103_s4, 16 }
  0x46   :  { %s64_s17 = sshll.u32 %s3943_s1, 4  ;;  %p3884_p4 = scmp.ne.s32.totalorder %s4103_s4, %s3883_s20  ;;  %s65_s17 = int_to_ptr.vmem [resolvable:$true] %s64_s17 }
  0x47   :  { %p3887_p5 = scmp.lt.u32.totalorder %s3883_s20, %s4103_s4 }
  0x49   :  { %p3889_p6 = pnand %p3887_p5, %p3884_p4 }
  0x4b   :  { %3892 = shalt.err (!%p3889_p6)
}
  0x4c   :  { %s3893_s26 = scalar_lea.vmem %s65_s17, 16  ;;  %s3897_s2 = scalar_lea.vmem %s65_s17, 32 }
  0x4d   :  { %p3894_p7 = scmp.ne.s32.totalorder %s65_s17, %s3893_s26  ;;  %p3898_p8 = scmp.lt.s32.totalorder %s65_s17, %s65_s17 }
  0x4e   :  { %p3899_p9 = scmp.lt.s32.totalorder %s3897_s2, %s3893_s26 }
  0x50   :  { %p3900_p10 = por %p3899_p9, %p3898_p8 }
  0x52   :  { %p3901_p11 = pnand %p3900_p10, %p3894_p7 }
  0x54   :  { %3904 = shalt.err (!%p3901_p11)
}
  0x55   :  { %67 = dma.hbm_to_vmem [thread:$0]  %s4103_s4, 16, %s65_s17, [#allocation9]  }
  0x56   :  { %3927 = dma.done.wait [#allocation3], 384  }
  0x57   :  { %3928 = vsyncadd [#allocation3], 4294966912 }
  0x58   :  { %3929 = dma.done.wait [#allocation6], 36960  }
  0x59   :  { %3930 = vsyncadd [#allocation6], 4294930336 }
  0x5a   :  { %3931 = dma.done.wait [#allocation9], 6160  }
  0x5b   :  { %3932 = vsyncadd [#allocation9], 4294961136  ;;  %v3285_v0 = vld [vmem:[#allocation5 + $0x4] ss:$24 sps:$4 sm:$0xff]   ;;  %v3289_v2 = vld [vmem:[#allocation5] ss:$24 sps:$4 sm:$0xff]  }
  0x5c   :  { %v3287_v1 = vld [vmem:[#allocation5 + $0x304] ss:$24 sps:$4 sm:$0xff]   ;;  %1868 = vmatprep.subr.bf16.mxu1 %v3285_v0  ;;  %v3290_v3 = vld [vmem:[#allocation5 + $0x300] ss:$24 sps:$4 sm:$0xff]   ;;  %v3291_v4 = vld [vmem:[#allocation5 + $0x34] ss:$24 sps:$4 sm:$0xff]  }
  0x5d   :  { %1909 = vmatprep.subr.bf16.mxu0 %v3287_v1  ;;  %1869 = vmatpush1.bf16.msra.mxu1 %v3289_v2  ;;  %v3293_v5 = vld [vmem:[#allocation5 + $0x334] ss:$24 sps:$4 sm:$0xff]   ;;  %v3295_v6 = vld [vmem:[#allocation5 + $0x30] ss:$24 sps:$4 sm:$0xff]   ;;  %v3297_v8 = vld [vmem:[#allocation5 + $0x64] ss:$24 sps:$4 sm:$0xff]  }
  0x5e   :  { %1910 = vmatpush1.bf16.msra.mxu0 %v3290_v3  ;;  %1870 = vmatprep.subr.bf16.mxu1 %v3291_v4  ;;  %v3296_v7 = vld [vmem:[#allocation5 + $0x330] ss:$24 sps:$4 sm:$0xff]   ;;  %v3299_v9 = vld [vmem:[#allocation5 + $0x364] ss:$24 sps:$4 sm:$0xff]   ;;  %v3301_v10 = vld [vmem:[#allocation5 + $0x60] ss:$24 sps:$4 sm:$0xff]  }
  0x5f   :  { %1911 = vmatprep.subr.bf16.mxu0 %v3293_v5  ;;  %v3302_v11 = vld [vmem:[#allocation5 + $0x360] ss:$24 sps:$4 sm:$0xff]   ;;  %v3303_v12 = vld [vmem:[#allocation5 + $0x94] ss:$24 sps:$4 sm:$0xff]   ;;  %v3307_v14 = vld [vmem:[#allocation5 + $0x90] ss:$24 sps:$4 sm:$0xff]  }
  0x60   :  { %v3305_v13 = vld [vmem:[#allocation5 + $0x394] ss:$24 sps:$4 sm:$0xff]   ;;  %v3308_v15 = vld [vmem:[#allocation5 + $0x390] ss:$24 sps:$4 sm:$0xff]   ;;  %v3309_v16 = vld [vmem:[#allocation5 + $0xc4] ss:$24 sps:$4 sm:$0xff]  }
  0x61   :  { %1871 = vmatpush1.bf16.msra.mxu1 %v3295_v6  ;;  %v3311_v17 = vld [vmem:[#allocation5 + $0x3c4] ss:$24 sps:$4 sm:$0xff]   ;;  %v3313_v18 = vld [vmem:[#allocation5 + $0xc0] ss:$24 sps:$4 sm:$0xff]   ;;  %v3315_v20 = vld [vmem:[#allocation5 + $0xf4] ss:$24 sps:$4 sm:$0xff]  }
  0x62   :  { %1912 = vmatpush1.bf16.msra.mxu0 %v3296_v7  ;;  %1872 = vmatprep.subr.bf16.mxu1 %v3297_v8  ;;  %v3314_v19 = vld [vmem:[#allocation5 + $0x3c0] ss:$24 sps:$4 sm:$0xff]   ;;  %v3317_v21 = vld [vmem:[#allocation5 + $0x3f4] ss:$24 sps:$4 sm:$0xff]   ;;  %v3319_v22 = vld [vmem:[#allocation5 + $0xf0] ss:$24 sps:$4 sm:$0xff]  }
  0x63   :  { %1913 = vmatprep.subr.bf16.mxu0 %v3299_v9  ;;  %v3320_v23 = vld [vmem:[#allocation5 + $0x3f0] ss:$24 sps:$4 sm:$0xff]   ;;  %v3321_v24 = vld [vmem:[#allocation5 + $0x124] ss:$24 sps:$4 sm:$0xff]   ;;  %v3325_v26 = vld [vmem:[#allocation5 + $0x120] ss:$24 sps:$4 sm:$0xff]  }
  0x64   :  { %v3323_v25 = vld [vmem:[#allocation5 + $0x424] ss:$24 sps:$4 sm:$0xff]   ;;  %v3326_v27 = vld [vmem:[#allocation5 + $0x420] ss:$24 sps:$4 sm:$0xff]   ;;  %v3327_v28 = vld [vmem:[#allocation5 + $0x154] ss:$24 sps:$4 sm:$0xff]  }
  0x65   :  { %1873 = vmatpush1.bf16.msra.mxu1 %v3301_v10  ;;  %v3329_v29 = vld [vmem:[#allocation5 + $0x454] ss:$24 sps:$4 sm:$0xff]   ;;  %v3331_v30 = vld [vmem:[#allocation5 + $0x150] ss:$24 sps:$4 sm:$0xff]   ;;  %v3333_v32 = vld [vmem:[#allocation5 + $0x184] ss:$24 sps:$4 sm:$0xff]  }
  0x66   :  { %1914 = vmatpush1.bf16.msra.mxu0 %v3302_v11  ;;  %1874 = vmatprep.subr.bf16.mxu1 %v3303_v12  ;;  %v3332_v31 = vld [vmem:[#allocation5 + $0x450] ss:$24 sps:$4 sm:$0xff]   ;;  %v3335_v33 = vld [vmem:[#allocation5 + $0x484] ss:$24 sps:$4 sm:$0xff]   ;;  %v3337_v34 = vld [vmem:[#allocation5 + $0x180] ss:$24 sps:$4 sm:$0xff]  }
  0x67   :  { %1915 = vmatprep.subr.bf16.mxu0 %v3305_v13  ;;  %v3338_v35 = vld [vmem:[#allocation5 + $0x480] ss:$24 sps:$4 sm:$0xff]   ;;  %v3339_v36 = vld [vmem:[#allocation5 + $0x1b4] ss:$24 sps:$4 sm:$0xff]   ;;  %v3343_v38 = vld [vmem:[#allocation5 + $0x1b0] ss:$24 sps:$4 sm:$0xff]  }
  0x68   :  { %v3341_v37 = vld [vmem:[#allocation5 + $0x4b4] ss:$24 sps:$4 sm:$0xff]   ;;  %v3344_v39 = vld [vmem:[#allocation5 + $0x4b0] ss:$24 sps:$4 sm:$0xff]   ;;  %v3345_v40 = vld [vmem:[#allocation5 + $0x1e4] ss:$24 sps:$4 sm:$0xff]  }
  0x69   :  { %1875 = vmatpush1.bf16.msra.mxu1 %v3307_v14  ;;  %v3347_v41 = vld [vmem:[#allocation5 + $0x4e4] ss:$24 sps:$4 sm:$0xff]   ;;  %v3349_v42 = vld [vmem:[#allocation5 + $0x1e0] ss:$24 sps:$4 sm:$0xff]   ;;  %v3351_v44 = vld [vmem:[#allocation5 + $0x214] ss:$24 sps:$4 sm:$0xff]  }
  0x6a   :  { %1916 = vmatpush1.bf16.msra.mxu0 %v3308_v15  ;;  %1876 = vmatprep.subr.bf16.mxu1 %v3309_v16  ;;  %v3350_v43 = vld [vmem:[#allocation5 + $0x4e0] ss:$24 sps:$4 sm:$0xff]   ;;  %v3353_v45 = vld [vmem:[#allocation5 + $0x514] ss:$24 sps:$4 sm:$0xff]   ;;  %v3355_v49 = vld [vmem:[#allocation5 + $0x210] ss:$24 sps:$4 sm:$0xff]  }
  0x6b   :  { %1917 = vmatprep.subr.bf16.mxu0 %v3311_v17  ;;  %v84_v46 = vld [vmem:[#allocation2] sm:$0xff]  ;;  %v85_v48 = vld [vmem:[#allocation2 + $0x8] sm:$0xff]  ;;  %v3357_v52 = vld [vmem:[#allocation5 + $0x244] ss:$24 sps:$4 sm:$0xff]   ;;  %s3944_s4 = smov [#allocation11]  }
  0x6c   :  { %v4035_v47 = vcombine.high %v84_v46, %v84_v46  ;;  %v3356_v50 = vld [vmem:[#allocation5 + $0x510] ss:$24 sps:$4 sm:$0xff]   ;;  %v4037_v51 = vcombine.high %v85_v48, %v85_v48  ;;  %v3359_v53 = vld [vmem:[#allocation5 + $0x544] ss:$24 sps:$4 sm:$0xff]   ;;  %v3361_v54 = vld [vmem:[#allocation5 + $0x240] ss:$24 sps:$4 sm:$0xff]   ;;  %v4041_v6 = vcombine.low %v84_v46, %v84_v46  ;;  %v4043_v7 = vcombine.low %v85_v48, %v85_v48 }
  0x6d   :  { %1877 = vmatpush1.bf16.msra.mxu1 %v3313_v18  ;;  %v3362_v55 = vld [vmem:[#allocation5 + $0x540] ss:$24 sps:$4 sm:$0xff]   ;;  %v3363_v56 = vld [vmem:[#allocation5 + $0x274] ss:$24 sps:$4 sm:$0xff]   ;;  %v3367_v58 = vld [vmem:[#allocation5 + $0x270] ss:$24 sps:$4 sm:$0xff]  }
  0x6e   :  { %1918 = vmatpush1.bf16.msra.mxu0 %v3314_v19  ;;  %1878 = vmatprep.subr.bf16.mxu1 %v3315_v20  ;;  %v3365_v57 = vld [vmem:[#allocation5 + $0x574] ss:$24 sps:$4 sm:$0xff]   ;;  %v3368_v59 = vld [vmem:[#allocation5 + $0x570] ss:$24 sps:$4 sm:$0xff]   ;;  %v3369_v60 = vld [vmem:[#allocation5 + $0x2a4] ss:$24 sps:$4 sm:$0xff]  }
  0x6f   :  { %1919 = vmatprep.subr.bf16.mxu0 %v3317_v21  ;;  %1900 = vmatprep.mubr.bf16.mxu1 %v4035_v47  ;;  %v3371_v61 = vld [vmem:[#allocation5 + $0x5a4] ss:$24 sps:$4 sm:$0xff]   ;;  %v3373_v62 = vld [vmem:[#allocation5 + $0x2a0] ss:$24 sps:$4 sm:$0xff]   ;;  %v3375_v0 = vld [vmem:[#allocation5 + $0x2d4] ss:$24 sps:$4 sm:$0xff]  }
  0x70   :  { %1941 = vmatprep.mubr.bf16.mxu0 %v4037_v51  ;;  %v3374_v63 = vld [vmem:[#allocation5 + $0x5a0] ss:$24 sps:$4 sm:$0xff]   ;;  %v3377_v1 = vld [vmem:[#allocation5 + $0x5d4] ss:$24 sps:$4 sm:$0xff]   ;;  %v3379_v2 = vld [vmem:[#allocation5 + $0x2d0] ss:$24 sps:$4 sm:$0xff]  }
  0x71   :  { %1879 = vmatpush1.bf16.msra.mxu1 %v3319_v22  ;;  %v3380_v3 = vld [vmem:[#allocation5 + $0x5d0] ss:$24 sps:$4 sm:$0xff]   ;;  %v3385_v4 = vld [vmem:[#allocation5 + $0x604] ss:$24 sps:$4 sm:$0xff]   ;;  %v3383_v8 = vld [vmem:[#allocation5 + $0x600] ss:$24 sps:$4 sm:$0xff]  }
  0x72   :  { %1920 = vmatpush1.bf16.msra.mxu0 %v3320_v23  ;;  %1880 = vmatprep.subr.bf16.mxu1 %v3321_v24  ;;  %v3388_v5 = vld [vmem:[#allocation5 + $0xc] ss:$24 sps:$4 sm:$0xff]   ;;  %v3386_v9 = vld [vmem:[#allocation5 + $0x8] ss:$24 sps:$4 sm:$0xff]   ;;  %v3396_v11 = vld [vmem:[#allocation5 + $0x3c] ss:$24 sps:$4 sm:$0xff]  }
  0x73   :  { %1921 = vmatprep.subr.bf16.mxu0 %v3323_v25  ;;  %v3393_v10 = vld [vmem:[#allocation5 + $0x634] ss:$24 sps:$4 sm:$0xff]   ;;  %v3391_v12 = vld [vmem:[#allocation5 + $0x630] ss:$24 sps:$4 sm:$0xff]   ;;  %v3399_v14 = vld [vmem:[#allocation5 + $0x664] ss:$24 sps:$4 sm:$0xff]  }
  0x74   :  { %v3394_v13 = vld [vmem:[#allocation5 + $0x38] ss:$24 sps:$4 sm:$0xff]   ;;  %v3402_v15 = vld [vmem:[#allocation5 + $0x6c] ss:$24 sps:$4 sm:$0xff]   ;;  %v3400_v17 = vld [vmem:[#allocation5 + $0x68] ss:$24 sps:$4 sm:$0xff]  }
  0x75   :  { %1881 = vmatpush1.bf16.msra.mxu1 %v3325_v26  ;;  %v3397_v16 = vld [vmem:[#allocation5 + $0x660] ss:$24 sps:$4 sm:$0xff]   ;;  %v3405_v18 = vld [vmem:[#allocation5 + $0x694] ss:$24 sps:$4 sm:$0xff]   ;;  %v3403_v20 = vld [vmem:[#allocation5 + $0x690] ss:$24 sps:$4 sm:$0xff]  }
  0x76   :  { %1922 = vmatpush1.bf16.msra.mxu0 %v3326_v27  ;;  %1882 = vmatprep.subr.bf16.mxu1 %v3327_v28  ;;  %v3408_v19 = vld [vmem:[#allocation5 + $0x9c] ss:$24 sps:$4 sm:$0xff]   ;;  %v3406_v21 = vld [vmem:[#allocation5 + $0x98] ss:$24 sps:$4 sm:$0xff]   ;;  %v3414_v23 = vld [vmem:[#allocation5 + $0xcc] ss:$24 sps:$4 sm:$0xff]  }
  0x77   :  { %1923 = vmatprep.subr.bf16.mxu0 %v3329_v29  ;;  %v3411_v22 = vld [vmem:[#allocation5 + $0x6c4] ss:$24 sps:$4 sm:$0xff]   ;;  %v3409_v24 = vld [vmem:[#allocation5 + $0x6c0] ss:$24 sps:$4 sm:$0xff]   ;;  %v3417_v26 = vld [vmem:[#allocation5 + $0x6f4] ss:$24 sps:$4 sm:$0xff]  }
  0x78   :  { %v3412_v25 = vld [vmem:[#allocation5 + $0xc8] ss:$24 sps:$4 sm:$0xff]   ;;  %v3420_v27 = vld [vmem:[#allocation5 + $0xfc] ss:$24 sps:$4 sm:$0xff]   ;;  %v3418_v29 = vld [vmem:[#allocation5 + $0xf8] ss:$24 sps:$4 sm:$0xff]  }
  0x79   :  { %1883 = vmatpush1.bf16.msra.mxu1 %v3331_v30  ;;  %v3415_v28 = vld [vmem:[#allocation5 + $0x6f0] ss:$24 sps:$4 sm:$0xff]   ;;  %v3423_v30 = vld [vmem:[#allocation5 + $0x724] ss:$24 sps:$4 sm:$0xff]   ;;  %s2827_s28 = sshll.u32 %s3944_s4, 4  ;;  %s2828_s28 = int_to_ptr.vmem [resolvable:$true] %s2827_s28 }
  0x7a   :  { %1924 = vmatpush1.bf16.msra.mxu0 %v3332_v31  ;;  %1884 = vmatprep.subr.bf16.mxu1 %v3333_v32  ;;  %v3426_v31 = vld [vmem:[#allocation5 + $0x12c] ss:$24 sps:$4 sm:$0xff]   ;;  %v4048_v32 = vld [vmem:[#allocation2 + $0x10] sm:$0xff]  ;;  %v3439_v46 = vld [vmem:[#allocation5 + $0x7b0] ss:$24 sps:$4 sm:$0xff]   ;;  %s3905_s29 = scalar_lea.vmem %s2828_s28, 128  ;;  %p3910_p13 = scmp.lt.s32.totalorder %s2828_s28, %s2828_s28 }
  0x7b   :  { %1925 = vmatprep.subr.bf16.mxu0 %v3335_v33  ;;  %v3421_v33 = vld [vmem:[#allocation5 + $0x720] ss:$24 sps:$4 sm:$0xff]   ;;  %p3906_p12 = scmp.ne.s32.totalorder %s2828_s28, %s3905_s29  ;;  %p3911_p0 = scmp.lt.s32.totalorder %s3905_s29, %s3905_s29 }
  0x7c   :  { %v3442_v48 = vld [vmem:[#allocation5 + $0x1b8] ss:$24 sps:$4 sm:$0xff]  }
  0x7d   :  { %1885 = vmatpush1.bf16.msra.mxu1 %v3337_v34  ;;  %v4052_v34 = vcombine.high %v4048_v32, %v4048_v32  ;;  %p3912_p1 = por %p3911_p0, %p3910_p13 }
  0x7e   :  { %1926 = vmatpush1.bf16.msra.mxu0 %v3338_v35  ;;  %1886 = vmatprep.subr.bf16.mxu1 %v3339_v36  ;;  %v3424_v35 = vld [vmem:[#allocation5 + $0x128] ss:$24 sps:$4 sm:$0xff]   ;;  %v3429_v36 = vld [vmem:[#allocation5 + $0x754] ss:$24 sps:$4 sm:$0xff]  }
  0x7f   :  { %1927 = vmatprep.subr.bf16.mxu0 %v3341_v37  ;;  %v3432_v37 = vld [vmem:[#allocation5 + $0x15c] ss:$24 sps:$4 sm:$0xff]   ;;  %p3913_p2 = pnand %p3912_p1, %p3906_p12 }
  0x81   :  { %1887 = vmatpush1.bf16.msra.mxu1 %v3343_v38  ;;  %v3427_v38 = vld [vmem:[#allocation5 + $0x750] ss:$24 sps:$4 sm:$0xff]  }
  0x82   :  { %1928 = vmatpush1.bf16.msra.mxu0 %v3344_v39  ;;  %1888 = vmatprep.subr.bf16.mxu1 %v3345_v40  ;;  %v3430_v39 = vld [vmem:[#allocation5 + $0x158] ss:$24 sps:$4 sm:$0xff]   ;;  %v3435_v40 = vld [vmem:[#allocation5 + $0x784] ss:$24 sps:$4 sm:$0xff]  }
  0x83   :  { %1929 = vmatprep.subr.bf16.mxu0 %v3347_v41  ;;  %v3438_v41 = vld [vmem:[#allocation5 + $0x18c] ss:$24 sps:$4 sm:$0xff]  }
  0x85   :  { %1889 = vmatpush1.bf16.msra.mxu1 %v3349_v42  ;;  %v3433_v42 = vld [vmem:[#allocation5 + $0x780] ss:$24 sps:$4 sm:$0xff]  }
  0x86   :  { %1930 = vmatpush1.bf16.msra.mxu0 %v3350_v43  ;;  %1890 = vmatprep.subr.bf16.mxu1 %v3351_v44  ;;  %v3436_v43 = vld [vmem:[#allocation5 + $0x188] ss:$24 sps:$4 sm:$0xff]   ;;  %v3441_v44 = vld [vmem:[#allocation5 + $0x7b4] ss:$24 sps:$4 sm:$0xff]  }
  0x87   :  { %1931 = vmatprep.subr.bf16.mxu0 %v3353_v45  ;;  %v3444_v45 = vld [vmem:[#allocation5 + $0x1bc] ss:$24 sps:$4 sm:$0xff]  }
  0x89   :  { %1891 = vmatpush1.bf16.msra.mxu1 %v3355_v49  ;;  %v3447_v49 = vld [vmem:[#allocation5 + $0x7e4] ss:$24 sps:$4 sm:$0xff]  }
  0x8a   :  { %1932 = vmatpush1.bf16.msra.mxu0 %v3356_v50  ;;  %1892 = vmatprep.subr.bf16.mxu1 %v3357_v52  ;;  %v3450_v50 = vld [vmem:[#allocation5 + $0x1ec] ss:$24 sps:$4 sm:$0xff]   ;;  %v3445_v52 = vld [vmem:[#allocation5 + $0x7e0] ss:$24 sps:$4 sm:$0xff]  }
  0x8b   :  { %1933 = vmatprep.subr.bf16.mxu0 %v3359_v53  ;;  %v3448_v53 = vld [vmem:[#allocation5 + $0x1e8] ss:$24 sps:$4 sm:$0xff]  }
  0x8d   :  { %1893 = vmatpush1.bf16.msra.mxu1 %v3361_v54  ;;  %v3453_v54 = vld [vmem:[#allocation5 + $0x814] ss:$24 sps:$4 sm:$0xff]  }
  0x8e   :  { %1934 = vmatpush1.bf16.msra.mxu0 %v3362_v55  ;;  %1894 = vmatprep.subr.bf16.mxu1 %v3363_v56  ;;  %v3456_v55 = vld [vmem:[#allocation5 + $0x21c] ss:$24 sps:$4 sm:$0xff]   ;;  %v3451_v56 = vld [vmem:[#allocation5 + $0x810] ss:$24 sps:$4 sm:$0xff]  }
  0x8f   :  { %1935 = vmatprep.subr.bf16.mxu0 %v3365_v57  ;;  %v3454_v57 = vld [vmem:[#allocation5 + $0x218] ss:$24 sps:$4 sm:$0xff]  }
  0x91   :  { %1895 = vmatpush1.bf16.msra.mxu1 %v3367_v58  ;;  %v3459_v58 = vld [vmem:[#allocation5 + $0x844] ss:$24 sps:$4 sm:$0xff]  }
  0x92   :  { %1936 = vmatpush1.bf16.msra.mxu0 %v3368_v59  ;;  %1896 = vmatprep.subr.bf16.mxu1 %v3369_v60  ;;  %v3462_v59 = vld [vmem:[#allocation5 + $0x24c] ss:$24 sps:$4 sm:$0xff]   ;;  %v3457_v60 = vld [vmem:[#allocation5 + $0x840] ss:$24 sps:$4 sm:$0xff]  }
  0x93   :  { %1937 = vmatprep.subr.bf16.mxu0 %v3371_v61  ;;  %v3460_v61 = vld [vmem:[#allocation5 + $0x248] ss:$24 sps:$4 sm:$0xff]  }
  0x95   :  { %1897 = vmatpush1.bf16.msra.mxu1 %v3373_v62  ;;  %v3465_v62 = vld [vmem:[#allocation5 + $0x874] ss:$24 sps:$4 sm:$0xff]  }
  0x96   :  { %1938 = vmatpush1.bf16.msra.mxu0 %v3374_v63  ;;  %1898 = vmatprep.subr.bf16.mxu1 %v3375_v0  ;;  %v3468_v63 = vld [vmem:[#allocation5 + $0x27c] ss:$24 sps:$4 sm:$0xff]   ;;  %v3463_v0 = vld [vmem:[#allocation5 + $0x870] ss:$24 sps:$4 sm:$0xff]  }
  0x97   :  { %1939 = vmatprep.subr.bf16.mxu0 %v3377_v1  ;;  %v3466_v1 = vld [vmem:[#allocation5 + $0x278] ss:$24 sps:$4 sm:$0xff]  }
  0x99   :  { %1899 = vmatpush1.bf16.msra.mxu1 %v3379_v2  ;;  %v3471_v2 = vld [vmem:[#allocation5 + $0x8a4] ss:$24 sps:$4 sm:$0xff]  }
  0x9a   :  { %1940 = vmatpush1.bf16.msra.mxu0 %v3380_v3  ;;  %1991 = vmatprep.subr.bf16.mxu1 %v3388_v5  ;;  %v3474_v3 = vld [vmem:[#allocation5 + $0x2ac] ss:$24 sps:$4 sm:$0xff]   ;;  %v3472_v5 = vld [vmem:[#allocation5 + $0x2a8] ss:$24 sps:$4 sm:$0xff]  }
  0x9b   :  { %1950 = vmatprep.subr.bf16.mxu0 %v3385_v4  ;;  %v3469_v4 = vld [vmem:[#allocation5 + $0x8a0] ss:$24 sps:$4 sm:$0xff]  }
  0x9c   :  { %1901 = vmatmul.mubr.bf16.vlgmr.msra.gmra.mrb[0].mxu1 %v4041_v6 }
  0x9d   :  { %1942 = vmatmul.mubr.bf16.vlgmr.msra.gmra.mrb[0].mxu0 %v4043_v7  ;;  %1992 = vmatpush1.bf16.msra.mxu1 %v3386_v9  ;;  %v3480_v9 = vld [vmem:[#allocation5 + $0x2dc] ss:$24 sps:$4 sm:$0xff]  }
  0x9e   :  { %1951 = vmatpush1.bf16.msra.mxu0 %v3383_v8  ;;  %1993 = vmatprep.subr.bf16.mxu1 %v3396_v11  ;;  %v3477_v8 = vld [vmem:[#allocation5 + $0x8d4] ss:$24 sps:$4 sm:$0xff]   ;;  %v3478_v11 = vld [vmem:[#allocation5 + $0x2d8] ss:$24 sps:$4 sm:$0xff]  }
  0x9f   :  { %1952 = vmatprep.subr.bf16.mxu0 %v3393_v10  ;;  %2023 = vmatprep.mubr.bf16.mxu1 %v4035_v47  ;;  %v3475_v10 = vld [vmem:[#allocation5 + $0x8d0] ss:$24 sps:$4 sm:$0xff]  }
  0xa0   :  { %1982 = vmatprep.mubr.bf16.mxu0 %v4052_v34 }
  0xa1   :  { %1994 = vmatpush1.bf16.msra.mxu1 %v3394_v13  ;;  %v3488_v13 = vld [vmem:[#allocation5 + $0x14] ss:$24 sps:$4 sm:$0xff]  }
  0xa2   :  { %1953 = vmatpush1.bf16.msra.mxu0 %v3391_v12  ;;  %1995 = vmatprep.subr.bf16.mxu1 %v3402_v15  ;;  %v3485_v12 = vld [vmem:[#allocation5 + $0x30c] ss:$24 sps:$4 sm:$0xff]   ;;  %v3483_v15 = vld [vmem:[#allocation5 + $0x308] ss:$24 sps:$4 sm:$0xff]  }
  0xa3   :  { %1954 = vmatprep.subr.bf16.mxu0 %v3399_v14  ;;  %v4057_v14 = vcombine.low %v4048_v32, %v4048_v32  ;;  %v3515_v32 = vld [vmem:[#allocation5 + $0x3fc] ss:$24 sps:$4 sm:$0xff]  }
  0xa5   :  { %1996 = vmatpush1.bf16.msra.mxu1 %v3400_v17  ;;  %v3491_v17 = vld [vmem:[#allocation5 + $0x33c] ss:$24 sps:$4 sm:$0xff]  }
  0xa6   :  { %1955 = vmatpush1.bf16.msra.mxu0 %v3397_v16  ;;  %1997 = vmatprep.subr.bf16.mxu1 %v3408_v19  ;;  %v3486_v16 = vld [vmem:[#allocation5 + $0x10] ss:$24 sps:$4 sm:$0xff]  }
  0xa7   :  { %1956 = vmatprep.subr.bf16.mxu0 %v3405_v18  ;;  %v3494_v18 = vld [vmem:[#allocation5 + $0x44] ss:$24 sps:$4 sm:$0xff]   ;;  %v3489_v19 = vld [vmem:[#allocation5 + $0x338] ss:$24 sps:$4 sm:$0xff]  }
  0xa9   :  { %1998 = vmatpush1.bf16.msra.mxu1 %v3406_v21  ;;  %v3497_v21 = vld [vmem:[#allocation5 + $0x36c] ss:$24 sps:$4 sm:$0xff]  }
  0xaa   :  { %1957 = vmatpush1.bf16.msra.mxu0 %v3403_v20  ;;  %1999 = vmatprep.subr.bf16.mxu1 %v3414_v23  ;;  %v3492_v20 = vld [vmem:[#allocation5 + $0x40] ss:$24 sps:$4 sm:$0xff]  }
  0xab   :  { %1958 = vmatprep.subr.bf16.mxu0 %v3411_v22  ;;  %v3500_v22 = vld [vmem:[#allocation5 + $0x74] ss:$24 sps:$4 sm:$0xff]   ;;  %v3495_v23 = vld [vmem:[#allocation5 + $0x368] ss:$24 sps:$4 sm:$0xff]  }
  0xad   :  { %2000 = vmatpush1.bf16.msra.mxu1 %v3412_v25  ;;  %v3503_v25 = vld [vmem:[#allocation5 + $0x39c] ss:$24 sps:$4 sm:$0xff]  }
  0xae   :  { %1959 = vmatpush1.bf16.msra.mxu0 %v3409_v24  ;;  %2001 = vmatprep.subr.bf16.mxu1 %v3420_v27  ;;  %v3498_v24 = vld [vmem:[#allocation5 + $0x70] ss:$24 sps:$4 sm:$0xff]  }
  0xaf   :  { %1960 = vmatprep.subr.bf16.mxu0 %v3417_v26  ;;  %v3506_v26 = vld [vmem:[#allocation5 + $0xa4] ss:$24 sps:$4 sm:$0xff]   ;;  %v3501_v27 = vld [vmem:[#allocation5 + $0x398] ss:$24 sps:$4 sm:$0xff]  }
  0xb1   :  { %2002 = vmatpush1.bf16.msra.mxu1 %v3418_v29  ;;  %v3509_v29 = vld [vmem:[#allocation5 + $0x3cc] ss:$24 sps:$4 sm:$0xff]  }
  0xb2   :  { %1961 = vmatpush1.bf16.msra.mxu0 %v3415_v28  ;;  %2003 = vmatprep.subr.bf16.mxu1 %v3426_v31  ;;  %v3504_v28 = vld [vmem:[#allocation5 + $0xa0] ss:$24 sps:$4 sm:$0xff]  }
  0xb3   :  { %1962 = vmatprep.subr.bf16.mxu0 %v3423_v30  ;;  %v3512_v30 = vld [vmem:[#allocation5 + $0xd4] ss:$24 sps:$4 sm:$0xff]   ;;  %v3507_v31 = vld [vmem:[#allocation5 + $0x3c8] ss:$24 sps:$4 sm:$0xff]  }
  0xb5   :  { %2004 = vmatpush1.bf16.msra.mxu1 %v3424_v35  ;;  %v3513_v35 = vld [vmem:[#allocation5 + $0x3f8] ss:$24 sps:$4 sm:$0xff]  }
  0xb6   :  { %1963 = vmatpush1.bf16.msra.mxu0 %v3421_v33  ;;  %2005 = vmatprep.subr.bf16.mxu1 %v3432_v37  ;;  %v3518_v33 = vld [vmem:[#allocation5 + $0x104] ss:$24 sps:$4 sm:$0xff]  }
  0xb7   :  { %1964 = vmatprep.subr.bf16.mxu0 %v3429_v36  ;;  %v3516_v36 = vld [vmem:[#allocation5 + $0x100] ss:$24 sps:$4 sm:$0xff]   ;;  %v3521_v37 = vld [vmem:[#allocation5 + $0x42c] ss:$24 sps:$4 sm:$0xff]  }
  0xb9   :  { %2006 = vmatpush1.bf16.msra.mxu1 %v3430_v39  ;;  %v3519_v39 = vld [vmem:[#allocation5 + $0x428] ss:$24 sps:$4 sm:$0xff]  }
  0xba   :  { %1965 = vmatpush1.bf16.msra.mxu0 %v3427_v38  ;;  %2007 = vmatprep.subr.bf16.mxu1 %v3438_v41  ;;  %v3524_v38 = vld [vmem:[#allocation5 + $0x134] ss:$24 sps:$4 sm:$0xff]  }
  0xbb   :  { %1966 = vmatprep.subr.bf16.mxu0 %v3435_v40  ;;  %v3522_v40 = vld [vmem:[#allocation5 + $0x130] ss:$24 sps:$4 sm:$0xff]   ;;  %v3527_v41 = vld [vmem:[#allocation5 + $0x45c] ss:$24 sps:$4 sm:$0xff]  }
  0xbd   :  { %2008 = vmatpush1.bf16.msra.mxu1 %v3436_v43  ;;  %v3525_v43 = vld [vmem:[#allocation5 + $0x458] ss:$24 sps:$4 sm:$0xff]  }
  0xbe   :  { %1967 = vmatpush1.bf16.msra.mxu0 %v3433_v42  ;;  %2009 = vmatprep.subr.bf16.mxu1 %v3444_v45  ;;  %v3530_v42 = vld [vmem:[#allocation5 + $0x164] ss:$24 sps:$4 sm:$0xff]  }
  0xbf   :  { %1968 = vmatprep.subr.bf16.mxu0 %v3441_v44  ;;  %v3528_v44 = vld [vmem:[#allocation5 + $0x160] ss:$24 sps:$4 sm:$0xff]   ;;  %v3533_v45 = vld [vmem:[#allocation5 + $0x48c] ss:$24 sps:$4 sm:$0xff]  }
  0xc1   :  { %2010 = vmatpush1.bf16.msra.mxu1 %v3442_v48  ;;  %v3531_v48 = vld [vmem:[#allocation5 + $0x488] ss:$24 sps:$4 sm:$0xff]  }
  0xc2   :  { %1969 = vmatpush1.bf16.msra.mxu0 %v3439_v46  ;;  %2011 = vmatprep.subr.bf16.mxu1 %v3450_v50  ;;  %v3536_v46 = vld [vmem:[#allocation5 + $0x194] ss:$24 sps:$4 sm:$0xff]  }
  0xc3   :  { %1970 = vmatprep.subr.bf16.mxu0 %v3447_v49  ;;  %v3534_v49 = vld [vmem:[#allocation5 + $0x190] ss:$24 sps:$4 sm:$0xff]   ;;  %v3539_v50 = vld [vmem:[#allocation5 + $0x4bc] ss:$24 sps:$4 sm:$0xff]  }
  0xc5   :  { %2012 = vmatpush1.bf16.msra.mxu1 %v3448_v53  ;;  %v3537_v53 = vld [vmem:[#allocation5 + $0x4b8] ss:$24 sps:$4 sm:$0xff]  }
  0xc6   :  { %1971 = vmatpush1.bf16.msra.mxu0 %v3445_v52  ;;  %2013 = vmatprep.subr.bf16.mxu1 %v3456_v55  ;;  %v3542_v52 = vld [vmem:[#allocation5 + $0x1c4] ss:$24 sps:$4 sm:$0xff]  }
  0xc7   :  { %1972 = vmatprep.subr.bf16.mxu0 %v3453_v54  ;;  %v3540_v54 = vld [vmem:[#allocation5 + $0x1c0] ss:$24 sps:$4 sm:$0xff]   ;;  %v3545_v55 = vld [vmem:[#allocation5 + $0x4ec] ss:$24 sps:$4 sm:$0xff]  }
  0xc9   :  { %2014 = vmatpush1.bf16.msra.mxu1 %v3454_v57  ;;  %v3543_v57 = vld [vmem:[#allocation5 + $0x4e8] ss:$24 sps:$4 sm:$0xff]  }
  0xca   :  { %1973 = vmatpush1.bf16.msra.mxu0 %v3451_v56  ;;  %2015 = vmatprep.subr.bf16.mxu1 %v3462_v59  ;;  %v3548_v56 = vld [vmem:[#allocation5 + $0x1f4] ss:$24 sps:$4 sm:$0xff]  }
  0xcb   :  { %1974 = vmatprep.subr.bf16.mxu0 %v3459_v58  ;;  %v3546_v58 = vld [vmem:[#allocation5 + $0x1f0] ss:$24 sps:$4 sm:$0xff]   ;;  %v3551_v59 = vld [vmem:[#allocation5 + $0x51c] ss:$24 sps:$4 sm:$0xff]  }
  0xcd   :  { %2016 = vmatpush1.bf16.msra.mxu1 %v3460_v61  ;;  %v3549_v61 = vld [vmem:[#allocation5 + $0x518] ss:$24 sps:$4 sm:$0xff]  }
  0xce   :  { %1975 = vmatpush1.bf16.msra.mxu0 %v3457_v60  ;;  %2017 = vmatprep.subr.bf16.mxu1 %v3468_v63  ;;  %v3554_v60 = vld [vmem:[#allocation5 + $0x224] ss:$24 sps:$4 sm:$0xff]  }
  0xcf   :  { %1976 = vmatprep.subr.bf16.mxu0 %v3465_v62  ;;  %v3552_v62 = vld [vmem:[#allocation5 + $0x220] ss:$24 sps:$4 sm:$0xff]   ;;  %v3557_v63 = vld [vmem:[#allocation5 + $0x54c] ss:$24 sps:$4 sm:$0xff]  }
  0xd1   :  { %2018 = vmatpush1.bf16.msra.mxu1 %v3466_v1  ;;  %v3555_v1 = vld [vmem:[#allocation5 + $0x548] ss:$24 sps:$4 sm:$0xff]  }
  0xd2   :  { %1977 = vmatpush1.bf16.msra.mxu0 %v3463_v0  ;;  %2019 = vmatprep.subr.bf16.mxu1 %v3474_v3  ;;  %v3560_v0 = vld [vmem:[#allocation5 + $0x254] ss:$24 sps:$4 sm:$0xff]  }
  0xd3   :  { %1978 = vmatprep.subr.bf16.mxu0 %v3471_v2  ;;  %v3558_v2 = vld [vmem:[#allocation5 + $0x250] ss:$24 sps:$4 sm:$0xff]   ;;  %v3563_v3 = vld [vmem:[#allocation5 + $0x57c] ss:$24 sps:$4 sm:$0xff]  }
  0xd5   :  { %2020 = vmatpush1.bf16.msra.mxu1 %v3472_v5  ;;  %v3561_v5 = vld [vmem:[#allocation5 + $0x578] ss:$24 sps:$4 sm:$0xff]  }
  0xd6   :  { %1979 = vmatpush1.bf16.msra.mxu0 %v3469_v4  ;;  %2021 = vmatprep.subr.bf16.mxu1 %v3480_v9  ;;  %v3566_v4 = vld [vmem:[#allocation5 + $0x284] ss:$24 sps:$4 sm:$0xff]  }
  0xd7   :  { %1980 = vmatprep.subr.bf16.mxu0 %v3477_v8  ;;  %v3564_v8 = vld [vmem:[#allocation5 + $0x280] ss:$24 sps:$4 sm:$0xff]   ;;  %v3569_v9 = vld [vmem:[#allocation5 + $0x5ac] ss:$24 sps:$4 sm:$0xff]  }
  0xd9   :  { %2022 = vmatpush1.bf16.msra.mxu1 %v3478_v11  ;;  %v3567_v11 = vld [vmem:[#allocation5 + $0x5a8] ss:$24 sps:$4 sm:$0xff]  }
  0xda   :  { %1981 = vmatpush1.bf16.msra.mxu0 %v3475_v10  ;;  %2032 = vmatprep.subr.bf16.mxu1 %v3485_v12  ;;  %v3572_v10 = vld [vmem:[#allocation5 + $0x2b4] ss:$24 sps:$4 sm:$0xff]   ;;  %v3570_v12 = vld [vmem:[#allocation5 + $0x2b0] ss:$24 sps:$4 sm:$0xff]  }
  0xdb   :  { %2114 = vmatprep.subr.bf16.mxu0 %v3488_v13  ;;  %v3575_v13 = vld [vmem:[#allocation5 + $0x5dc] ss:$24 sps:$4 sm:$0xff]  }
  0xdc   :  { %2024 = vmatmul.mubr.bf16.vlgmr.msra.gmra.mrb[4].mxu1 %v4041_v6 }
  0xdd   :  { %1983 = vmatmul.mubr.bf16.vlgmr.msra.gmra.mrb[0].mxu0 %v4057_v14  ;;  %2033 = vmatpush1.bf16.msra.mxu1 %v3483_v15  ;;  %v3578_v15 = vld [vmem:[#allocation5 + $0x2e4] ss:$24 sps:$4 sm:$0xff]  }
  0xde   :  { %2115 = vmatpush1.bf16.msra.mxu0 %v3486_v16  ;;  %2034 = vmatprep.subr.bf16.mxu1 %v3491_v17  ;;  %v3573_v16 = vld [vmem:[#allocation5 + $0x5d8] ss:$24 sps:$4 sm:$0xff]  }
  0xdf   :  { %2116 = vmatprep.subr.bf16.mxu0 %v3494_v18  ;;  %2064 = vmatprep.mubr.bf16.mxu1 %v4037_v51  ;;  %v3576_v17 = vld [vmem:[#allocation5 + $0x2e0] ss:$24 sps:$4 sm:$0xff]   ;;  %v3581_v18 = vld [vmem:[#allocation5 + $0x60c] ss:$24 sps:$4 sm:$0xff]  }
  0xe0   :  { %2146 = vmatprep.mubr.bf16.mxu0 %v4035_v47  ;;  %v3510_v47 = vld [vmem:[#allocation5 + $0xd0] ss:$24 sps:$4 sm:$0xff]  }
  0xe1   :  { %2035 = vmatpush1.bf16.msra.mxu1 %v3489_v19  ;;  %v3584_v19 = vld [vmem:[#allocation5 + $0x314] ss:$24 sps:$4 sm:$0xff]  }
  0xe2   :  { %2117 = vmatpush1.bf16.msra.mxu0 %v3492_v20  ;;  %2036 = vmatprep.subr.bf16.mxu1 %v3497_v21  ;;  %v3579_v20 = vld [vmem:[#allocation5 + $0x608] ss:$24 sps:$4 sm:$0xff]  }
  0xe3   :  { %2118 = vmatprep.subr.bf16.mxu0 %v3500_v22  ;;  %v3582_v21 = vld [vmem:[#allocation5 + $0x310] ss:$24 sps:$4 sm:$0xff]   ;;  %v3587_v22 = vld [vmem:[#allocation5 + $0x63c] ss:$24 sps:$4 sm:$0xff]  }
  0xe5   :  { %2037 = vmatpush1.bf16.msra.mxu1 %v3495_v23  ;;  %v3590_v23 = vld [vmem:[#allocation5 + $0x344] ss:$24 sps:$4 sm:$0xff]  }
  0xe6   :  { %2119 = vmatpush1.bf16.msra.mxu0 %v3498_v24  ;;  %2038 = vmatprep.subr.bf16.mxu1 %v3503_v25  ;;  %v3585_v24 = vld [vmem:[#allocation5 + $0x638] ss:$24 sps:$4 sm:$0xff]  }
  0xe7   :  { %2120 = vmatprep.subr.bf16.mxu0 %v3506_v26  ;;  %v3588_v25 = vld [vmem:[#allocation5 + $0x340] ss:$24 sps:$4 sm:$0xff]   ;;  %v3593_v26 = vld [vmem:[#allocation5 + $0x66c] ss:$24 sps:$4 sm:$0xff]  }
  0xe9   :  { %2039 = vmatpush1.bf16.msra.mxu1 %v3501_v27  ;;  %v3596_v27 = vld [vmem:[#allocation5 + $0x374] ss:$24 sps:$4 sm:$0xff]  }
  0xea   :  { %2121 = vmatpush1.bf16.msra.mxu0 %v3504_v28  ;;  %2040 = vmatprep.subr.bf16.mxu1 %v3509_v29  ;;  %v3591_v28 = vld [vmem:[#allocation5 + $0x668] ss:$24 sps:$4 sm:$0xff]  }
  0xeb   :  { %2122 = vmatprep.subr.bf16.mxu0 %v3512_v30  ;;  %v3594_v29 = vld [vmem:[#allocation5 + $0x370] ss:$24 sps:$4 sm:$0xff]   ;;  %v3599_v30 = vld [vmem:[#allocation5 + $0x69c] ss:$24 sps:$4 sm:$0xff]  }
  0xed   :  { %2041 = vmatpush1.bf16.msra.mxu1 %v3507_v31  ;;  %v3602_v31 = vld [vmem:[#allocation5 + $0x3a4] ss:$24 sps:$4 sm:$0xff]  }
  0xee   :  { %2123 = vmatpush1.bf16.msra.mxu0 %v3510_v47  ;;  %2042 = vmatprep.subr.bf16.mxu1 %v3515_v32  ;;  %v3597_v47 = vld [vmem:[#allocation5 + $0x698] ss:$24 sps:$4 sm:$0xff]   ;;  %v3605_v32 = vld [vmem:[#allocation5 + $0x6cc] ss:$24 sps:$4 sm:$0xff]  }
  0xef   :  { %2124 = vmatprep.subr.bf16.mxu0 %v3518_v33  ;;  %v3608_v33 = vld [vmem:[#allocation5 + $0x3d4] ss:$24 sps:$4 sm:$0xff]  }
  0xf1   :  { %2043 = vmatpush1.bf16.msra.mxu1 %v3513_v35  ;;  %v3603_v35 = vld [vmem:[#allocation5 + $0x6c8] ss:$24 sps:$4 sm:$0xff]  }
  0xf2   :  { %2125 = vmatpush1.bf16.msra.mxu0 %v3516_v36  ;;  %2044 = vmatprep.subr.bf16.mxu1 %v3521_v37  ;;  %v3606_v36 = vld [vmem:[#allocation5 + $0x3d0] ss:$24 sps:$4 sm:$0xff]   ;;  %v3611_v37 = vld [vmem:[#allocation5 + $0x6fc] ss:$24 sps:$4 sm:$0xff]  }
  0xf3   :  { %2126 = vmatprep.subr.bf16.mxu0 %v3524_v38  ;;  %v3614_v38 = vld [vmem:[#allocation5 + $0x404] ss:$24 sps:$4 sm:$0xff]  }
  0xf5   :  { %2045 = vmatpush1.bf16.msra.mxu1 %v3519_v39  ;;  %v3612_v39 = vld [vmem:[#allocation5 + $0x400] ss:$24 sps:$4 sm:$0xff]  }
  0xf6   :  { %2127 = vmatpush1.bf16.msra.mxu0 %v3522_v40  ;;  %2046 = vmatprep.subr.bf16.mxu1 %v3527_v41  ;;  %v3617_v40 = vld [vmem:[#allocation5 + $0x72c] ss:$24 sps:$4 sm:$0xff]  }
  0xf7   :  { %2128 = vmatprep.subr.bf16.mxu0 %v3530_v42  ;;  %v3620_v41 = vld [vmem:[#allocation5 + $0x434] ss:$24 sps:$4 sm:$0xff]   ;;  %v3615_v42 = vld [vmem:[#allocation5 + $0x728] ss:$24 sps:$4 sm:$0xff]  }
  0xf9   :  { %2047 = vmatpush1.bf16.msra.mxu1 %v3525_v43  ;;  %v3618_v43 = vld [vmem:[#allocation5 + $0x430] ss:$24 sps:$4 sm:$0xff]  }
  0xfa   :  { %2129 = vmatpush1.bf16.msra.mxu0 %v3528_v44  ;;  %2048 = vmatprep.subr.bf16.mxu1 %v3533_v45  ;;  %v3623_v44 = vld [vmem:[#allocation5 + $0x75c] ss:$24 sps:$4 sm:$0xff]  }
  0xfb   :  { %2130 = vmatprep.subr.bf16.mxu0 %v3536_v46  ;;  %v3626_v45 = vld [vmem:[#allocation5 + $0x464] ss:$24 sps:$4 sm:$0xff]   ;;  %v3621_v46 = vld [vmem:[#allocation5 + $0x758] ss:$24 sps:$4 sm:$0xff]  }
  0xfd   :  { %2049 = vmatpush1.bf16.msra.mxu1 %v3531_v48  ;;  %v3624_v48 = vld [vmem:[#allocation5 + $0x460] ss:$24 sps:$4 sm:$0xff]  }
  0xfe   :  { %2131 = vmatpush1.bf16.msra.mxu0 %v3534_v49  ;;  %2050 = vmatprep.subr.bf16.mxu1 %v3539_v50  ;;  %v3629_v49 = vld [vmem:[#allocation5 + $0x78c] ss:$24 sps:$4 sm:$0xff]  }
  0xff   :  { %2132 = vmatprep.subr.bf16.mxu0 %v3542_v52  ;;  %v3632_v50 = vld [vmem:[#allocation5 + $0x494] ss:$24 sps:$4 sm:$0xff]   ;;  %v3627_v52 = vld [vmem:[#allocation5 + $0x788] ss:$24 sps:$4 sm:$0xff]  }
 0x101   :  { %2051 = vmatpush1.bf16.msra.mxu1 %v3537_v53  ;;  %v3630_v53 = vld [vmem:[#allocation5 + $0x490] ss:$24 sps:$4 sm:$0xff]  }
 0x102   :  { %2133 = vmatpush1.bf16.msra.mxu0 %v3540_v54  ;;  %2052 = vmatprep.subr.bf16.mxu1 %v3545_v55  ;;  %v3635_v54 = vld [vmem:[#allocation5 + $0x7bc] ss:$24 sps:$4 sm:$0xff]  }
 0x103   :  { %2134 = vmatprep.subr.bf16.mxu0 %v3548_v56  ;;  %v3638_v55 = vld [vmem:[#allocation5 + $0x4c4] ss:$24 sps:$4 sm:$0xff]   ;;  %v3633_v56 = vld [vmem:[#allocation5 + $0x7b8] ss:$24 sps:$4 sm:$0xff]  }
 0x105   :  { %2053 = vmatpush1.bf16.msra.mxu1 %v3543_v57  ;;  %v3636_v57 = vld [vmem:[#allocation5 + $0x4c0] ss:$24 sps:$4 sm:$0xff]  }
 0x106   :  { %2135 = vmatpush1.bf16.msra.mxu0 %v3546_v58  ;;  %2054 = vmatprep.subr.bf16.mxu1 %v3551_v59  ;;  %v3641_v58 = vld [vmem:[#allocation5 + $0x7ec] ss:$24 sps:$4 sm:$0xff]  }
 0x107   :  { %2136 = vmatprep.subr.bf16.mxu0 %v3554_v60  ;;  %v3644_v59 = vld [vmem:[#allocation5 + $0x4f4] ss:$24 sps:$4 sm:$0xff]   ;;  %v3639_v60 = vld [vmem:[#allocation5 + $0x7e8] ss:$24 sps:$4 sm:$0xff]  }
 0x109   :  { %2055 = vmatpush1.bf16.msra.mxu1 %v3549_v61  ;;  %v3642_v61 = vld [vmem:[#allocation5 + $0x4f0] ss:$24 sps:$4 sm:$0xff]  }
 0x10a   :  { %2137 = vmatpush1.bf16.msra.mxu0 %v3552_v62  ;;  %2056 = vmatprep.subr.bf16.mxu1 %v3557_v63  ;;  %v3647_v62 = vld [vmem:[#allocation5 + $0x81c] ss:$24 sps:$4 sm:$0xff]  }
 0x10b   :  { %2138 = vmatprep.subr.bf16.mxu0 %v3560_v0  ;;  %v3650_v63 = vld [vmem:[#allocation5 + $0x524] ss:$24 sps:$4 sm:$0xff]   ;;  %v3645_v0 = vld [vmem:[#allocation5 + $0x818] ss:$24 sps:$4 sm:$0xff]  }
 0x10d   :  { %2057 = vmatpush1.bf16.msra.mxu1 %v3555_v1  ;;  %v3648_v1 = vld [vmem:[#allocation5 + $0x520] ss:$24 sps:$4 sm:$0xff]  }
 0x10e   :  { %2139 = vmatpush1.bf16.msra.mxu0 %v3558_v2  ;;  %2058 = vmatprep.subr.bf16.mxu1 %v3563_v3  ;;  %v3653_v2 = vld [vmem:[#allocation5 + $0x84c] ss:$24 sps:$4 sm:$0xff]  }
 0x10f   :  { %2140 = vmatprep.subr.bf16.mxu0 %v3566_v4  ;;  %v3656_v3 = vld [vmem:[#allocation5 + $0x554] ss:$24 sps:$4 sm:$0xff]   ;;  %v3651_v4 = vld [vmem:[#allocation5 + $0x848] ss:$24 sps:$4 sm:$0xff]  }
 0x111   :  { %2059 = vmatpush1.bf16.msra.mxu1 %v3561_v5  ;;  %v3654_v5 = vld [vmem:[#allocation5 + $0x550] ss:$24 sps:$4 sm:$0xff]  }
 0x112   :  { %2141 = vmatpush1.bf16.msra.mxu0 %v3564_v8  ;;  %2060 = vmatprep.subr.bf16.mxu1 %v3569_v9  ;;  %v3659_v8 = vld [vmem:[#allocation5 + $0x87c] ss:$24 sps:$4 sm:$0xff]  }
 0x113   :  { %2142 = vmatprep.subr.bf16.mxu0 %v3572_v10  ;;  %v3662_v9 = vld [vmem:[#allocation5 + $0x584] ss:$24 sps:$4 sm:$0xff]   ;;  %v3657_v10 = vld [vmem:[#allocation5 + $0x878] ss:$24 sps:$4 sm:$0xff]  }
 0x115   :  { %2061 = vmatpush1.bf16.msra.mxu1 %v3567_v11  ;;  %v3660_v11 = vld [vmem:[#allocation5 + $0x580] ss:$24 sps:$4 sm:$0xff]  }
 0x116   :  { %2143 = vmatpush1.bf16.msra.mxu0 %v3570_v12  ;;  %2062 = vmatprep.subr.bf16.mxu1 %v3575_v13  ;;  %v3665_v12 = vld [vmem:[#allocation5 + $0x8ac] ss:$24 sps:$4 sm:$0xff]  }
 0x117   :  { %2144 = vmatprep.subr.bf16.mxu0 %v3578_v15  ;;  %v3668_v13 = vld [vmem:[#allocation5 + $0x5b4] ss:$24 sps:$4 sm:$0xff]   ;;  %v3663_v15 = vld [vmem:[#allocation5 + $0x8a8] ss:$24 sps:$4 sm:$0xff]  }
 0x119   :  { %2063 = vmatpush1.bf16.msra.mxu1 %v3573_v16  ;;  %v3666_v16 = vld [vmem:[#allocation5 + $0x5b0] ss:$24 sps:$4 sm:$0xff]  }
 0x11a   :  { %2145 = vmatpush1.bf16.msra.mxu0 %v3576_v17  ;;  %2073 = vmatprep.subr.bf16.mxu1 %v3581_v18  ;;  %v3671_v17 = vld [vmem:[#allocation5 + $0x8dc] ss:$24 sps:$4 sm:$0xff]  }
 0x11b   :  { %2155 = vmatprep.subr.bf16.mxu0 %v3584_v19  ;;  %v3674_v18 = vld [vmem:[#allocation5 + $0x5e4] ss:$24 sps:$4 sm:$0xff]   ;;  %v3669_v19 = vld [vmem:[#allocation5 + $0x8d8] ss:$24 sps:$4 sm:$0xff]  }
 0x11c   :  { %2065 = vmatmul.mubr.bf16.vlgmr.msra.gmra.mrb[4].mxu1 %v4043_v7 }
 0x11d   :  { %2147 = vmatmul.mubr.bf16.vlgmr.msra.gmra.mrb[4].mxu0 %v4041_v6  ;;  %2074 = vmatpush1.bf16.msra.mxu1 %v3579_v20  ;;  %v3600_v6 = vld [vmem:[#allocation5 + $0x3a0] ss:$24 sps:$4 sm:$0xff]  }
 0x11e   :  { %2156 = vmatpush1.bf16.msra.mxu0 %v3582_v21  ;;  %2075 = vmatprep.subr.bf16.mxu1 %v3587_v22  ;;  %v3672_v20 = vld [vmem:[#allocation5 + $0x5e0] ss:$24 sps:$4 sm:$0xff]   ;;  %v3677_v21 = vld [vmem:[#allocation5 + $0x614] ss:$24 sps:$4 sm:$0xff]  }
 0x11f   :  { %2157 = vmatprep.subr.bf16.mxu0 %v3590_v23  ;;  %2105 = vmatprep.mubr.bf16.mxu1 %v4052_v34  ;;  %v3723_v22 = vld [vmem:[#allocation8 + $0x40] sm:$0xff]  }
 0x120   :  { %2187 = vmatprep.mubr.bf16.mxu0 %v4037_v51  ;;  %v3609_v51 = vld [vmem:[#allocation5 + $0x6f8] ss:$24 sps:$4 sm:$0xff]  }
 0x121   :  { %2076 = vmatpush1.bf16.msra.mxu1 %v3585_v24  ;;  %v3675_v23 = vld [vmem:[#allocation5 + $0x610] ss:$24 sps:$4 sm:$0xff]   ;;  %v3680_v24 = vld [vmem:[#allocation5 + $0x644] ss:$24 sps:$4 sm:$0xff]  }
 0x122   :  { %2158 = vmatpush1.bf16.msra.mxu0 %v3588_v25  ;;  %2077 = vmatprep.subr.bf16.mxu1 %v3593_v26  ;;  %v3724_v25 = vld [vmem:[#allocation8] sm:$0xff]   ;;  %v3725_v26 = vld [vmem:[#allocation8 + $0x48] sm:$0xff]  }
 0x123   :  { %2159 = vmatprep.subr.bf16.mxu0 %v3596_v27  ;;  %v3678_v27 = vld [vmem:[#allocation5 + $0x640] ss:$24 sps:$4 sm:$0xff]  }
 0x125   :  { %2078 = vmatpush1.bf16.msra.mxu1 %v3591_v28  ;;  %v3683_v28 = vld [vmem:[#allocation5 + $0x674] ss:$24 sps:$4 sm:$0xff]  }
 0x126   :  { %2160 = vmatpush1.bf16.msra.mxu0 %v3594_v29  ;;  %2079 = vmatprep.subr.bf16.mxu1 %v3599_v30  ;;  %v3726_v29 = vld [vmem:[#allocation8 + $0x8] sm:$0xff]   ;;  %v3727_v30 = vld [vmem:[#allocation8 + $0x50] sm:$0xff]  }
 0x127   :  { %2161 = vmatprep.subr.bf16.mxu0 %v3602_v31  ;;  %v3681_v31 = vld [vmem:[#allocation5 + $0x670] ss:$24 sps:$4 sm:$0xff]  }
 0x129   :  { %2080 = vmatpush1.bf16.msra.mxu1 %v3597_v47  ;;  %v3686_v47 = vld [vmem:[#allocation5 + $0x6a4] ss:$24 sps:$4 sm:$0xff]  }
 0x12a   :  { %2162 = vmatpush1.bf16.msra.mxu0 %v3600_v6  ;;  %2081 = vmatprep.subr.bf16.mxu1 %v3605_v32  ;;  %v3728_v6 = vld [vmem:[#allocation8 + $0x10] sm:$0xff]   ;;  %v3729_v32 = vld [vmem:[#allocation8 + $0x58] sm:$0xff]  }
 0x12b   :  { %2163 = vmatprep.subr.bf16.mxu0 %v3608_v33  ;;  %v3689_v33 = vld [vmem:[#allocation5 + $0x6d4] ss:$24 sps:$4 sm:$0xff]  }
 0x12d   :  { %2082 = vmatpush1.bf16.msra.mxu1 %v3603_v35  ;;  %v3731_v35 = vld [vmem:[#allocation8 + $0x60] sm:$0xff]  }
 0x12e   :  { %2164 = vmatpush1.bf16.msra.mxu0 %v3606_v36  ;;  %2083 = vmatprep.subr.bf16.mxu1 %v3611_v37  ;;  %v3687_v36 = vld [vmem:[#allocation5 + $0x6d0] ss:$24 sps:$4 sm:$0xff]   ;;  %v3692_v37 = vld [vmem:[#allocation5 + $0x704] ss:$24 sps:$4 sm:$0xff]  }
 0x12f   :  { %2165 = vmatprep.subr.bf16.mxu0 %v3614_v38  ;;  %v3732_v38 = vld [vmem:[#allocation8 + $0x20] sm:$0xff]  }
 0x131   :  { %2084 = vmatpush1.bf16.msra.mxu1 %v3609_v51  ;;  %v3733_v51 = vld [vmem:[#allocation8 + $0x68] sm:$0xff]  }
 0x132   :  { %2166 = vmatpush1.bf16.msra.mxu0 %v3612_v39  ;;  %2085 = vmatprep.subr.bf16.mxu1 %v3617_v40  ;;  %v3690_v39 = vld [vmem:[#allocation5 + $0x700] ss:$24 sps:$4 sm:$0xff]   ;;  %v3695_v40 = vld [vmem:[#allocation5 + $0x734] ss:$24 sps:$4 sm:$0xff]  }
 0x133   :  { %2167 = vmatprep.subr.bf16.mxu0 %v3620_v41  ;;  %v3734_v41 = vld [vmem:[#allocation8 + $0x28] sm:$0xff]  }
 0x135   :  { %2086 = vmatpush1.bf16.msra.mxu1 %v3615_v42 }
 0x136   :  { %2168 = vmatpush1.bf16.msra.mxu0 %v3618_v43  ;;  %2087 = vmatprep.subr.bf16.mxu1 %v3623_v44  ;;  %v3735_v43 = vld [vmem:[#allocation8 + $0x70] sm:$0xff]  }
 0x137   :  { %2169 = vmatprep.subr.bf16.mxu0 %v3626_v45  ;;  %v3693_v45 = vld [vmem:[#allocation5 + $0x730] ss:$24 sps:$4 sm:$0xff]  }
 0x139   :  { %2088 = vmatpush1.bf16.msra.mxu1 %v3621_v46 }
 0x13a   :  { %2170 = vmatpush1.bf16.msra.mxu0 %v3624_v48  ;;  %2089 = vmatprep.subr.bf16.mxu1 %v3629_v49  ;;  %v3698_v48 = vld [vmem:[#allocation5 + $0x764] ss:$24 sps:$4 sm:$0xff]  }
 0x13b   :  { %2171 = vmatprep.subr.bf16.mxu0 %v3632_v50  ;;  %v3736_v50 = vld [vmem:[#allocation8 + $0x30] sm:$0xff]  }
 0x13d   :  { %2090 = vmatpush1.bf16.msra.mxu1 %v3627_v52  ;;  %v3737_v52 = vld [vmem:[#allocation8 + $0x78] sm:$0xff]  }
 0x13e   :  { %2172 = vmatpush1.bf16.msra.mxu0 %v3630_v53  ;;  %2091 = vmatprep.subr.bf16.mxu1 %v3635_v54  ;;  %v3696_v53 = vld [vmem:[#allocation5 + $0x760] ss:$24 sps:$4 sm:$0xff]   ;;  %v3701_v54 = vld [vmem:[#allocation5 + $0x794] ss:$24 sps:$4 sm:$0xff]  }
 0x13f   :  { %2173 = vmatprep.subr.bf16.mxu0 %v3638_v55  ;;  %v3738_v55 = vld [vmem:[#allocation8 + $0x38] sm:$0xff]  }
 0x141   :  { %2092 = vmatpush1.bf16.msra.mxu1 %v3633_v56  ;;  %v3699_v56 = vld [vmem:[#allocation5 + $0x790] ss:$24 sps:$4 sm:$0xff]  }
 0x142   :  { %2174 = vmatpush1.bf16.msra.mxu0 %v3636_v57  ;;  %2093 = vmatprep.subr.bf16.mxu1 %v3641_v58  ;;  %v3704_v57 = vld [vmem:[#allocation5 + $0x7c4] ss:$24 sps:$4 sm:$0xff]   ;;  %v3702_v58 = vld [vmem:[#allocation5 + $0x7c0] ss:$24 sps:$4 sm:$0xff]  }
 0x143   :  { %2175 = vmatprep.subr.bf16.mxu0 %v3644_v59  ;;  %v3707_v59 = vld [vmem:[#allocation5 + $0x7f4] ss:$24 sps:$4 sm:$0xff]  }
 0x145   :  { %2094 = vmatpush1.bf16.msra.mxu1 %v3639_v60  ;;  %v3705_v60 = vld [vmem:[#allocation5 + $0x7f0] ss:$24 sps:$4 sm:$0xff]  }
 0x146   :  { %2176 = vmatpush1.bf16.msra.mxu0 %v3642_v61  ;;  %2095 = vmatprep.subr.bf16.mxu1 %v3647_v62  ;;  %v3710_v61 = vld [vmem:[#allocation5 + $0x824] ss:$24 sps:$4 sm:$0xff]   ;;  %v3708_v62 = vld [vmem:[#allocation5 + $0x820] ss:$24 sps:$4 sm:$0xff]  }
 0x147   :  { %2177 = vmatprep.subr.bf16.mxu0 %v3650_v63  ;;  %v3713_v63 = vld [vmem:[#allocation5 + $0x854] ss:$24 sps:$4 sm:$0xff]  }
 0x149   :  { %2096 = vmatpush1.bf16.msra.mxu1 %v3645_v0  ;;  %v3711_v0 = vld [vmem:[#allocation5 + $0x850] ss:$24 sps:$4 sm:$0xff]  }
 0x14a   :  { %2178 = vmatpush1.bf16.msra.mxu0 %v3648_v1  ;;  %2097 = vmatprep.subr.bf16.mxu1 %v3653_v2  ;;  %v3716_v1 = vld [vmem:[#allocation5 + $0x884] ss:$24 sps:$4 sm:$0xff]   ;;  %v3714_v2 = vld [vmem:[#allocation5 + $0x880] ss:$24 sps:$4 sm:$0xff]  }
 0x14b   :  { %2179 = vmatprep.subr.bf16.mxu0 %v3656_v3  ;;  %v3719_v3 = vld [vmem:[#allocation5 + $0x8b4] ss:$24 sps:$4 sm:$0xff]  }
 0x14d   :  { %2098 = vmatpush1.bf16.msra.mxu1 %v3651_v4  ;;  %v3717_v4 = vld [vmem:[#allocation5 + $0x8b0] ss:$24 sps:$4 sm:$0xff]  }
 0x14e   :  { %2180 = vmatpush1.bf16.msra.mxu0 %v3654_v5  ;;  %2099 = vmatprep.subr.bf16.mxu1 %v3659_v8  ;;  %v3722_v5 = vld [vmem:[#allocation5 + $0x8e4] ss:$24 sps:$4 sm:$0xff]   ;;  %v3720_v8 = vld [vmem:[#allocation5 + $0x8e0] ss:$24 sps:$4 sm:$0xff]  }
 0x14f   :  { %2181 = vmatprep.subr.bf16.mxu0 %v3662_v9  ;;  %v377_v9 = vlaneseq }
 0x151   :  { %2100 = vmatpush1.bf16.msra.mxu1 %v3657_v10  ;;  %v4071_v10 = vshrl.u32 %v377_v9, 7 }
 0x152   :  { %2182 = vmatpush1.bf16.msra.mxu0 %v3660_v11  ;;  %2101 = vmatprep.subr.bf16.mxu1 %v3665_v12  ;;  %v4074_v12 = vld [vmem:[#allocation7] sm:$0x3f] }
 0x153   :  { %2183 = vmatprep.subr.bf16.mxu0 %v3668_v13  ;;  %v379_v11 = vsub.s32 0, %v4071_v10  ;;  %v383_v13 = vsub.s32 1, %v4071_v10 }
 0x155   :  { %2102 = vmatpush1.bf16.msra.mxu1 %v3663_v15  ;;  %v380_v15 = vrot.slane %v4074_v12, %v379_v11 }
 0x156   :  { %2184 = vmatpush1.bf16.msra.mxu0 %v3666_v16  ;;  %2103 = vmatprep.subr.bf16.mxu1 %v3671_v17  ;;  %v384_v16 = vrot.slane %v4074_v12, %v383_v13 }
 0x157   :  { %2185 = vmatprep.subr.bf16.mxu0 %v3674_v18 }
 0x159   :  { %2104 = vmatpush1.bf16.msra.mxu1 %v3669_v19 }
 0x15a   :  { %2186 = vmatpush1.bf16.msra.mxu0 %v3672_v20  ;;  %3181 = vmatprep.subr.bf16.mxu1 %v3723_v22 }
 0x15b   :  { %2196 = vmatprep.subr.bf16.mxu0 %v3677_v21 }
 0x15c   :  { %2106 = vmatmul.mubr.bf16.vlgmr.msra.gmra.mrb[4].mxu1 %v4057_v14 }
 0x15d   :  { %2188 = vmatmul.mubr.bf16.vlgmr.msra.gmra.mrb[4].mxu0 %v4043_v7  ;;  %3182 = vmatpush3.bf16.msra.mxu1 %v3724_v25  ;;  %v3684_v7 = vld [vmem:[#allocation5 + $0x6a0] ss:$24 sps:$4 sm:$0xff]  }
 0x15e   :  { %2197 = vmatpush1.bf16.msra.mxu0 %v3675_v23  ;;  %2228 = vmatprep.mubr.bf16.mxu0 %v4052_v34  ;;  %v3730_v34 = vld [vmem:[#allocation8 + $0x18] sm:$0xff]  }
 0x15f   :  { %2198 = vmatprep.subr.bf16.mxu0 %v3680_v24  ;;  %3183 = vmatprep.subr.bf16.mxu1 %v3725_v26 }
 0x161   :  { %3184 = vmatpush3.bf16.msra.mxu1 %v3726_v29 }
 0x162   :  { %2199 = vmatpush1.bf16.msra.mxu0 %v3678_v27  ;;  %3185 = vmatprep.subr.bf16.mxu1 %v3727_v30 }
 0x163   :  { %2200 = vmatprep.subr.bf16.mxu0 %v3683_v28  ;;  %v3739_v28 = vld [vmem:[#allocation8 + $0xc0] sm:$0xff]  }
 0x165   :  { %3186 = vmatpush3.bf16.msra.mxu1 %v3728_v6 }
 0x166   :  { %2201 = vmatpush1.bf16.msra.mxu0 %v3681_v31  ;;  %3187 = vmatprep.subr.bf16.mxu1 %v3729_v32 }
 0x167   :  { %2202 = vmatprep.subr.bf16.mxu0 %v3686_v47 }
 0x169   :  { %3188 = vmatpush3.bf16.msra.mxu1 %v3730_v34 }
 0x16a   :  { %2203 = vmatpush1.bf16.msra.mxu0 %v3684_v7  ;;  %3189 = vmatprep.subr.bf16.mxu1 %v3731_v35 }
 0x16b   :  { %2204 = vmatprep.subr.bf16.mxu0 %v3689_v33 }
 0x16d   :  { %3190 = vmatpush3.bf16.msra.mxu1 %v3732_v38 }
 0x16e   :  { %2205 = vmatpush1.bf16.msra.mxu0 %v3687_v36  ;;  %3191 = vmatprep.subr.bf16.mxu1 %v3733_v51 }
 0x16f   :  { %2206 = vmatprep.subr.bf16.mxu0 %v3692_v37  ;;  %v1902_v42 = vpop.f32.mrb[0].mxu1 }
 0x170   :  { %v1904_v44 = vpop.f32.mrb[1].mxu1  ;;  %v1903_v17 = vadd.f32 %v1902_v42, %v380_v15  ;;  %v3740_v42 = vld [vmem:[#allocation8 + $0x80] sm:$0xff]  }
 0x171   :  { %v1906_v46 = vpop.f32.mrb[2].mxu1  ;;  %3192 = vmatpush3.bf16.msra.mxu1 %v3734_v41  ;;  %v1905_v18 = vadd.f32 %v1904_v44, %v384_v16  ;;  %v3741_v44 = vld [vmem:[#allocation8 + $0xc8] sm:$0xff]  }
 0x172   :  { %2207 = vmatpush1.bf16.msra.mxu0 %v3690_v39  ;;  %v1907_v49 = vpop.f32.mrb[3].mxu1  ;;  %3193 = vmatprep.subr.bf16.mxu1 %v3735_v43  ;;  %v3743_v46 = vld [vmem:[#allocation8 + $0xd0] sm:$0xff]  }
 0x173   :  { %2208 = vmatprep.subr.bf16.mxu0 %v3695_v40  ;;  %v3745_v49 = vld [vmem:[#allocation8 + $0xd8] sm:$0xff]  }
 0x175   :  { %3194 = vmatpush3.bf16.msra.mxu1 %v3736_v50  ;;  %v3746_v50 = vld [vmem:[#allocation8 + $0x98] sm:$0xff]  }
 0x176   :  { %2209 = vmatpush1.bf16.msra.mxu0 %v3693_v45  ;;  %3195 = vmatprep.subr.bf16.mxu1 %v3737_v52  ;;  %v3742_v45 = vld [vmem:[#allocation8 + $0x88] sm:$0xff]   ;;  %v3747_v52 = vld [vmem:[#allocation8 + $0xe0] sm:$0xff]  }
 0x177   :  { %2210 = vmatprep.subr.bf16.mxu0 %v3698_v48  ;;  %v3744_v48 = vld [vmem:[#allocation8 + $0x90] sm:$0xff]  }
 0x179   :  { %3196 = vmatpush3.bf16.msra.mxu1 %v3738_v55  ;;  %v3750_v55 = vld [vmem:[#allocation8 + $0xa8] sm:$0xff]  }
 0x17a   :  { %2211 = vmatpush1.bf16.msra.mxu0 %v3696_v53  ;;  %3203 = vmatprep.subr.bf16.mxu1 %v3739_v28  ;;  %v3748_v53 = vld [vmem:[#allocation8 + $0xa0] sm:$0xff]  }
 0x17b   :  { %2212 = vmatprep.subr.bf16.mxu0 %v3701_v54  ;;  %v3749_v54 = vld [vmem:[#allocation8 + $0xe8] sm:$0xff]  }
 0x17e   :  { %2213 = vmatpush1.bf16.msra.mxu0 %v3699_v56  ;;  %v3751_v56 = vld [vmem:[#allocation8 + $0xf0] sm:$0xff]  }
 0x17f   :  { %2214 = vmatprep.subr.bf16.mxu0 %v3704_v57  ;;  %v3752_v57 = vld [vmem:[#allocation8 + $0xb0] sm:$0xff]  }
 0x182   :  { %2215 = vmatpush1.bf16.msra.mxu0 %v3702_v58  ;;  %v3753_v58 = vld [vmem:[#allocation8 + $0xf8] sm:$0xff]  }
 0x183   :  { %2216 = vmatprep.subr.bf16.mxu0 %v3707_v59  ;;  %v3754_v59 = vld [vmem:[#allocation8 + $0xb8] sm:$0xff]  }
 0x186   :  { %2217 = vmatpush1.bf16.msra.mxu0 %v3705_v60  ;;  %v3755_v60 = vld [vmem:[#allocation8 + $0x140] sm:$0xff]  }
 0x187   :  { %2218 = vmatprep.subr.bf16.mxu0 %v3710_v61  ;;  %v387_v61 = vsub.s32 2, %v4071_v10 }
 0x18a   :  { %2219 = vmatpush1.bf16.msra.mxu0 %v3708_v62  ;;  %v391_v62 = vsub.s32 3, %v4071_v10 }
 0x18b   :  { %2220 = vmatprep.subr.bf16.mxu0 %v3713_v63  ;;  %v388_v63 = vrot.slane %v4074_v12, %v387_v61 }
 0x18e   :  { %2221 = vmatpush1.bf16.msra.mxu0 %v3711_v0  ;;  %v392_v0 = vrot.slane %v4074_v12, %v391_v62 }
 0x18f   :  { %2222 = vmatprep.subr.bf16.mxu0 %v3716_v1 }
 0x192   :  { %2223 = vmatpush1.bf16.msra.mxu0 %v3714_v2 }
 0x193   :  { %2224 = vmatprep.subr.bf16.mxu0 %v3719_v3 }
 0x196   :  { %2225 = vmatpush1.bf16.msra.mxu0 %v3717_v4 }
 0x197   :  { %2226 = vmatprep.subr.bf16.mxu0 %v3722_v5 }
 0x19a   :  { %2227 = vmatpush1.bf16.msra.mxu0 %v3720_v8 }
 0x19d   :  { %2229 = vmatmul.mubr.bf16.vlgmr.msra.gmra.mrb[4].mxu0 %v4057_v14 }
 0x1b0   :  { %v1984_v19 = vpop.f32.mrb[0].mxu0 }
 0x1b1   :  { %v3248_v20 = vadd.f32 %v1984_v19, %v1903_v17  ;;  %v1986_v21 = vpop.f32.mrb[1].mxu0 }
 0x1b2   :  { %v3250_v22 = vadd.f32 %v1986_v21, %v1905_v18  ;;  %v1988_v14 = vpop.f32.mrb[2].mxu0 }
 0x1b3   :  { %v2237_v23 = vmin.f32 %v3248_v20, 20.0  ;;  %v1989_v24 = vpop.f32.mrb[3].mxu0  ;;  %vm2285_vm0 = vcmp.gt.f32.partialorder %v3248_v20, 20.0 }
 0x1b4   :  { %v2238_v25 = vmin.f32 %v3250_v22, 20.0  ;;  %vm2286_vm1 = vcmp.gt.f32.partialorder %v3250_v22, 20.0 }
 0x1b5   :  { %v2243_v26 = vmul.f32 1.442695, %v2237_v23 }
 0x1b6   :  { %v2245_v27 = vmul.f32 1.442695, %v2238_v25 }
 0x1b7   :  { %3771 = vpow2.f32 %v2243_v26 }
 0x1b8   :  { %3773 = vpow2.f32 %v2245_v27 }
 0x1c1   :  { %v3772_v29 = vpop.eup %3771 }
 0x1c2   :  { %v3774_v30 = vpop.eup %3773  ;;  %v2255_v31 = vadd.f32 2.0, %v3772_v29 }
 0x1c3   :  { %v2256_v47 = vadd.f32 2.0, %v3774_v30 }
 0x1c4   :  { %v2261_v6 = vmul.f32 %v3772_v29, %v2255_v31 }
 0x1c5   :  { %v2262_v32 = vmul.f32 %v3774_v30, %v2256_v47  ;;  %v3756_v47 = vld [vmem:[#allocation8 + $0x100] sm:$0xff]  }
 0x1c6   :  { %v2267_v7 = vadd.f32 2.0, %v2261_v6 }
 0x1c7   :  { %v2268_v33 = vadd.f32 2.0, %v2262_v32 }
 0x1c8   :  { %3775 = vrcp.f32 %v2267_v7  ;;  %v3758_v7 = vld [vmem:[#allocation8 + $0x108] sm:$0xff]  }
 0x1c9   :  { %3777 = vrcp.f32 %v2268_v33  ;;  %v3759_v33 = vld [vmem:[#allocation8 + $0x150] sm:$0xff]  }
 0x1d2   :  { %v3776_v34 = vpop.eup %3775 }
 0x1d3   :  { %v3778_v35 = vpop.eup %3777  ;;  %v2279_v36 = vmul.f32 %v3776_v34, %v2261_v6  ;;  %v3760_v34 = vld [vmem:[#allocation8 + $0x110] sm:$0xff]  }
 0x1d4   :  { %v2280_v37 = vmul.f32 %v3778_v35, %v2262_v32  ;;  %v3757_v32 = vld [vmem:[#allocation8 + $0x148] sm:$0xff]   ;;  %v3761_v35 = vld [vmem:[#allocation8 + $0x158] sm:$0xff]  }
 0x1d5   :  { %v2291_v38 = vmul.f32 %v3248_v20, %v2279_v36  ;;  %v3762_v36 = vld [vmem:[#allocation8 + $0x118] sm:$0xff]  }
 0x1d6   :  { %v2292_v51 = vmul.f32 %v3250_v22, %v2280_v37  ;;  %v3763_v37 = vld [vmem:[#allocation8 + $0x160] sm:$0xff]  }
 0x1d7   :  { %v2297_v39 = vsel %vm2285_vm0, %v3248_v20, %v2291_v38  ;;  %v395_v38 = vsub.s32 4, %v4071_v10 }
 0x1d8   :  { %v2298_v40 = vsel %vm2286_vm1, %v3250_v22, %v2292_v51  ;;  %v2303_v43 = vpack.c.bf16 %v2297_v39, %v2297_v39  ;;  %v3764_v51 = vld [vmem:[#allocation8 + $0x120] sm:$0xff]   ;;  %v399_v39 = vsub.s32 5, %v4071_v10 }
 0x1d9   :  { %v2304_v41 = vpack.c.bf16 %v2298_v40, %v2298_v40  ;;  %v3765_v40 = vld [vmem:[#allocation8 + $0x168] sm:$0xff]  }
 0x1db   :  { %2732 = vmatprep.mubr.bf16.mxu1 %v2304_v41  ;;  %v396_v41 = vrot.slane %v4074_v12, %v395_v38 }
 0x1dc   :  { %2733 = vmatmul.mubr.bf16.vlgmr.msra.gmra.mrb[8].mxu1 %v2303_v43  ;;  %v400_v43 = vrot.slane %v4074_v12, %v399_v39 }
 0x1dd   :  { %3204 = vmatpush3.bf16.msra.mxu1 %v3740_v42  ;;  %v3766_v42 = vld [vmem:[#allocation8 + $0x128] sm:$0xff]  }
 0x1de   :  { %3205 = vmatprep.subr.bf16.mxu1 %v3741_v44  ;;  %v3767_v44 = vld [vmem:[#allocation8 + $0x170] sm:$0xff]  }
 0x1e1   :  { %3206 = vmatpush3.bf16.msra.mxu1 %v3742_v45 }
 0x1e2   :  { %3207 = vmatprep.subr.bf16.mxu1 %v3743_v46 }
 0x1e5   :  { %3208 = vmatpush3.bf16.msra.mxu1 %v3744_v48 }
 0x1e6   :  { %3209 = vmatprep.subr.bf16.mxu1 %v3745_v49  ;;  %v3768_v49 = vld [vmem:[#allocation8 + $0x130] sm:$0xff]  }
 0x1e9   :  { %3210 = vmatpush3.bf16.msra.mxu1 %v3746_v50 }
 0x1ea   :  { %3211 = vmatprep.subr.bf16.mxu1 %v3747_v52 }
 0x1ed   :  { %3212 = vmatpush3.bf16.msra.mxu1 %v3748_v53  ;;  %v3769_v53 = vld [vmem:[#allocation8 + $0x178] sm:$0xff]  }
 0x1ee   :  { %3213 = vmatprep.subr.bf16.mxu1 %v3749_v54 }
 0x1f1   :  { %3214 = vmatpush3.bf16.msra.mxu1 %v3750_v55 }
 0x1f2   :  { %3215 = vmatprep.subr.bf16.mxu1 %v3751_v56 }
 0x1f5   :  { %3216 = vmatpush3.bf16.msra.mxu1 %v3752_v57  ;;  %v3770_v57 = vld [vmem:[#allocation8 + $0x138] sm:$0xff]  }
 0x1f6   :  { %3217 = vmatprep.subr.bf16.mxu1 %v3753_v58 }
 0x1f9   :  { %3218 = vmatpush3.bf16.msra.mxu1 %v3754_v59 }
 0x1fa   :  { %3225 = vmatprep.subr.bf16.mxu1 %v3755_v60 }
 0x22f   :  { %v2107_v1 = vpop.f32.mrb[4].mxu1 }
 0x230   :  { %v3251_v2 = vadd.f32 %v2107_v1, %v388_v63  ;;  %v2109_v3 = vpop.f32.mrb[5].mxu1 }
 0x231   :  { %v3252_v4 = vadd.f32 %v2109_v3, %v392_v0  ;;  %v2111_v5 = vpop.f32.mrb[6].mxu1 }
 0x232   :  { %v2239_v8 = vmin.f32 %v3251_v2, 20.0  ;;  %v2112_v9 = vpop.f32.mrb[7].mxu1  ;;  %vm2287_vm2 = vcmp.gt.f32.partialorder %v3251_v2, 20.0 }
 0x233   :  { %v2240_v11 = vmin.f32 %v3252_v4, 20.0  ;;  %vm2288_vm3 = vcmp.gt.f32.partialorder %v3252_v4, 20.0 }
 0x234   :  { %v2247_v13 = vmul.f32 1.442695, %v2239_v8 }
 0x235   :  { %v2249_v15 = vmul.f32 1.442695, %v2240_v11 }
 0x236   :  { %3779 = vpow2.f32 %v2247_v13 }
 0x237   :  { %3781 = vpow2.f32 %v2249_v15 }
 0x240   :  { %v3780_v16 = vpop.eup %3779 }
 0x241   :  { %v3782_v17 = vpop.eup %3781  ;;  %v2257_v18 = vadd.f32 2.0, %v3780_v16 }
 0x242   :  { %v2258_v19 = vadd.f32 2.0, %v3782_v17 }
 0x243   :  { %v2263_v20 = vmul.f32 %v3780_v16, %v2257_v18 }
 0x244   :  { %v2264_v21 = vmul.f32 %v3782_v17, %v2258_v19 }
 0x245   :  { %v2269_v22 = vadd.f32 2.0, %v2263_v20 }
 0x246   :  { %v2270_v14 = vadd.f32 2.0, %v2264_v21 }
 0x247   :  { %3783 = vrcp.f32 %v2269_v22  ;;  %v3132_v22 = vld [vmem:[#allocation10] ss:$0 sm:$0xff] }
 0x248   :  { %3785 = vrcp.f32 %v2270_v14 }
 0x251   :  { %v3784_v23 = vpop.eup %3783 }
 0x252   :  { %v3786_v24 = vpop.eup %3785  ;;  %v2281_v25 = vmul.f32 %v3784_v23, %v2263_v20 }
 0x253   :  { %v2282_v26 = vmul.f32 %v3786_v24, %v2264_v21 }
 0x254   :  { %v2293_v27 = vmul.f32 %v3251_v2, %v2281_v25 }
 0x255   :  { %v2294_v28 = vmul.f32 %v3252_v4, %v2282_v26 }
 0x256   :  { %v2299_v29 = vsel %vm2287_vm2, %v3251_v2, %v2293_v27 }
 0x257   :  { %v2300_v30 = vsel %vm2288_vm3, %v3252_v4, %v2294_v28  ;;  %v2305_v6 = vpack.c.bf16 %v2299_v29, %v2299_v29 }
 0x258   :  { %v2306_v31 = vpack.c.bf16 %v2300_v30, %v2300_v30 }
 0x25a   :  { %2772 = vmatprep.mubr.bf16.mxu1 %v2306_v31 }
 0x25b   :  { %2773 = vmatmul.mubr.bf16.vlgmr.msra.gmra.mrb[12].mxu1 %v2305_v6 }
 0x25c   :  { %3226 = vmatpush3.bf16.msra.mxu1 %v3756_v47 }
 0x25d   :  { %3227 = vmatprep.subr.bf16.mxu1 %v3757_v32 }
 0x260   :  { %3228 = vmatpush3.bf16.msra.mxu1 %v3758_v7 }
 0x261   :  { %3229 = vmatprep.subr.bf16.mxu1 %v3759_v33 }
 0x264   :  { %3230 = vmatpush3.bf16.msra.mxu1 %v3760_v34 }
 0x265   :  { %3231 = vmatprep.subr.bf16.mxu1 %v3761_v35 }
 0x268   :  { %3232 = vmatpush3.bf16.msra.mxu1 %v3762_v36 }
 0x269   :  { %3233 = vmatprep.subr.bf16.mxu1 %v3763_v37 }
 0x26c   :  { %3234 = vmatpush3.bf16.msra.mxu1 %v3764_v51 }
 0x26d   :  { %3235 = vmatprep.subr.bf16.mxu1 %v3765_v40 }
 0x270   :  { %v2230_v45 = vpop.f32.mrb[4].mxu0  ;;  %3236 = vmatpush3.bf16.msra.mxu1 %v3766_v42 }
 0x271   :  { %v3253_v46 = vadd.f32 %v2230_v45, %v396_v41  ;;  %v2232_v48 = vpop.f32.mrb[5].mxu0  ;;  %3237 = vmatprep.subr.bf16.mxu1 %v3767_v44 }
 0x272   :  { %v3254_v50 = vadd.f32 %v2232_v48, %v400_v43  ;;  %v2234_v52 = vpop.f32.mrb[6].mxu0 }
 0x273   :  { %v2241_v10 = vmin.f32 %v3253_v46, 20.0  ;;  %v2235_v54 = vpop.f32.mrb[7].mxu0  ;;  %vm2289_vm4 = vcmp.gt.f32.partialorder %v3253_v46, 20.0 }
 0x274   :  { %v2242_v55 = vmin.f32 %v3254_v50, 20.0  ;;  %3238 = vmatpush3.bf16.msra.mxu1 %v3768_v49  ;;  %vm2290_vm5 = vcmp.gt.f32.partialorder %v3254_v50, 20.0 }
 0x275   :  { %v2251_v56 = vmul.f32 1.442695, %v2241_v10  ;;  %3239 = vmatprep.subr.bf16.mxu1 %v3769_v53 }
 0x276   :  { %v2253_v58 = vmul.f32 1.442695, %v2242_v55 }
 0x277   :  { %3787 = vpow2.f32 %v2251_v56 }
 0x278   :  { %3789 = vpow2.f32 %v2253_v58  ;;  %3240 = vmatpush3.bf16.msra.mxu1 %v3770_v57 }
 0x281   :  { %v3788_v12 = vpop.eup %3787 }
 0x282   :  { %v3790_v59 = vpop.eup %3789  ;;  %v2259_v60 = vadd.f32 2.0, %v3788_v12 }
 0x283   :  { %v2260_v61 = vadd.f32 2.0, %v3790_v59 }
 0x284   :  { %v2265_v62 = vmul.f32 %v3788_v12, %v2259_v60 }
 0x285   :  { %v2266_v63 = vmul.f32 %v3790_v59, %v2260_v61 }
 0x286   :  { %v2271_v0 = vadd.f32 2.0, %v2265_v62 }
 0x287   :  { %v2272_v1 = vadd.f32 2.0, %v2266_v63 }
 0x288   :  { %3791 = vrcp.f32 %v2271_v0 }
 0x289   :  { %3793 = vrcp.f32 %v2272_v1 }
 0x292   :  { %v3792_v2 = vpop.eup %3791 }
 0x293   :  { %v3794_v3 = vpop.eup %3793  ;;  %v2283_v4 = vmul.f32 %v3792_v2, %v2265_v62 }
 0x294   :  { %v2284_v5 = vmul.f32 %v3794_v3, %v2266_v63 }
 0x295   :  { %v2295_v8 = vmul.f32 %v3253_v46, %v2283_v4 }
 0x296   :  { %v2296_v9 = vmul.f32 %v3254_v50, %v2284_v5 }
 0x297   :  { %v2301_v11 = vsel %vm2289_vm4, %v3253_v46, %v2295_v8 }
 0x298   :  { %v2302_v13 = vsel %vm2290_vm5, %v3254_v50, %v2296_v9  ;;  %v2307_v16 = vpack.c.bf16 %v2301_v11, %v2301_v11 }
 0x299   :  { %v2308_v15 = vpack.c.bf16 %v2302_v13, %v2302_v13 }
 0x29b   :  { %2812 = vmatprep.mubr.bf16.mxu1 %v2308_v15 }
 0x29c   :  { %2813 = vmatmul.mubr.bf16.vlgmr.msra.gmra.mrb[16].mxu1 %v2307_v16 }
 0x2af   :  { %v3197_v17 = vpop.f32.mrb[8].mxu1 }
 0x2b0   :  { %v3198_v18 = vpop.f32.mrb[9].mxu1 }
 0x2b1   :  { %v3199_v19 = vadd.f32 %v3198_v18, %v3197_v17  ;;  %v3200_v20 = vpop.f32.mrb[10].mxu1 }
 0x2b2   :  { %v3201_v21 = vpop.f32.mrb[11].mxu1 }
 0x2b3   :  { %v2735_v24 = vadd.f32 %v3199_v19, %v3132_v22 }
 0x32e   :  { %v3219_v14 = vpop.f32.mrb[12].mxu1 }
 0x32f   :  { %v3220_v23 = vpop.f32.mrb[13].mxu1 }
 0x330   :  { %v3221_v25 = vadd.f32 %v3220_v23, %v3219_v14  ;;  %v3222_v26 = vpop.f32.mrb[14].mxu1 }
 0x331   :  { %v3223_v27 = vpop.f32.mrb[15].mxu1 }
 0x332   :  { %v2775_v28 = vadd.f32 %v3221_v25, %v2735_v24 }
 0x36f   :  { %v3241_v29 = vpop.f32.mrb[16].mxu1 }
 0x370   :  { %v3242_v30 = vpop.f32.mrb[17].mxu1 }
 0x371   :  { %v3243_v31 = vadd.f32 %v3242_v30, %v3241_v29  ;;  %v3244_v47 = vpop.f32.mrb[18].mxu1 }
 0x372   :  { %v3245_v6 = vpop.f32.mrb[19].mxu1 }
 0x373   :  { %v2815_v32 = vadd.f32 %v3243_v31, %v2775_v28 }
 0x375   :  { %2820 = vst [vmem:[#allocation11] sm:$0xff] %v2815_v32 }
 0x376   :  { %3916 = shalt.err (!%p3913_p2)
}
 0x377   :  { %s3917_s6 = scalar_lea.hbm %s4104_s5, 128 }
 0x378   :  { %p3918_p3 = scmp.ne.s32.totalorder %s4104_s5, %s3917_s6  ;;  %p3921_p4 = scmp.lt.u32.totalorder %s3917_s6, %s4104_s5 }
 0x37a   :  { %p3923_p5 = pnand %p3921_p4, %p3918_p3 }
 0x37c   :  { %3926 = shalt.err (!%p3923_p5)
}
 0x37d   :  { %2830 = dma.vmem_to_hbm [thread:$0]  %s2828_s28, 128, %s4104_s5, [#allocation4]  }
 0x37e   :  { %3933 = dma.done.wait [#allocation4], 128  }
 0x37f   :  { %3934 = vsyncadd [#allocation4], 4294967168 }
 0x380   :  { %2834 = vsyncpa [#allocation3], 1 }
 0x381   :  { %2835 = vsyncpa [#allocation6], 1 }
 0x382   :  { %2836 = vsyncpa [#allocation9], 1 }
 0x383   :  { %2837 = vsyncpa [#allocation4], 1 }

</bundles_post_ra>
